<compile_context>
chip_gen: v7x
topology: tpu7x:2x2x1
jax: 0.10.0
libtpu: 0.0.40
codegen_flags: <defaults>
</compile_context>

<pallas_src>
import numpy as np
import jax
import jax.numpy as jnp
from jax import lax
from jax.experimental import pallas as pl
from jax.experimental.pallas import tpu as pltpu


# ----------------------------------------------------------------------------
# Fused Pallas kernel: hoisted input projection + stacked bi-directional LSTM
# recurrence + v-projection + score combine + masked softmax, one launch.
# ----------------------------------------------------------------------------
def _bilstm_att_kernel(x_ref, wih_ref, whh_ref, b_ref, v_ref, umask_ref,
                       pmask_ref, o_ref, gx_scr):
    L, B, H2 = umask_ref.shape          # H2 = 2 * hid_dim  (carry = [h_fwd | h_bwd])
    H = H2 // 2
    G = whh_ref.shape[1]                # 4 * H2 combined gate width

    # --- hoisted: input projection (+bias) for ALL timesteps, one MXU pass ---
    gx_scr[...] = (
        jnp.dot(x_ref[...], wih_ref[...], preferred_element_type=jnp.float32)
        + b_ref[...])

    # --- loop-invariant loads / constants (hoisted out of the serial loop) ---
    whh = whh_ref[...]                                      # (H2, G)
    v = v_ref[...]                                          # (1, H2) = [v_fwd | v_bwd]
    gate_idx = lax.broadcasted_iota(jnp.int32, (B, G), 1)
    is_g = (gate_idx >= 2 * H2) & (gate_idx < 3 * H2)       # tanh ('g') gate lanes
    pos = lax.broadcasted_iota(jnp.int32, (B, L), 1)        # output lane positions

    def step(s, carry):
        h, c, scores = carry
        row0 = pl.multiple_of(s * B, B)
        gx = gx_scr[pl.ds(row0, B), :]                                   # (B, G)
        gates = gx + jnp.dot(h, whh, preferred_element_type=jnp.float32)
        # full-vreg nonlinearities + lane-mask blend (no quarter-width EUP ops)
        sig = jax.nn.sigmoid(gates)
        th = jnp.tanh(gates)
        act = jnp.where(is_g, th, sig)
        i_g = act[:, 0 * H2:1 * H2]
        f_g = act[:, 1 * H2:2 * H2]
        g_g = act[:, 2 * H2:3 * H2]
        o_g = act[:, 3 * H2:4 * H2]
        # update mask: fwd half always updates; bwd half only once its sequence
        # has started (pack_padded emulation).  Masked bwd state stays exactly 0.
        m = umask_ref[s]                                                 # (B, H2)
        c = m * (f_g * c + i_g * g_g)
        h = m * (o_g * jnp.tanh(c))
        # v-projection: fwd score belongs to position s, bwd score to L-1-s
        prod = h * v
        sc_f = jnp.sum(prod[:, :H], axis=-1, keepdims=True)             # (B, 1)
        sc_b = jnp.sum(prod[:, H:], axis=-1, keepdims=True)             # (B, 1)
        scores = (scores
                  + jnp.where(pos == s, sc_f, 0.0)
                  + jnp.where(pos == (L - 1 - s), sc_b, 0.0))
        return h, c, scores

    init = (jnp.zeros((B, H2), jnp.float32),
            jnp.zeros((B, H2), jnp.float32),
            jnp.zeros((B, L), jnp.float32))
    _, _, scores = lax.fori_loop(0, L, step, init, unroll=True)

    # masked fill (faithful to the PyTorch source: 1e-10, not -inf) + row softmax
    scores = jnp.where(pmask_ref[...] > 0.0, jnp.float32(1e-10), scores)
    smax = jnp.max(scores, axis=-1, keepdims=True)
    e = jnp.exp(scores - smax)
    o_ref[...] = e / jnp.sum(e, axis=-1, keepdims=True)                  # (B, L)


# ----------------------------------------------------------------------------
# Parameters (deterministic synthetic init, mirroring the module's shapes)
# ----------------------------------------------------------------------------
def init_params(key, vocab, emb_dim, hid_dim, in_dim):
    ks = jax.random.split(key, 12)
    s = 1.0 / np.sqrt(hid_dim)
    u = lambda k, shape: jax.random.uniform(k, shape, jnp.float32, -s, s)
    return dict(
        emb_table=0.1 * jax.random.normal(ks[0], (vocab, emb_dim), jnp.float32),
        uni_stat=jax.random.uniform(ks[1], (vocab,), jnp.float32),
        ent_stat=jax.random.uniform(ks[2], (vocab,), jnp.float32),
        # PyTorch LSTM layout: weight_ih (4H, D_in), weight_hh (4H, H), gates i,f,g,o
        w_ih_f=u(ks[3], (4 * hid_dim, in_dim)),
        w_hh_f=u(ks[4], (4 * hid_dim, hid_dim)),
        b_ih_f=u(ks[5], (4 * hid_dim,)),
        b_hh_f=u(ks[6], (4 * hid_dim,)),
        w_ih_b=u(ks[7], (4 * hid_dim, in_dim)),
        w_hh_b=u(ks[8], (4 * hid_dim, hid_dim)),
        b_ih_b=u(ks[9], (4 * hid_dim,)),
        b_hh_b=u(ks[10], (4 * hid_dim,)),
        v_w=u(ks[11], (1, 2 * hid_dim)),                    # nn.Linear(2H, 1, bias=False)
    )


# ----------------------------------------------------------------------------
# Wrapper-side prep: embeddings/stats, time-major flip, block-diagonal combined
# weights, per-step backward start mask, pad mask.
# ----------------------------------------------------------------------------
def _split_gates(w, H):
    return [w[k * H:(k + 1) * H] for k in range(4)]


def build_rnn_input(params, x_tokens):
    emb = params['emb_table'][x_tokens]                               # (B, L, E)
    u = params['uni_stat'][x_tokens][..., None]                       # (B, L, 1)
    t = params['ent_stat'][x_tokens][..., None]                       # (B, L, 1)
    return jnp.concatenate([emb, u, t], axis=-1)                      # (B, L, Din)


def prepare_fused_inputs(params, x_tokens, input_len, pad_idx):
    B, L = x_tokens.shape
    H = params['w_hh_f'].shape[1]
    rnn_input = build_rnn_input(params, x_tokens)
    Din = rnn_input.shape[-1]

    x_fwd = jnp.transpose(rnn_input, (1, 0, 2))                       # (L, B, Din)
    x_rev = x_fwd[::-1]                                               # uniform time flip
    x_flat = jnp.concatenate([x_fwd, x_rev], axis=-1).reshape(L * B, 2 * Din)

    # combined gate layout: [i_f i_b | f_f f_b | g_f g_b | o_f o_b], sub-blocks H wide
    wih_f, wih_b = _split_gates(params['w_ih_f'], H), _split_gates(params['w_ih_b'], H)
    whh_f, whh_b = _split_gates(params['w_hh_f'], H), _split_gates(params['w_hh_b'], H)
    zDH = jnp.zeros((Din, H), jnp.float32)
    zHH = jnp.zeros((H, H), jnp.float32)
    wih_cols, whh_cols = [], []
    for k in range(4):
        wih_cols.append(jnp.concatenate([
            jnp.concatenate([wih_f[k].T, zDH], axis=1),
            jnp.concatenate([zDH, wih_b[k].T], axis=1)], axis=0))     # (2Din, 2H)
        whh_cols.append(jnp.concatenate([
            jnp.concatenate([whh_f[k].T, zHH], axis=1),
            jnp.concatenate([zHH, whh_b[k].T], axis=1)], axis=0))     # (2H, 2H)
    wih_comb = jnp.concatenate(wih_cols, axis=1)                      # (2Din, 8H)
    whh_comb = jnp.concatenate(whh_cols, axis=1)                      # (2H, 8H)

    bf = params['b_ih_f'] + params['b_hh_f']
    bb = params['b_ih_b'] + params['b_hh_b']
    b_comb = jnp.concatenate(
        [jnp.concatenate([bf[k * H:(k + 1) * H], bb[k * H:(k + 1) * H]])
         for k in range(4)])[None, :]                                 # (1, 8H)

    # backward "started" mask: at combined step s the bwd half sees original
    # position L-1-s; it starts (from zero state) only once that position is valid.
    steps = jnp.arange(L)[:, None]                                    # (L, 1)
    started = (steps >= (L - input_len)[None, :]).astype(jnp.float32) # (L, B)
    umask = jnp.concatenate(
        [jnp.ones((L, B, H), jnp.float32),
         jnp.broadcast_to(started[..., None], (L, B, H))], axis=-1)   # (L, B, 2H)

    pmask = (x_tokens == pad_idx).astype(jnp.float32)                 # (B, L)
    return dict(x_flat=x_flat, wih=wih_comb, whh=whh_comb, b=b_comb,
                v=params['v_w'], umask=umask, pmask=pmask)


def att_generator_forward(params, x_tokens, input_len, pad_idx):
    B, L = x_tokens.shape
    H = params['w_hh_f'].shape[1]
    p = prepare_fused_inputs(params, x_tokens, input_len, pad_idx)
    return pl.pallas_call(
        _bilstm_att_kernel,
        out_shape=jax.ShapeDtypeStruct((B, L), jnp.float32),
        grid=(1,),
        in_specs=[
            pl.BlockSpec(p['x_flat'].shape, lambda i: (0, 0)),
            pl.BlockSpec(p['wih'].shape, lambda i: (0, 0)),
            pl.BlockSpec(p['whh'].shape, lambda i: (0, 0)),
            pl.BlockSpec(p['b'].shape, lambda i: (0, 0)),
            pl.BlockSpec(p['v'].shape, lambda i: (0, 0)),
            pl.BlockSpec(p['umask'].shape, lambda i: (0, 0, 0)),
            pl.BlockSpec(p['pmask'].shape, lambda i: (0, 0)),
        ],
        out_specs=pl.BlockSpec((B, L), lambda i: (0, 0)),
        scratch_shapes=[pltpu.VMEM((L * B, 8 * H), jnp.float32)],
        compiler_params=pltpu.CompilerParams(dimension_semantics=("arbitrary",)),
    )(p['x_flat'], p['wih'], p['whh'], p['b'], p['v'], p['umask'], p['pmask'])


# ----------------------------------------------------------------------------
# Pure-JAX reference (per-direction lax.scan LSTM, PyTorch-layout weights) —
# independent of the block-diagonal combination, for correctness checking.
# ----------------------------------------------------------------------------
def _ref_lstm_dir(x_tm, wih_T, whh_T, b, H):
    B = x_tm.shape[1]

    def stepf(carry, x_t):
        h, c = carry
        gates = x_t @ wih_T + h @ whh_T + b
        i = jax.nn.sigmoid(gates[:, :H])
        f = jax.nn.sigmoid(gates[:, H:2 * H])
        g = jnp.tanh(gates[:, 2 * H:3 * H])
        o = jax.nn.sigmoid(gates[:, 3 * H:])
        c = f * c + i * g
        h = o * jnp.tanh(c)
        return (h, c), h

    init = (jnp.zeros((B, H), jnp.float32), jnp.zeros((B, H), jnp.float32))
    _, hs = lax.scan(stepf, init, x_tm)
    return hs                                                          # (L, B, H)


def reference_forward(params, x_tokens, input_len, pad_idx):
    B, L = x_tokens.shape
    H = params['w_hh_f'].shape[1]
    rnn_input = build_rnn_input(params, x_tokens)
    D = rnn_input.shape[-1]

    pos = jnp.arange(L)[None, :]
    rev_idx = jnp.clip(input_len[:, None] - 1 - pos, 0, L - 1)         # (B, L)
    valid = (pos < input_len[:, None]).astype(jnp.float32)

    x_fwd = jnp.transpose(rnn_input, (1, 0, 2))
    x_bwd_bm = jnp.take_along_axis(
        rnn_input, jnp.broadcast_to(rev_idx[..., None], (B, L, D)), axis=1)
    x_bwd = jnp.transpose(x_bwd_bm * valid[..., None], (1, 0, 2))

    b_f = (params['b_ih_f'] + params['b_hh_f'])[None, :]
    b_b = (params['b_ih_b'] + params['b_hh_b'])[None, :]
    hs_f = _ref_lstm_dir(x_fwd, params['w_ih_f'].T, params['w_hh_f'].T, b_f, H)
    hs_b = _ref_lstm_dir(x_bwd, params['w_ih_b'].T, params['w_hh_b'].T, b_b, H)
    sc_f = jnp.einsum('lbh,h->bl', hs_f, params['v_w'][0, :H])
    sc_b_rev = jnp.einsum('lbh,h->bl', hs_b, params['v_w'][0, H:])
    sc_b = jnp.take_along_axis(sc_b_rev, rev_idx, axis=1)
    scores = sc_f + sc_b
    scores = jnp.where(x_tokens == pad_idx, jnp.float32(1e-10), scores)
    return jax.nn.softmax(scores, axis=-1)


# ----------------------------------------------------------------------------
if __name__ == "__main__":
    # small config consistent with the module: N*K=8 docs, max_len=16,
    # fastText-like emb_dim=30 (+1 uni stat +1 ent stat => in_dim=32), hid_dim=32
    B, L, EMB, HID, VOCAB, PAD = 8, 16, 30, 32, 50, 0
    IN_DIM = EMB + 1 + 1                                               # args.use_stat

    key = jax.random.PRNGKey(0)
    k_par, k_tok = jax.random.split(key)
    params = init_params(k_par, VOCAB, EMB, HID, IN_DIM)

    # lengths sorted descending (pack_padded_sequence enforce_sorted), longest = L
    input_len = jnp.array([16, 14, 12, 10, 8, 6, 4, 3], dtype=jnp.int32)
    tokens = jax.random.randint(k_tok, (B, L), 1, VOCAB, dtype=jnp.int32)
    pos = jnp.arange(L)[None, :]
    x_tokens = jnp.where(pos < input_len[:, None], tokens, PAD)        # pad beyond length

    out = att_generator_forward(params, x_tokens, input_len, PAD)
    out = jax.block_until_ready(out)

    ref = jax.block_until_ready(reference_forward(params, x_tokens, input_len, PAD))
    assert out.shape == (B, L)
    np.testing.assert_allclose(np.asarray(out), np.asarray(ref), rtol=3e-4, atol=3e-4)
    # rows sum to 1 (softmax over sequence positions)
    np.testing.assert_allclose(np.asarray(out).sum(-1), np.ones(B), rtol=1e-4, atol=1e-4)

    print("KERNEL_OK")
</pallas_src>

<mosaic_0001>
module attributes {stable_mosaic.version = 11 : i64} {
  func.func @_bilstm_att_kernel(%arg0: i32, %arg1: memref<128x64xf32, #tpu.memory_space<vmem>>, %arg2: memref<64x256xf32, #tpu.memory_space<vmem>>, %arg3: memref<64x256xf32, #tpu.memory_space<vmem>>, %arg4: memref<1x256xf32, #tpu.memory_space<vmem>>, %arg5: memref<1x64xf32, #tpu.memory_space<vmem>>, %arg6: memref<16x8x64xf32, #tpu.memory_space<vmem>>, %arg7: memref<8x16xf32, #tpu.memory_space<vmem>>, %arg8: memref<8x16xf32, #tpu.memory_space<vmem>>, %arg9: memref<128x256xf32, #tpu.memory_space<vmem>>) attributes {dimension_semantics = [#tpu.dimension_semantics<arbitrary>], iteration_bounds = array<i64: 1>, scalar_prefetch = 0 : i64, scratch_operands = 1 : i64, tpu.core_type = #tpu.core_type<tc>, window_params = [{pipeline_mode = #tpu.pipeline_mode<synchronous>, transform_indices = @transform_0, window_bounds = array<i64: 128, 64>}, {pipeline_mode = #tpu.pipeline_mode<synchronous>, transform_indices = @transform_1, window_bounds = array<i64: 64, 256>}, {pipeline_mode = #tpu.pipeline_mode<synchronous>, transform_indices = @transform_2, window_bounds = array<i64: 64, 256>}, {pipeline_mode = #tpu.pipeline_mode<synchronous>, transform_indices = @transform_3, window_bounds = array<i64: 1, 256>}, {pipeline_mode = #tpu.pipeline_mode<synchronous>, transform_indices = @transform_4, window_bounds = array<i64: 1, 64>}, {pipeline_mode = #tpu.pipeline_mode<synchronous>, transform_indices = @transform_5, window_bounds = array<i64: 16, 8, 64>}, {pipeline_mode = #tpu.pipeline_mode<synchronous>, transform_indices = @transform_6, window_bounds = array<i64: 8, 16>}, {pipeline_mode = #tpu.pipeline_mode<synchronous>, transform_indices = @transform_7, window_bounds = array<i64: 8, 16>}]} {
    %c0 = arith.constant 0 : index
    %c0_0 = arith.constant 0 : index
    %0 = vector.load %arg1[%c0, %c0_0] : memref<128x64xf32, #tpu.memory_space<vmem>>, vector<128x64xf32>
    %c0_1 = arith.constant 0 : index
    %c0_2 = arith.constant 0 : index
    %1 = vector.load %arg2[%c0_1, %c0_2] : memref<64x256xf32, #tpu.memory_space<vmem>>, vector<64x256xf32>
    %cst = arith.constant dense<0.000000e+00> : vector<128x256xf32>
    %2 = tpu.matmul %0, %1, %cst {dimension_numbers = #tpu.dot_dimension_numbers<[1], [0], [0], [1], [0, 0, 1, 1], [], []>} : vector<128x64xf32>, vector<64x256xf32>, vector<128x256xf32> -> vector<128x256xf32>
    %c0_3 = arith.constant 0 : index
    %c0_4 = arith.constant 0 : index
    %3 = vector.load %arg4[%c0_3, %c0_4] : memref<1x256xf32, #tpu.memory_space<vmem>>, vector<1x256xf32>
    %4 = vector.broadcast %3 : vector<1x256xf32> to vector<128x256xf32>
    %5 = arith.addf %2, %4 : vector<128x256xf32>
    %c0_5 = arith.constant 0 : index
    %c0_6 = arith.constant 0 : index
    %6 = vector.load %arg9[%c0_5, %c0_6] : memref<128x256xf32, #tpu.memory_space<vmem>>, vector<128x256xf32>
    tpu.vector_store %arg9[%c0_5, %c0_6], %5 {strides = array<i32>} : memref<128x256xf32, #tpu.memory_space<vmem>>, vector<128x256xf32>,
    %c0_7 = arith.constant 0 : index
    %c0_8 = arith.constant 0 : index
    %7 = vector.load %arg3[%c0_7, %c0_8] : memref<64x256xf32, #tpu.memory_space<vmem>>, vector<64x256xf32>
    %c0_9 = arith.constant 0 : index
    %c0_10 = arith.constant 0 : index
    %8 = vector.load %arg5[%c0_9, %c0_10] : memref<1x64xf32, #tpu.memory_space<vmem>>, vector<1x64xf32>
    %9 = tpu.iota {dimensions = array<i32: 1>} : vector<8x256xi32>
    %c128_i32 = arith.constant 128 : i32
    %10 = vector.broadcast %c128_i32 : i32 to vector<8x256xi32>
    %11 = arith.cmpi sge, %9, %10 : vector<8x256xi32>
    %c192_i32 = arith.constant 192 : i32
    %12 = vector.broadcast %c192_i32 : i32 to vector<8x256xi32>
    %13 = arith.cmpi slt, %9, %12 : vector<8x256xi32>
    %14 = arith.andi %11, %13 : vector<8x256xi1>
    %15 = tpu.iota {dimensions = array<i32: 1>} : vector<8x16xi32>
    %cst_11 = arith.constant 0.000000e+00 : f32
    %16 = vector.broadcast %cst_11 : f32 to vector<8x64xf32>
    %cst_12 = arith.constant 0.000000e+00 : f32
    %17 = vector.broadcast %cst_12 : f32 to vector<8x64xf32>
    %cst_13 = arith.constant 0.000000e+00 : f32
    %18 = vector.broadcast %cst_13 : f32 to vector<8x16xf32>
    %c0_i32 = arith.constant 0 : i32
    %c8_i32 = arith.constant 8 : i32
    %19 = arith.muli %c0_i32, %c8_i32 : i32
    %20 = tpu.assume_multiple %19, 8 : i32
    %21 = arith.index_cast %20 : i32 to index
    %c0_14 = arith.constant 0 : index
    %22 = vector.load %arg9[%21, %c0_14] : memref<128x256xf32, #tpu.memory_space<vmem>>, vector<8x256xf32>
    %cst_15 = arith.constant dense<0.000000e+00> : vector<8x256xf32>
    %23 = tpu.matmul %16, %7, %cst_15 {dimension_numbers = #tpu.dot_dimension_numbers<[1], [0], [0], [1], [0, 0, 1, 1], [], []>} : vector<8x64xf32>, vector<64x256xf32>, vector<8x256xf32> -> vector<8x256xf32>
    %24 = arith.addf %22, %23 : vector<8x256xf32>
    %25 = arith.negf %24 : vector<8x256xf32>
    %26 = math.exp %25 : vector<8x256xf32>
    %cst_16 = arith.constant 1.000000e+00 : f32
    %27 = vector.broadcast %cst_16 : f32 to vector<8x256xf32>
    %28 = arith.addf %27, %26 : vector<8x256xf32>
    %29 = arith.divf %27, %28 : vector<8x256xf32>
    %30 = math.tanh %24 : vector<8x256xf32>
    %31 = arith.select %14, %30, %29 : vector<8x256xi1>, vector<8x256xf32>
    %32 = vector.extract_strided_slice %31 {offsets = [0, 0], sizes = [8, 64], strides = [1, 1]} : vector<8x256xf32> to vector<8x64xf32>
    %33 = vector.extract_strided_slice %31 {offsets = [0, 64], sizes = [8, 64], strides = [1, 1]} : vector<8x256xf32> to vector<8x64xf32>
    %34 = vector.extract_strided_slice %31 {offsets = [0, 128], sizes = [8, 64], strides = [1, 1]} : vector<8x256xf32> to vector<8x64xf32>
    %35 = vector.extract_strided_slice %31 {offsets = [0, 192], sizes = [8, 64], strides = [1, 1]} : vector<8x256xf32> to vector<8x64xf32>
    %36 = arith.index_cast %c0_i32 : i32 to index
    %c0_17 = arith.constant 0 : index
    %c0_18 = arith.constant 0 : index
    %37 = vector.load %arg6[%36, %c0_17, %c0_18] : memref<16x8x64xf32, #tpu.memory_space<vmem>>, vector<1x8x64xf32>
    %38 = vector.shape_cast %37 : vector<1x8x64xf32> to vector<8x64xf32>
    %39 = arith.mulf %33, %17 : vector<8x64xf32>
    %40 = arith.mulf %32, %34 : vector<8x64xf32>
    %41 = arith.addf %39, %40 : vector<8x64xf32>
    %42 = arith.mulf %38, %41 : vector<8x64xf32>
    %43 = math.tanh %42 : vector<8x64xf32>
    %44 = arith.mulf %35, %43 : vector<8x64xf32>
    %45 = arith.mulf %38, %44 : vector<8x64xf32>
    %46 = vector.broadcast %8 : vector<1x64xf32> to vector<8x64xf32>
    %47 = arith.mulf %45, %46 : vector<8x64xf32>
    %48 = vector.extract_strided_slice %47 {offsets = [0, 0], sizes = [8, 32], strides = [1, 1]} : vector<8x64xf32> to vector<8x32xf32>
    %cst_19 = arith.constant dense<0.000000e+00> : vector<8xf32>
    %49 = vector.multi_reduction <add>, %48, %cst_19 [1] : vector<8x32xf32> to vector<8xf32>
    %50 = vector.shape_cast %49 : vector<8xf32> to vector<8x1xf32>
    %51 = vector.extract_strided_slice %47 {offsets = [0, 32], sizes = [8, 32], strides = [1, 1]} : vector<8x64xf32> to vector<8x32xf32>
    %cst_20 = arith.constant dense<0.000000e+00> : vector<8xf32>
    %52 = vector.multi_reduction <add>, %51, %cst_20 [1] : vector<8x32xf32> to vector<8xf32>
    %53 = vector.shape_cast %52 : vector<8xf32> to vector<8x1xf32>
    %54 = vector.broadcast %c0_i32 : i32 to vector<8x16xi32>
    %55 = arith.cmpi eq, %15, %54 : vector<8x16xi32>
    %cst_21 = arith.constant 0.000000e+00 : f32
    %56 = vector.shape_cast %50 : vector<8x1xf32> to vector<8x1xf32>
    %57 = vector.broadcast %56 : vector<8x1xf32> to vector<8x16xf32>
    %58 = vector.broadcast %cst_21 : f32 to vector<8x16xf32>
    %59 = arith.select %55, %57, %58 : vector<8x16xi1>, vector<8x16xf32>
    %60 = arith.addf %18, %59 : vector<8x16xf32>
    %c15_i32 = arith.constant 15 : i32
    %61 = arith.subi %c15_i32, %c0_i32 : i32
    %62 = vector.broadcast %61 : i32 to vector<8x16xi32>
    %63 = arith.cmpi eq, %15, %62 : vector<8x16xi32>
    %cst_22 = arith.constant 0.000000e+00 : f32
    %64 = vector.shape_cast %53 : vector<8x1xf32> to vector<8x1xf32>
    %65 = vector.broadcast %64 : vector<8x1xf32> to vector<8x16xf32>
    %66 = vector.broadcast %cst_22 : f32 to vector<8x16xf32>
    %67 = arith.select %63, %65, %66 : vector<8x16xi1>, vector<8x16xf32>
    %68 = arith.addf %60, %67 : vector<8x16xf32>
    %c1_i32 = arith.constant 1 : i32
    %c8_i32_23 = arith.constant 8 : i32
    %69 = arith.muli %c1_i32, %c8_i32_23 : i32
    %70 = tpu.assume_multiple %69, 8 : i32
    %71 = arith.index_cast %70 : i32 to index
    %c0_24 = arith.constant 0 : index
    %72 = vector.load %arg9[%71, %c0_24] : memref<128x256xf32, #tpu.memory_space<vmem>>, vector<8x256xf32>
    %cst_25 = arith.constant dense<0.000000e+00> : vector<8x256xf32>
    %73 = tpu.matmul %45, %7, %cst_25 {dimension_numbers = #tpu.dot_dimension_numbers<[1], [0], [0], [1], [0, 0, 1, 1], [], []>} : vector<8x64xf32>, vector<64x256xf32>, vector<8x256xf32> -> vector<8x256xf32>
    %74 = arith.addf %72, %73 : vector<8x256xf32>
    %75 = arith.negf %74 : vector<8x256xf32>
    %76 = math.exp %75 : vector<8x256xf32>
    %cst_26 = arith.constant 1.000000e+00 : f32
    %77 = vector.broadcast %cst_26 : f32 to vector<8x256xf32>
    %78 = arith.addf %77, %76 : vector<8x256xf32>
    %79 = arith.divf %77, %78 : vector<8x256xf32>
    %80 = math.tanh %74 : vector<8x256xf32>
    %81 = arith.select %14, %80, %79 : vector<8x256xi1>, vector<8x256xf32>
    %82 = vector.extract_strided_slice %81 {offsets = [0, 0], sizes = [8, 64], strides = [1, 1]} : vector<8x256xf32> to vector<8x64xf32>
    %83 = vector.extract_strided_slice %81 {offsets = [0, 64], sizes = [8, 64], strides = [1, 1]} : vector<8x256xf32> to vector<8x64xf32>
    %84 = vector.extract_strided_slice %81 {offsets = [0, 128], sizes = [8, 64], strides = [1, 1]} : vector<8x256xf32> to vector<8x64xf32>
    %85 = vector.extract_strided_slice %81 {offsets = [0, 192], sizes = [8, 64], strides = [1, 1]} : vector<8x256xf32> to vector<8x64xf32>
    %86 = arith.index_cast %c1_i32 : i32 to index
    %c0_27 = arith.constant 0 : index
    %c0_28 = arith.constant 0 : index
    %87 = vector.load %arg6[%86, %c0_27, %c0_28] : memref<16x8x64xf32, #tpu.memory_space<vmem>>, vector<1x8x64xf32>
    %88 = vector.shape_cast %87 : vector<1x8x64xf32> to vector<8x64xf32>
    %89 = arith.mulf %83, %42 : vector<8x64xf32>
    %90 = arith.mulf %82, %84 : vector<8x64xf32>
    %91 = arith.addf %89, %90 : vector<8x64xf32>
    %92 = arith.mulf %88, %91 : vector<8x64xf32>
    %93 = math.tanh %92 : vector<8x64xf32>
    %94 = arith.mulf %85, %93 : vector<8x64xf32>
    %95 = arith.mulf %88, %94 : vector<8x64xf32>
    %96 = vector.broadcast %8 : vector<1x64xf32> to vector<8x64xf32>
    %97 = arith.mulf %95, %96 : vector<8x64xf32>
    %98 = vector.extract_strided_slice %97 {offsets = [0, 0], sizes = [8, 32], strides = [1, 1]} : vector<8x64xf32> to vector<8x32xf32>
    %cst_29 = arith.constant dense<0.000000e+00> : vector<8xf32>
    %99 = vector.multi_reduction <add>, %98, %cst_29 [1] : vector<8x32xf32> to vector<8xf32>
    %100 = vector.shape_cast %99 : vector<8xf32> to vector<8x1xf32>
    %101 = vector.extract_strided_slice %97 {offsets = [0, 32], sizes = [8, 32], strides = [1, 1]} : vector<8x64xf32> to vector<8x32xf32>
    %cst_30 = arith.constant dense<0.000000e+00> : vector<8xf32>
    %102 = vector.multi_reduction <add>, %101, %cst_30 [1] : vector<8x32xf32> to vector<8xf32>
    %103 = vector.shape_cast %102 : vector<8xf32> to vector<8x1xf32>
    %104 = vector.broadcast %c1_i32 : i32 to vector<8x16xi32>
    %105 = arith.cmpi eq, %15, %104 : vector<8x16xi32>
    %cst_31 = arith.constant 0.000000e+00 : f32
    %106 = vector.shape_cast %100 : vector<8x1xf32> to vector<8x1xf32>
    %107 = vector.broadcast %106 : vector<8x1xf32> to vector<8x16xf32>
    %108 = vector.broadcast %cst_31 : f32 to vector<8x16xf32>
    %109 = arith.select %105, %107, %108 : vector<8x16xi1>, vector<8x16xf32>
    %110 = arith.addf %68, %109 : vector<8x16xf32>
    %c15_i32_32 = arith.constant 15 : i32
    %111 = arith.subi %c15_i32_32, %c1_i32 : i32
    %112 = vector.broadcast %111 : i32 to vector<8x16xi32>
    %113 = arith.cmpi eq, %15, %112 : vector<8x16xi32>
    %cst_33 = arith.constant 0.000000e+00 : f32
    %114 = vector.shape_cast %103 : vector<8x1xf32> to vector<8x1xf32>
    %115 = vector.broadcast %114 : vector<8x1xf32> to vector<8x16xf32>
    %116 = vector.broadcast %cst_33 : f32 to vector<8x16xf32>
    %117 = arith.select %113, %115, %116 : vector<8x16xi1>, vector<8x16xf32>
    %118 = arith.addf %110, %117 : vector<8x16xf32>
    %c2_i32 = arith.constant 2 : i32
    %c8_i32_34 = arith.constant 8 : i32
    %119 = arith.muli %c2_i32, %c8_i32_34 : i32
    %120 = tpu.assume_multiple %119, 8 : i32
    %121 = arith.index_cast %120 : i32 to index
    %c0_35 = arith.constant 0 : index
    %122 = vector.load %arg9[%121, %c0_35] : memref<128x256xf32, #tpu.memory_space<vmem>>, vector<8x256xf32>
    %cst_36 = arith.constant dense<0.000000e+00> : vector<8x256xf32>
    %123 = tpu.matmul %95, %7, %cst_36 {dimension_numbers = #tpu.dot_dimension_numbers<[1], [0], [0], [1], [0, 0, 1, 1], [], []>} : vector<8x64xf32>, vector<64x256xf32>, vector<8x256xf32> -> vector<8x256xf32>
    %124 = arith.addf %122, %123 : vector<8x256xf32>
    %125 = arith.negf %124 : vector<8x256xf32>
    %126 = math.exp %125 : vector<8x256xf32>
    %cst_37 = arith.constant 1.000000e+00 : f32
    %127 = vector.broadcast %cst_37 : f32 to vector<8x256xf32>
    %128 = arith.addf %127, %126 : vector<8x256xf32>
    %129 = arith.divf %127, %128 : vector<8x256xf32>
    %130 = math.tanh %124 : vector<8x256xf32>
    %131 = arith.select %14, %130, %129 : vector<8x256xi1>, vector<8x256xf32>
    %132 = vector.extract_strided_slice %131 {offsets = [0, 0], sizes = [8, 64], strides = [1, 1]} : vector<8x256xf32> to vector<8x64xf32>
    %133 = vector.extract_strided_slice %131 {offsets = [0, 64], sizes = [8, 64], strides = [1, 1]} : vector<8x256xf32> to vector<8x64xf32>
    %134 = vector.extract_strided_slice %131 {offsets = [0, 128], sizes = [8, 64], strides = [1, 1]} : vector<8x256xf32> to vector<8x64xf32>
    %135 = vector.extract_strided_slice %131 {offsets = [0, 192], sizes = [8, 64], strides = [1, 1]} : vector<8x256xf32> to vector<8x64xf32>
    %136 = arith.index_cast %c2_i32 : i32 to index
    %c0_38 = arith.constant 0 : index
    %c0_39 = arith.constant 0 : index
    %137 = vector.load %arg6[%136, %c0_38, %c0_39] : memref<16x8x64xf32, #tpu.memory_space<vmem>>, vector<1x8x64xf32>
    %138 = vector.shape_cast %137 : vector<1x8x64xf32> to vector<8x64xf32>
    %139 = arith.mulf %133, %92 : vector<8x64xf32>
    %140 = arith.mulf %132, %134 : vector<8x64xf32>
    %141 = arith.addf %139, %140 : vector<8x64xf32>
    %142 = arith.mulf %138, %141 : vector<8x64xf32>
    %143 = math.tanh %142 : vector<8x64xf32>
    %144 = arith.mulf %135, %143 : vector<8x64xf32>
    %145 = arith.mulf %138, %144 : vector<8x64xf32>
    %146 = vector.broadcast %8 : vector<1x64xf32> to vector<8x64xf32>
    %147 = arith.mulf %145, %146 : vector<8x64xf32>
    %148 = vector.extract_strided_slice %147 {offsets = [0, 0], sizes = [8, 32], strides = [1, 1]} : vector<8x64xf32> to vector<8x32xf32>
    %cst_40 = arith.constant dense<0.000000e+00> : vector<8xf32>
    %149 = vector.multi_reduction <add>, %148, %cst_40 [1] : vector<8x32xf32> to vector<8xf32>
    %150 = vector.shape_cast %149 : vector<8xf32> to vector<8x1xf32>
    %151 = vector.extract_strided_slice %147 {offsets = [0, 32], sizes = [8, 32], strides = [1, 1]} : vector<8x64xf32> to vector<8x32xf32>
    %cst_41 = arith.constant dense<0.000000e+00> : vector<8xf32>
    %152 = vector.multi_reduction <add>, %151, %cst_41 [1] : vector<8x32xf32> to vector<8xf32>
    %153 = vector.shape_cast %152 : vector<8xf32> to vector<8x1xf32>
    %154 = vector.broadcast %c2_i32 : i32 to vector<8x16xi32>
    %155 = arith.cmpi eq, %15, %154 : vector<8x16xi32>
    %cst_42 = arith.constant 0.000000e+00 : f32
    %156 = vector.shape_cast %150 : vector<8x1xf32> to vector<8x1xf32>
    %157 = vector.broadcast %156 : vector<8x1xf32> to vector<8x16xf32>
    %158 = vector.broadcast %cst_42 : f32 to vector<8x16xf32>
    %159 = arith.select %155, %157, %158 : vector<8x16xi1>, vector<8x16xf32>
    %160 = arith.addf %118, %159 : vector<8x16xf32>
    %c15_i32_43 = arith.constant 15 : i32
    %161 = arith.subi %c15_i32_43, %c2_i32 : i32
    %162 = vector.broadcast %161 : i32 to vector<8x16xi32>
    %163 = arith.cmpi eq, %15, %162 : vector<8x16xi32>
    %cst_44 = arith.constant 0.000000e+00 : f32
    %164 = vector.shape_cast %153 : vector<8x1xf32> to vector<8x1xf32>
    %165 = vector.broadcast %164 : vector<8x1xf32> to vector<8x16xf32>
    %166 = vector.broadcast %cst_44 : f32 to vector<8x16xf32>
    %167 = arith.select %163, %165, %166 : vector<8x16xi1>, vector<8x16xf32>
    %168 = arith.addf %160, %167 : vector<8x16xf32>
    %c3_i32 = arith.constant 3 : i32
    %c8_i32_45 = arith.constant 8 : i32
    %169 = arith.muli %c3_i32, %c8_i32_45 : i32
    %170 = tpu.assume_multiple %169, 8 : i32
    %171 = arith.index_cast %170 : i32 to index
    %c0_46 = arith.constant 0 : index
    %172 = vector.load %arg9[%171, %c0_46] : memref<128x256xf32, #tpu.memory_space<vmem>>, vector<8x256xf32>
    %cst_47 = arith.constant dense<0.000000e+00> : vector<8x256xf32>
    %173 = tpu.matmul %145, %7, %cst_47 {dimension_numbers = #tpu.dot_dimension_numbers<[1], [0], [0], [1], [0, 0, 1, 1], [], []>} : vector<8x64xf32>, vector<64x256xf32>, vector<8x256xf32> -> vector<8x256xf32>
    %174 = arith.addf %172, %173 : vector<8x256xf32>
    %175 = arith.negf %174 : vector<8x256xf32>
    %176 = math.exp %175 : vector<8x256xf32>
    %cst_48 = arith.constant 1.000000e+00 : f32
    %177 = vector.broadcast %cst_48 : f32 to vector<8x256xf32>
    %178 = arith.addf %177, %176 : vector<8x256xf32>
    %179 = arith.divf %177, %178 : vector<8x256xf32>
    %180 = math.tanh %174 : vector<8x256xf32>
    %181 = arith.select %14, %180, %179 : vector<8x256xi1>, vector<8x256xf32>
    %182 = vector.extract_strided_slice %181 {offsets = [0, 0], sizes = [8, 64], strides = [1, 1]} : vector<8x256xf32> to vector<8x64xf32>
    %183 = vector.extract_strided_slice %181 {offsets = [0, 64], sizes = [8, 64], strides = [1, 1]} : vector<8x256xf32> to vector<8x64xf32>
    %184 = vector.extract_strided_slice %181 {offsets = [0, 128], sizes = [8, 64], strides = [1, 1]} : vector<8x256xf32> to vector<8x64xf32>
    %185 = vector.extract_strided_slice %181 {offsets = [0, 192], sizes = [8, 64], strides = [1, 1]} : vector<8x256xf32> to vector<8x64xf32>
    %186 = arith.index_cast %c3_i32 : i32 to index
    %c0_49 = arith.constant 0 : index
    %c0_50 = arith.constant 0 : index
    %187 = vector.load %arg6[%186, %c0_49, %c0_50] : memref<16x8x64xf32, #tpu.memory_space<vmem>>, vector<1x8x64xf32>
    %188 = vector.shape_cast %187 : vector<1x8x64xf32> to vector<8x64xf32>
    %189 = arith.mulf %183, %142 : vector<8x64xf32>
    %190 = arith.mulf %182, %184 : vector<8x64xf32>
    %191 = arith.addf %189, %190 : vector<8x64xf32>
    %192 = arith.mulf %188, %191 : vector<8x64xf32>
    %193 = math.tanh %192 : vector<8x64xf32>
    %194 = arith.mulf %185, %193 : vector<8x64xf32>
    %195 = arith.mulf %188, %194 : vector<8x64xf32>
    %196 = vector.broadcast %8 : vector<1x64xf32> to vector<8x64xf32>
    %197 = arith.mulf %195, %196 : vector<8x64xf32>
    %198 = vector.extract_strided_slice %197 {offsets = [0, 0], sizes = [8, 32], strides = [1, 1]} : vector<8x64xf32> to vector<8x32xf32>
    %cst_51 = arith.constant dense<0.000000e+00> : vector<8xf32>
    %199 = vector.multi_reduction <add>, %198, %cst_51 [1] : vector<8x32xf32> to vector<8xf32>
    %200 = vector.shape_cast %199 : vector<8xf32> to vector<8x1xf32>
    %201 = vector.extract_strided_slice %197 {offsets = [0, 32], sizes = [8, 32], strides = [1, 1]} : vector<8x64xf32> to vector<8x32xf32>
    %cst_52 = arith.constant dense<0.000000e+00> : vector<8xf32>
    %202 = vector.multi_reduction <add>, %201, %cst_52 [1] : vector<8x32xf32> to vector<8xf32>
    %203 = vector.shape_cast %202 : vector<8xf32> to vector<8x1xf32>
    %204 = vector.broadcast %c3_i32 : i32 to vector<8x16xi32>
    %205 = arith.cmpi eq, %15, %204 : vector<8x16xi32>
    %cst_53 = arith.constant 0.000000e+00 : f32
    %206 = vector.shape_cast %200 : vector<8x1xf32> to vector<8x1xf32>
    %207 = vector.broadcast %206 : vector<8x1xf32> to vector<8x16xf32>
    %208 = vector.broadcast %cst_53 : f32 to vector<8x16xf32>
    %209 = arith.select %205, %207, %208 : vector<8x16xi1>, vector<8x16xf32>
    %210 = arith.addf %168, %209 : vector<8x16xf32>
    %c15_i32_54 = arith.constant 15 : i32
    %211 = arith.subi %c15_i32_54, %c3_i32 : i32
    %212 = vector.broadcast %211 : i32 to vector<8x16xi32>
    %213 = arith.cmpi eq, %15, %212 : vector<8x16xi32>
    %cst_55 = arith.constant 0.000000e+00 : f32
    %214 = vector.shape_cast %203 : vector<8x1xf32> to vector<8x1xf32>
    %215 = vector.broadcast %214 : vector<8x1xf32> to vector<8x16xf32>
    %216 = vector.broadcast %cst_55 : f32 to vector<8x16xf32>
    %217 = arith.select %213, %215, %216 : vector<8x16xi1>, vector<8x16xf32>
    %218 = arith.addf %210, %217 : vector<8x16xf32>
    %c4_i32 = arith.constant 4 : i32
    %c8_i32_56 = arith.constant 8 : i32
    %219 = arith.muli %c4_i32, %c8_i32_56 : i32
    %220 = tpu.assume_multiple %219, 8 : i32
    %221 = arith.index_cast %220 : i32 to index
    %c0_57 = arith.constant 0 : index
    %222 = vector.load %arg9[%221, %c0_57] : memref<128x256xf32, #tpu.memory_space<vmem>>, vector<8x256xf32>
    %cst_58 = arith.constant dense<0.000000e+00> : vector<8x256xf32>
    %223 = tpu.matmul %195, %7, %cst_58 {dimension_numbers = #tpu.dot_dimension_numbers<[1], [0], [0], [1], [0, 0, 1, 1], [], []>} : vector<8x64xf32>, vector<64x256xf32>, vector<8x256xf32> -> vector<8x256xf32>
    %224 = arith.addf %222, %223 : vector<8x256xf32>
    %225 = arith.negf %224 : vector<8x256xf32>
    %226 = math.exp %225 : vector<8x256xf32>
    %cst_59 = arith.constant 1.000000e+00 : f32
    %227 = vector.broadcast %cst_59 : f32 to vector<8x256xf32>
    %228 = arith.addf %227, %226 : vector<8x256xf32>
    %229 = arith.divf %227, %228 : vector<8x256xf32>
    %230 = math.tanh %224 : vector<8x256xf32>
    %231 = arith.select %14, %230, %229 : vector<8x256xi1>, vector<8x256xf32>
    %232 = vector.extract_strided_slice %231 {offsets = [0, 0], sizes = [8, 64], strides = [1, 1]} : vector<8x256xf32> to vector<8x64xf32>
    %233 = vector.extract_strided_slice %231 {offsets = [0, 64], sizes = [8, 64], strides = [1, 1]} : vector<8x256xf32> to vector<8x64xf32>
    %234 = vector.extract_strided_slice %231 {offsets = [0, 128], sizes = [8, 64], strides = [1, 1]} : vector<8x256xf32> to vector<8x64xf32>
    %235 = vector.extract_strided_slice %231 {offsets = [0, 192], sizes = [8, 64], strides = [1, 1]} : vector<8x256xf32> to vector<8x64xf32>
    %236 = arith.index_cast %c4_i32 : i32 to index
    %c0_60 = arith.constant 0 : index
    %c0_61 = arith.constant 0 : index
    %237 = vector.load %arg6[%236, %c0_60, %c0_61] : memref<16x8x64xf32, #tpu.memory_space<vmem>>, vector<1x8x64xf32>
    %238 = vector.shape_cast %237 : vector<1x8x64xf32> to vector<8x64xf32>
    %239 = arith.mulf %233, %192 : vector<8x64xf32>
    %240 = arith.mulf %232, %234 : vector<8x64xf32>
    %241 = arith.addf %239, %240 : vector<8x64xf32>
    %242 = arith.mulf %238, %241 : vector<8x64xf32>
    %243 = math.tanh %242 : vector<8x64xf32>
    %244 = arith.mulf %235, %243 : vector<8x64xf32>
    %245 = arith.mulf %238, %244 : vector<8x64xf32>
    %246 = vector.broadcast %8 : vector<1x64xf32> to vector<8x64xf32>
    %247 = arith.mulf %245, %246 : vector<8x64xf32>
    %248 = vector.extract_strided_slice %247 {offsets = [0, 0], sizes = [8, 32], strides = [1, 1]} : vector<8x64xf32> to vector<8x32xf32>
    %cst_62 = arith.constant dense<0.000000e+00> : vector<8xf32>
    %249 = vector.multi_reduction <add>, %248, %cst_62 [1] : vector<8x32xf32> to vector<8xf32>
    %250 = vector.shape_cast %249 : vector<8xf32> to vector<8x1xf32>
    %251 = vector.extract_strided_slice %247 {offsets = [0, 32], sizes = [8, 32], strides = [1, 1]} : vector<8x64xf32> to vector<8x32xf32>
    %cst_63 = arith.constant dense<0.000000e+00> : vector<8xf32>
    %252 = vector.multi_reduction <add>, %251, %cst_63 [1] : vector<8x32xf32> to vector<8xf32>
    %253 = vector.shape_cast %252 : vector<8xf32> to vector<8x1xf32>
    %254 = vector.broadcast %c4_i32 : i32 to vector<8x16xi32>
    %255 = arith.cmpi eq, %15, %254 : vector<8x16xi32>
    %cst_64 = arith.constant 0.000000e+00 : f32
    %256 = vector.shape_cast %250 : vector<8x1xf32> to vector<8x1xf32>
    %257 = vector.broadcast %256 : vector<8x1xf32> to vector<8x16xf32>
    %258 = vector.broadcast %cst_64 : f32 to vector<8x16xf32>
    %259 = arith.select %255, %257, %258 : vector<8x16xi1>, vector<8x16xf32>
    %260 = arith.addf %218, %259 : vector<8x16xf32>
    %c15_i32_65 = arith.constant 15 : i32
    %261 = arith.subi %c15_i32_65, %c4_i32 : i32
    %262 = vector.broadcast %261 : i32 to vector<8x16xi32>
    %263 = arith.cmpi eq, %15, %262 : vector<8x16xi32>
    %cst_66 = arith.constant 0.000000e+00 : f32
    %264 = vector.shape_cast %253 : vector<8x1xf32> to vector<8x1xf32>
    %265 = vector.broadcast %264 : vector<8x1xf32> to vector<8x16xf32>
    %266 = vector.broadcast %cst_66 : f32 to vector<8x16xf32>
    %267 = arith.select %263, %265, %266 : vector<8x16xi1>, vector<8x16xf32>
    %268 = arith.addf %260, %267 : vector<8x16xf32>
    %c5_i32 = arith.constant 5 : i32
    %c8_i32_67 = arith.constant 8 : i32
    %269 = arith.muli %c5_i32, %c8_i32_67 : i32
    %270 = tpu.assume_multiple %269, 8 : i32
    %271 = arith.index_cast %270 : i32 to index
    %c0_68 = arith.constant 0 : index
    %272 = vector.load %arg9[%271, %c0_68] : memref<128x256xf32, #tpu.memory_space<vmem>>, vector<8x256xf32>
    %cst_69 = arith.constant dense<0.000000e+00> : vector<8x256xf32>
    %273 = tpu.matmul %245, %7, %cst_69 {dimension_numbers = #tpu.dot_dimension_numbers<[1], [0], [0], [1], [0, 0, 1, 1], [], []>} : vector<8x64xf32>, vector<64x256xf32>, vector<8x256xf32> -> vector<8x256xf32>
    %274 = arith.addf %272, %273 : vector<8x256xf32>
    %275 = arith.negf %274 : vector<8x256xf32>
    %276 = math.exp %275 : vector<8x256xf32>
    %cst_70 = arith.constant 1.000000e+00 : f32
    %277 = vector.broadcast %cst_70 : f32 to vector<8x256xf32>
    %278 = arith.addf %277, %276 : vector<8x256xf32>
    %279 = arith.divf %277, %278 : vector<8x256xf32>
    %280 = math.tanh %274 : vector<8x256xf32>
    %281 = arith.select %14, %280, %279 : vector<8x256xi1>, vector<8x256xf32>
    %282 = vector.extract_strided_slice %281 {offsets = [0, 0], sizes = [8, 64], strides = [1, 1]} : vector<8x256xf32> to vector<8x64xf32>
    %283 = vector.extract_strided_slice %281 {offsets = [0, 64], sizes = [8, 64], strides = [1, 1]} : vector<8x256xf32> to vector<8x64xf32>
    %284 = vector.extract_strided_slice %281 {offsets = [0, 128], sizes = [8, 64], strides = [1, 1]} : vector<8x256xf32> to vector<8x64xf32>
    %285 = vector.extract_strided_slice %281 {offsets = [0, 192], sizes = [8, 64], strides = [1, 1]} : vector<8x256xf32> to vector<8x64xf32>
    %286 = arith.index_cast %c5_i32 : i32 to index
    %c0_71 = arith.constant 0 : index
    %c0_72 = arith.constant 0 : index
    %287 = vector.load %arg6[%286, %c0_71, %c0_72] : memref<16x8x64xf32, #tpu.memory_space<vmem>>, vector<1x8x64xf32>
    %288 = vector.shape_cast %287 : vector<1x8x64xf32> to vector<8x64xf32>
    %289 = arith.mulf %283, %242 : vector<8x64xf32>
    %290 = arith.mulf %282, %284 : vector<8x64xf32>
    %291 = arith.addf %289, %290 : vector<8x64xf32>
    %292 = arith.mulf %288, %291 : vector<8x64xf32>
    %293 = math.tanh %292 : vector<8x64xf32>
    %294 = arith.mulf %285, %293 : vector<8x64xf32>
    %295 = arith.mulf %288, %294 : vector<8x64xf32>
    %296 = vector.broadcast %8 : vector<1x64xf32> to vector<8x64xf32>
    %297 = arith.mulf %295, %296 : vector<8x64xf32>
    %298 = vector.extract_strided_slice %297 {offsets = [0, 0], sizes = [8, 32], strides = [1, 1]} : vector<8x64xf32> to vector<8x32xf32>
    %cst_73 = arith.constant dense<0.000000e+00> : vector<8xf32>
    %299 = vector.multi_reduction <add>, %298, %cst_73 [1] : vector<8x32xf32> to vector<8xf32>
    %300 = vector.shape_cast %299 : vector<8xf32> to vector<8x1xf32>
    %301 = vector.extract_strided_slice %297 {offsets = [0, 32], sizes = [8, 32], strides = [1, 1]} : vector<8x64xf32> to vector<8x32xf32>
    %cst_74 = arith.constant dense<0.000000e+00> : vector<8xf32>
    %302 = vector.multi_reduction <add>, %301, %cst_74 [1] : vector<8x32xf32> to vector<8xf32>
    %303 = vector.shape_cast %302 : vector<8xf32> to vector<8x1xf32>
    %304 = vector.broadcast %c5_i32 : i32 to vector<8x16xi32>
    %305 = arith.cmpi eq, %15, %304 : vector<8x16xi32>
    %cst_75 = arith.constant 0.000000e+00 : f32
    %306 = vector.shape_cast %300 : vector<8x1xf32> to vector<8x1xf32>
    %307 = vector.broadcast %306 : vector<8x1xf32> to vector<8x16xf32>
    %308 = vector.broadcast %cst_75 : f32 to vector<8x16xf32>
    %309 = arith.select %305, %307, %308 : vector<8x16xi1>, vector<8x16xf32>
    %310 = arith.addf %268, %309 : vector<8x16xf32>
    %c15_i32_76 = arith.constant 15 : i32
    %311 = arith.subi %c15_i32_76, %c5_i32 : i32
    %312 = vector.broadcast %311 : i32 to vector<8x16xi32>
    %313 = arith.cmpi eq, %15, %312 : vector<8x16xi32>
    %cst_77 = arith.constant 0.000000e+00 : f32
    %314 = vector.shape_cast %303 : vector<8x1xf32> to vector<8x1xf32>
    %315 = vector.broadcast %314 : vector<8x1xf32> to vector<8x16xf32>
    %316 = vector.broadcast %cst_77 : f32 to vector<8x16xf32>
    %317 = arith.select %313, %315, %316 : vector<8x16xi1>, vector<8x16xf32>
    %318 = arith.addf %310, %317 : vector<8x16xf32>
    %c6_i32 = arith.constant 6 : i32
    %c8_i32_78 = arith.constant 8 : i32
    %319 = arith.muli %c6_i32, %c8_i32_78 : i32
    %320 = tpu.assume_multiple %319, 8 : i32
    %321 = arith.index_cast %320 : i32 to index
    %c0_79 = arith.constant 0 : index
    %322 = vector.load %arg9[%321, %c0_79] : memref<128x256xf32, #tpu.memory_space<vmem>>, vector<8x256xf32>
    %cst_80 = arith.constant dense<0.000000e+00> : vector<8x256xf32>
    %323 = tpu.matmul %295, %7, %cst_80 {dimension_numbers = #tpu.dot_dimension_numbers<[1], [0], [0], [1], [0, 0, 1, 1], [], []>} : vector<8x64xf32>, vector<64x256xf32>, vector<8x256xf32> -> vector<8x256xf32>
    %324 = arith.addf %322, %323 : vector<8x256xf32>
    %325 = arith.negf %324 : vector<8x256xf32>
    %326 = math.exp %325 : vector<8x256xf32>
    %cst_81 = arith.constant 1.000000e+00 : f32
    %327 = vector.broadcast %cst_81 : f32 to vector<8x256xf32>
    %328 = arith.addf %327, %326 : vector<8x256xf32>
    %329 = arith.divf %327, %328 : vector<8x256xf32>
    %330 = math.tanh %324 : vector<8x256xf32>
    %331 = arith.select %14, %330, %329 : vector<8x256xi1>, vector<8x256xf32>
    %332 = vector.extract_strided_slice %331 {offsets = [0, 0], sizes = [8, 64], strides = [1, 1]} : vector<8x256xf32> to vector<8x64xf32>
    %333 = vector.extract_strided_slice %331 {offsets = [0, 64], sizes = [8, 64], strides = [1, 1]} : vector<8x256xf32> to vector<8x64xf32>
    %334 = vector.extract_strided_slice %331 {offsets = [0, 128], sizes = [8, 64], strides = [1, 1]} : vector<8x256xf32> to vector<8x64xf32>
    %335 = vector.extract_strided_slice %331 {offsets = [0, 192], sizes = [8, 64], strides = [1, 1]} : vector<8x256xf32> to vector<8x64xf32>
    %336 = arith.index_cast %c6_i32 : i32 to index
    %c0_82 = arith.constant 0 : index
    %c0_83 = arith.constant 0 : index
    %337 = vector.load %arg6[%336, %c0_82, %c0_83] : memref<16x8x64xf32, #tpu.memory_space<vmem>>, vector<1x8x64xf32>
    %338 = vector.shape_cast %337 : vector<1x8x64xf32> to vector<8x64xf32>
    %339 = arith.mulf %333, %292 : vector<8x64xf32>
    %340 = arith.mulf %332, %334 : vector<8x64xf32>
    %341 = arith.addf %339, %340 : vector<8x64xf32>
    %342 = arith.mulf %338, %341 : vector<8x64xf32>
    %343 = math.tanh %342 : vector<8x64xf32>
    %344 = arith.mulf %335, %343 : vector<8x64xf32>
    %345 = arith.mulf %338, %344 : vector<8x64xf32>
    %346 = vector.broadcast %8 : vector<1x64xf32> to vector<8x64xf32>
    %347 = arith.mulf %345, %346 : vector<8x64xf32>
    %348 = vector.extract_strided_slice %347 {offsets = [0, 0], sizes = [8, 32], strides = [1, 1]} : vector<8x64xf32> to vector<8x32xf32>
    %cst_84 = arith.constant dense<0.000000e+00> : vector<8xf32>
    %349 = vector.multi_reduction <add>, %348, %cst_84 [1] : vector<8x32xf32> to vector<8xf32>
    %350 = vector.shape_cast %349 : vector<8xf32> to vector<8x1xf32>
    %351 = vector.extract_strided_slice %347 {offsets = [0, 32], sizes = [8, 32], strides = [1, 1]} : vector<8x64xf32> to vector<8x32xf32>
    %cst_85 = arith.constant dense<0.000000e+00> : vector<8xf32>
    %352 = vector.multi_reduction <add>, %351, %cst_85 [1] : vector<8x32xf32> to vector<8xf32>
    %353 = vector.shape_cast %352 : vector<8xf32> to vector<8x1xf32>
    %354 = vector.broadcast %c6_i32 : i32 to vector<8x16xi32>
    %355 = arith.cmpi eq, %15, %354 : vector<8x16xi32>
    %cst_86 = arith.constant 0.000000e+00 : f32
    %356 = vector.shape_cast %350 : vector<8x1xf32> to vector<8x1xf32>
    %357 = vector.broadcast %356 : vector<8x1xf32> to vector<8x16xf32>
    %358 = vector.broadcast %cst_86 : f32 to vector<8x16xf32>
    %359 = arith.select %355, %357, %358 : vector<8x16xi1>, vector<8x16xf32>
    %360 = arith.addf %318, %359 : vector<8x16xf32>
    %c15_i32_87 = arith.constant 15 : i32
    %361 = arith.subi %c15_i32_87, %c6_i32 : i32
    %362 = vector.broadcast %361 : i32 to vector<8x16xi32>
    %363 = arith.cmpi eq, %15, %362 : vector<8x16xi32>
    %cst_88 = arith.constant 0.000000e+00 : f32
    %364 = vector.shape_cast %353 : vector<8x1xf32> to vector<8x1xf32>
    %365 = vector.broadcast %364 : vector<8x1xf32> to vector<8x16xf32>
    %366 = vector.broadcast %cst_88 : f32 to vector<8x16xf32>
    %367 = arith.select %363, %365, %366 : vector<8x16xi1>, vector<8x16xf32>
    %368 = arith.addf %360, %367 : vector<8x16xf32>
    %c7_i32 = arith.constant 7 : i32
    %c8_i32_89 = arith.constant 8 : i32
    %369 = arith.muli %c7_i32, %c8_i32_89 : i32
    %370 = tpu.assume_multiple %369, 8 : i32
    %371 = arith.index_cast %370 : i32 to index
    %c0_90 = arith.constant 0 : index
    %372 = vector.load %arg9[%371, %c0_90] : memref<128x256xf32, #tpu.memory_space<vmem>>, vector<8x256xf32>
    %cst_91 = arith.constant dense<0.000000e+00> : vector<8x256xf32>
    %373 = tpu.matmul %345, %7, %cst_91 {dimension_numbers = #tpu.dot_dimension_numbers<[1], [0], [0], [1], [0, 0, 1, 1], [], []>} : vector<8x64xf32>, vector<64x256xf32>, vector<8x256xf32> -> vector<8x256xf32>
    %374 = arith.addf %372, %373 : vector<8x256xf32>
    %375 = arith.negf %374 : vector<8x256xf32>
    %376 = math.exp %375 : vector<8x256xf32>
    %cst_92 = arith.constant 1.000000e+00 : f32
    %377 = vector.broadcast %cst_92 : f32 to vector<8x256xf32>
    %378 = arith.addf %377, %376 : vector<8x256xf32>
    %379 = arith.divf %377, %378 : vector<8x256xf32>
    %380 = math.tanh %374 : vector<8x256xf32>
    %381 = arith.select %14, %380, %379 : vector<8x256xi1>, vector<8x256xf32>
    %382 = vector.extract_strided_slice %381 {offsets = [0, 0], sizes = [8, 64], strides = [1, 1]} : vector<8x256xf32> to vector<8x64xf32>
    %383 = vector.extract_strided_slice %381 {offsets = [0, 64], sizes = [8, 64], strides = [1, 1]} : vector<8x256xf32> to vector<8x64xf32>
    %384 = vector.extract_strided_slice %381 {offsets = [0, 128], sizes = [8, 64], strides = [1, 1]} : vector<8x256xf32> to vector<8x64xf32>
    %385 = vector.extract_strided_slice %381 {offsets = [0, 192], sizes = [8, 64], strides = [1, 1]} : vector<8x256xf32> to vector<8x64xf32>
    %386 = arith.index_cast %c7_i32 : i32 to index
    %c0_93 = arith.constant 0 : index
    %c0_94 = arith.constant 0 : index
    %387 = vector.load %arg6[%386, %c0_93, %c0_94] : memref<16x8x64xf32, #tpu.memory_space<vmem>>, vector<1x8x64xf32>
    %388 = vector.shape_cast %387 : vector<1x8x64xf32> to vector<8x64xf32>
    %389 = arith.mulf %383, %342 : vector<8x64xf32>
    %390 = arith.mulf %382, %384 : vector<8x64xf32>
    %391 = arith.addf %389, %390 : vector<8x64xf32>
    %392 = arith.mulf %388, %391 : vector<8x64xf32>
    %393 = math.tanh %392 : vector<8x64xf32>
    %394 = arith.mulf %385, %393 : vector<8x64xf32>
    %395 = arith.mulf %388, %394 : vector<8x64xf32>
    %396 = vector.broadcast %8 : vector<1x64xf32> to vector<8x64xf32>
    %397 = arith.mulf %395, %396 : vector<8x64xf32>
    %398 = vector.extract_strided_slice %397 {offsets = [0, 0], sizes = [8, 32], strides = [1, 1]} : vector<8x64xf32> to vector<8x32xf32>
    %cst_95 = arith.constant dense<0.000000e+00> : vector<8xf32>
    %399 = vector.multi_reduction <add>, %398, %cst_95 [1] : vector<8x32xf32> to vector<8xf32>
    %400 = vector.shape_cast %399 : vector<8xf32> to vector<8x1xf32>
    %401 = vector.extract_strided_slice %397 {offsets = [0, 32], sizes = [8, 32], strides = [1, 1]} : vector<8x64xf32> to vector<8x32xf32>
    %cst_96 = arith.constant dense<0.000000e+00> : vector<8xf32>
    %402 = vector.multi_reduction <add>, %401, %cst_96 [1] : vector<8x32xf32> to vector<8xf32>
    %403 = vector.shape_cast %402 : vector<8xf32> to vector<8x1xf32>
    %404 = vector.broadcast %c7_i32 : i32 to vector<8x16xi32>
    %405 = arith.cmpi eq, %15, %404 : vector<8x16xi32>
    %cst_97 = arith.constant 0.000000e+00 : f32
    %406 = vector.shape_cast %400 : vector<8x1xf32> to vector<8x1xf32>
    %407 = vector.broadcast %406 : vector<8x1xf32> to vector<8x16xf32>
    %408 = vector.broadcast %cst_97 : f32 to vector<8x16xf32>
    %409 = arith.select %405, %407, %408 : vector<8x16xi1>, vector<8x16xf32>
    %410 = arith.addf %368, %409 : vector<8x16xf32>
    %c15_i32_98 = arith.constant 15 : i32
    %411 = arith.subi %c15_i32_98, %c7_i32 : i32
    %412 = vector.broadcast %411 : i32 to vector<8x16xi32>
    %413 = arith.cmpi eq, %15, %412 : vector<8x16xi32>
    %cst_99 = arith.constant 0.000000e+00 : f32
    %414 = vector.shape_cast %403 : vector<8x1xf32> to vector<8x1xf32>
    %415 = vector.broadcast %414 : vector<8x1xf32> to vector<8x16xf32>
    %416 = vector.broadcast %cst_99 : f32 to vector<8x16xf32>
    %417 = arith.select %413, %415, %416 : vector<8x16xi1>, vector<8x16xf32>
    %418 = arith.addf %410, %417 : vector<8x16xf32>
    %c8_i32_100 = arith.constant 8 : i32
    %c8_i32_101 = arith.constant 8 : i32
    %419 = arith.muli %c8_i32_100, %c8_i32_101 : i32
    %420 = tpu.assume_multiple %419, 8 : i32
    %421 = arith.index_cast %420 : i32 to index
    %c0_102 = arith.constant 0 : index
    %422 = vector.load %arg9[%421, %c0_102] : memref<128x256xf32, #tpu.memory_space<vmem>>, vector<8x256xf32>
    %cst_103 = arith.constant dense<0.000000e+00> : vector<8x256xf32>
    %423 = tpu.matmul %395, %7, %cst_103 {dimension_numbers = #tpu.dot_dimension_numbers<[1], [0], [0], [1], [0, 0, 1, 1], [], []>} : vector<8x64xf32>, vector<64x256xf32>, vector<8x256xf32> -> vector<8x256xf32>
    %424 = arith.addf %422, %423 : vector<8x256xf32>
    %425 = arith.negf %424 : vector<8x256xf32>
    %426 = math.exp %425 : vector<8x256xf32>
    %cst_104 = arith.constant 1.000000e+00 : f32
    %427 = vector.broadcast %cst_104 : f32 to vector<8x256xf32>
    %428 = arith.addf %427, %426 : vector<8x256xf32>
    %429 = arith.divf %427, %428 : vector<8x256xf32>
    %430 = math.tanh %424 : vector<8x256xf32>
    %431 = arith.select %14, %430, %429 : vector<8x256xi1>, vector<8x256xf32>
    %432 = vector.extract_strided_slice %431 {offsets = [0, 0], sizes = [8, 64], strides = [1, 1]} : vector<8x256xf32> to vector<8x64xf32>
    %433 = vector.extract_strided_slice %431 {offsets = [0, 64], sizes = [8, 64], strides = [1, 1]} : vector<8x256xf32> to vector<8x64xf32>
    %434 = vector.extract_strided_slice %431 {offsets = [0, 128], sizes = [8, 64], strides = [1, 1]} : vector<8x256xf32> to vector<8x64xf32>
    %435 = vector.extract_strided_slice %431 {offsets = [0, 192], sizes = [8, 64], strides = [1, 1]} : vector<8x256xf32> to vector<8x64xf32>
    %436 = arith.index_cast %c8_i32_100 : i32 to index
    %c0_105 = arith.constant 0 : index
    %c0_106 = arith.constant 0 : index
    %437 = vector.load %arg6[%436, %c0_105, %c0_106] : memref<16x8x64xf32, #tpu.memory_space<vmem>>, vector<1x8x64xf32>
    %438 = vector.shape_cast %437 : vector<1x8x64xf32> to vector<8x64xf32>
    %439 = arith.mulf %433, %392 : vector<8x64xf32>
    %440 = arith.mulf %432, %434 : vector<8x64xf32>
    %441 = arith.addf %439, %440 : vector<8x64xf32>
    %442 = arith.mulf %438, %441 : vector<8x64xf32>
    %443 = math.tanh %442 : vector<8x64xf32>
    %444 = arith.mulf %435, %443 : vector<8x64xf32>
    %445 = arith.mulf %438, %444 : vector<8x64xf32>
    %446 = vector.broadcast %8 : vector<1x64xf32> to vector<8x64xf32>
    %447 = arith.mulf %445, %446 : vector<8x64xf32>
    %448 = vector.extract_strided_slice %447 {offsets = [0, 0], sizes = [8, 32], strides = [1, 1]} : vector<8x64xf32> to vector<8x32xf32>
    %cst_107 = arith.constant dense<0.000000e+00> : vector<8xf32>
    %449 = vector.multi_reduction <add>, %448, %cst_107 [1] : vector<8x32xf32> to vector<8xf32>
    %450 = vector.shape_cast %449 : vector<8xf32> to vector<8x1xf32>
    %451 = vector.extract_strided_slice %447 {offsets = [0, 32], sizes = [8, 32], strides = [1, 1]} : vector<8x64xf32> to vector<8x32xf32>
    %cst_108 = arith.constant dense<0.000000e+00> : vector<8xf32>
    %452 = vector.multi_reduction <add>, %451, %cst_108 [1] : vector<8x32xf32> to vector<8xf32>
    %453 = vector.shape_cast %452 : vector<8xf32> to vector<8x1xf32>
    %454 = vector.broadcast %c8_i32_100 : i32 to vector<8x16xi32>
    %455 = arith.cmpi eq, %15, %454 : vector<8x16xi32>
    %cst_109 = arith.constant 0.000000e+00 : f32
    %456 = vector.shape_cast %450 : vector<8x1xf32> to vector<8x1xf32>
    %457 = vector.broadcast %456 : vector<8x1xf32> to vector<8x16xf32>
    %458 = vector.broadcast %cst_109 : f32 to vector<8x16xf32>
    %459 = arith.select %455, %457, %458 : vector<8x16xi1>, vector<8x16xf32>
    %460 = arith.addf %418, %459 : vector<8x16xf32>
    %c15_i32_110 = arith.constant 15 : i32
    %461 = arith.subi %c15_i32_110, %c8_i32_100 : i32
    %462 = vector.broadcast %461 : i32 to vector<8x16xi32>
    %463 = arith.cmpi eq, %15, %462 : vector<8x16xi32>
    %cst_111 = arith.constant 0.000000e+00 : f32
    %464 = vector.shape_cast %453 : vector<8x1xf32> to vector<8x1xf32>
    %465 = vector.broadcast %464 : vector<8x1xf32> to vector<8x16xf32>
    %466 = vector.broadcast %cst_111 : f32 to vector<8x16xf32>
    %467 = arith.select %463, %465, %466 : vector<8x16xi1>, vector<8x16xf32>
    %468 = arith.addf %460, %467 : vector<8x16xf32>
    %c9_i32 = arith.constant 9 : i32
    %c8_i32_112 = arith.constant 8 : i32
    %469 = arith.muli %c9_i32, %c8_i32_112 : i32
    %470 = tpu.assume_multiple %469, 8 : i32
    %471 = arith.index_cast %470 : i32 to index
    %c0_113 = arith.constant 0 : index
    %472 = vector.load %arg9[%471, %c0_113] : memref<128x256xf32, #tpu.memory_space<vmem>>, vector<8x256xf32>
    %cst_114 = arith.constant dense<0.000000e+00> : vector<8x256xf32>
    %473 = tpu.matmul %445, %7, %cst_114 {dimension_numbers = #tpu.dot_dimension_numbers<[1], [0], [0], [1], [0, 0, 1, 1], [], []>} : vector<8x64xf32>, vector<64x256xf32>, vector<8x256xf32> -> vector<8x256xf32>
    %474 = arith.addf %472, %473 : vector<8x256xf32>
    %475 = arith.negf %474 : vector<8x256xf32>
    %476 = math.exp %475 : vector<8x256xf32>
    %cst_115 = arith.constant 1.000000e+00 : f32
    %477 = vector.broadcast %cst_115 : f32 to vector<8x256xf32>
    %478 = arith.addf %477, %476 : vector<8x256xf32>
    %479 = arith.divf %477, %478 : vector<8x256xf32>
    %480 = math.tanh %474 : vector<8x256xf32>
    %481 = arith.select %14, %480, %479 : vector<8x256xi1>, vector<8x256xf32>
    %482 = vector.extract_strided_slice %481 {offsets = [0, 0], sizes = [8, 64], strides = [1, 1]} : vector<8x256xf32> to vector<8x64xf32>
    %483 = vector.extract_strided_slice %481 {offsets = [0, 64], sizes = [8, 64], strides = [1, 1]} : vector<8x256xf32> to vector<8x64xf32>
    %484 = vector.extract_strided_slice %481 {offsets = [0, 128], sizes = [8, 64], strides = [1, 1]} : vector<8x256xf32> to vector<8x64xf32>
    %485 = vector.extract_strided_slice %481 {offsets = [0, 192], sizes = [8, 64], strides = [1, 1]} : vector<8x256xf32> to vector<8x64xf32>
    %486 = arith.index_cast %c9_i32 : i32 to index
    %c0_116 = arith.constant 0 : index
    %c0_117 = arith.constant 0 : index
    %487 = vector.load %arg6[%486, %c0_116, %c0_117] : memref<16x8x64xf32, #tpu.memory_space<vmem>>, vector<1x8x64xf32>
    %488 = vector.shape_cast %487 : vector<1x8x64xf32> to vector<8x64xf32>
    %489 = arith.mulf %483, %442 : vector<8x64xf32>
    %490 = arith.mulf %482, %484 : vector<8x64xf32>
    %491 = arith.addf %489, %490 : vector<8x64xf32>
    %492 = arith.mulf %488, %491 : vector<8x64xf32>
    %493 = math.tanh %492 : vector<8x64xf32>
    %494 = arith.mulf %485, %493 : vector<8x64xf32>
    %495 = arith.mulf %488, %494 : vector<8x64xf32>
    %496 = vector.broadcast %8 : vector<1x64xf32> to vector<8x64xf32>
    %497 = arith.mulf %495, %496 : vector<8x64xf32>
    %498 = vector.extract_strided_slice %497 {offsets = [0, 0], sizes = [8, 32], strides = [1, 1]} : vector<8x64xf32> to vector<8x32xf32>
    %cst_118 = arith.constant dense<0.000000e+00> : vector<8xf32>
    %499 = vector.multi_reduction <add>, %498, %cst_118 [1] : vector<8x32xf32> to vector<8xf32>
    %500 = vector.shape_cast %499 : vector<8xf32> to vector<8x1xf32>
    %501 = vector.extract_strided_slice %497 {offsets = [0, 32], sizes = [8, 32], strides = [1, 1]} : vector<8x64xf32> to vector<8x32xf32>
    %cst_119 = arith.constant dense<0.000000e+00> : vector<8xf32>
    %502 = vector.multi_reduction <add>, %501, %cst_119 [1] : vector<8x32xf32> to vector<8xf32>
    %503 = vector.shape_cast %502 : vector<8xf32> to vector<8x1xf32>
    %504 = vector.broadcast %c9_i32 : i32 to vector<8x16xi32>
    %505 = arith.cmpi eq, %15, %504 : vector<8x16xi32>
    %cst_120 = arith.constant 0.000000e+00 : f32
    %506 = vector.shape_cast %500 : vector<8x1xf32> to vector<8x1xf32>
    %507 = vector.broadcast %506 : vector<8x1xf32> to vector<8x16xf32>
    %508 = vector.broadcast %cst_120 : f32 to vector<8x16xf32>
    %509 = arith.select %505, %507, %508 : vector<8x16xi1>, vector<8x16xf32>
    %510 = arith.addf %468, %509 : vector<8x16xf32>
    %c15_i32_121 = arith.constant 15 : i32
    %511 = arith.subi %c15_i32_121, %c9_i32 : i32
    %512 = vector.broadcast %511 : i32 to vector<8x16xi32>
    %513 = arith.cmpi eq, %15, %512 : vector<8x16xi32>
    %cst_122 = arith.constant 0.000000e+00 : f32
    %514 = vector.shape_cast %503 : vector<8x1xf32> to vector<8x1xf32>
    %515 = vector.broadcast %514 : vector<8x1xf32> to vector<8x16xf32>
    %516 = vector.broadcast %cst_122 : f32 to vector<8x16xf32>
    %517 = arith.select %513, %515, %516 : vector<8x16xi1>, vector<8x16xf32>
    %518 = arith.addf %510, %517 : vector<8x16xf32>
    %c10_i32 = arith.constant 10 : i32
    %c8_i32_123 = arith.constant 8 : i32
    %519 = arith.muli %c10_i32, %c8_i32_123 : i32
    %520 = tpu.assume_multiple %519, 8 : i32
    %521 = arith.index_cast %520 : i32 to index
    %c0_124 = arith.constant 0 : index
    %522 = vector.load %arg9[%521, %c0_124] : memref<128x256xf32, #tpu.memory_space<vmem>>, vector<8x256xf32>
    %cst_125 = arith.constant dense<0.000000e+00> : vector<8x256xf32>
    %523 = tpu.matmul %495, %7, %cst_125 {dimension_numbers = #tpu.dot_dimension_numbers<[1], [0], [0], [1], [0, 0, 1, 1], [], []>} : vector<8x64xf32>, vector<64x256xf32>, vector<8x256xf32> -> vector<8x256xf32>
    %524 = arith.addf %522, %523 : vector<8x256xf32>
    %525 = arith.negf %524 : vector<8x256xf32>
    %526 = math.exp %525 : vector<8x256xf32>
    %cst_126 = arith.constant 1.000000e+00 : f32
    %527 = vector.broadcast %cst_126 : f32 to vector<8x256xf32>
    %528 = arith.addf %527, %526 : vector<8x256xf32>
    %529 = arith.divf %527, %528 : vector<8x256xf32>
    %530 = math.tanh %524 : vector<8x256xf32>
    %531 = arith.select %14, %530, %529 : vector<8x256xi1>, vector<8x256xf32>
    %532 = vector.extract_strided_slice %531 {offsets = [0, 0], sizes = [8, 64], strides = [1, 1]} : vector<8x256xf32> to vector<8x64xf32>
    %533 = vector.extract_strided_slice %531 {offsets = [0, 64], sizes = [8, 64], strides = [1, 1]} : vector<8x256xf32> to vector<8x64xf32>
    %534 = vector.extract_strided_slice %531 {offsets = [0, 128], sizes = [8, 64], strides = [1, 1]} : vector<8x256xf32> to vector<8x64xf32>
    %535 = vector.extract_strided_slice %531 {offsets = [0, 192], sizes = [8, 64], strides = [1, 1]} : vector<8x256xf32> to vector<8x64xf32>
    %536 = arith.index_cast %c10_i32 : i32 to index
    %c0_127 = arith.constant 0 : index
    %c0_128 = arith.constant 0 : index
    %537 = vector.load %arg6[%536, %c0_127, %c0_128] : memref<16x8x64xf32, #tpu.memory_space<vmem>>, vector<1x8x64xf32>
    %538 = vector.shape_cast %537 : vector<1x8x64xf32> to vector<8x64xf32>
    %539 = arith.mulf %533, %492 : vector<8x64xf32>
    %540 = arith.mulf %532, %534 : vector<8x64xf32>
    %541 = arith.addf %539, %540 : vector<8x64xf32>
    %542 = arith.mulf %538, %541 : vector<8x64xf32>
    %543 = math.tanh %542 : vector<8x64xf32>
    %544 = arith.mulf %535, %543 : vector<8x64xf32>
    %545 = arith.mulf %538, %544 : vector<8x64xf32>
    %546 = vector.broadcast %8 : vector<1x64xf32> to vector<8x64xf32>
    %547 = arith.mulf %545, %546 : vector<8x64xf32>
    %548 = vector.extract_strided_slice %547 {offsets = [0, 0], sizes = [8, 32], strides = [1, 1]} : vector<8x64xf32> to vector<8x32xf32>
    %cst_129 = arith.constant dense<0.000000e+00> : vector<8xf32>
    %549 = vector.multi_reduction <add>, %548, %cst_129 [1] : vector<8x32xf32> to vector<8xf32>
    %550 = vector.shape_cast %549 : vector<8xf32> to vector<8x1xf32>
    %551 = vector.extract_strided_slice %547 {offsets = [0, 32], sizes = [8, 32], strides = [1, 1]} : vector<8x64xf32> to vector<8x32xf32>
    %cst_130 = arith.constant dense<0.000000e+00> : vector<8xf32>
    %552 = vector.multi_reduction <add>, %551, %cst_130 [1] : vector<8x32xf32> to vector<8xf32>
    %553 = vector.shape_cast %552 : vector<8xf32> to vector<8x1xf32>
    %554 = vector.broadcast %c10_i32 : i32 to vector<8x16xi32>
    %555 = arith.cmpi eq, %15, %554 : vector<8x16xi32>
    %cst_131 = arith.constant 0.000000e+00 : f32
    %556 = vector.shape_cast %550 : vector<8x1xf32> to vector<8x1xf32>
    %557 = vector.broadcast %556 : vector<8x1xf32> to vector<8x16xf32>
    %558 = vector.broadcast %cst_131 : f32 to vector<8x16xf32>
    %559 = arith.select %555, %557, %558 : vector<8x16xi1>, vector<8x16xf32>
    %560 = arith.addf %518, %559 : vector<8x16xf32>
    %c15_i32_132 = arith.constant 15 : i32
    %561 = arith.subi %c15_i32_132, %c10_i32 : i32
    %562 = vector.broadcast %561 : i32 to vector<8x16xi32>
    %563 = arith.cmpi eq, %15, %562 : vector<8x16xi32>
    %cst_133 = arith.constant 0.000000e+00 : f32
    %564 = vector.shape_cast %553 : vector<8x1xf32> to vector<8x1xf32>
    %565 = vector.broadcast %564 : vector<8x1xf32> to vector<8x16xf32>
    %566 = vector.broadcast %cst_133 : f32 to vector<8x16xf32>
    %567 = arith.select %563, %565, %566 : vector<8x16xi1>, vector<8x16xf32>
    %568 = arith.addf %560, %567 : vector<8x16xf32>
    %c11_i32 = arith.constant 11 : i32
    %c8_i32_134 = arith.constant 8 : i32
    %569 = arith.muli %c11_i32, %c8_i32_134 : i32
    %570 = tpu.assume_multiple %569, 8 : i32
    %571 = arith.index_cast %570 : i32 to index
    %c0_135 = arith.constant 0 : index
    %572 = vector.load %arg9[%571, %c0_135] : memref<128x256xf32, #tpu.memory_space<vmem>>, vector<8x256xf32>
    %cst_136 = arith.constant dense<0.000000e+00> : vector<8x256xf32>
    %573 = tpu.matmul %545, %7, %cst_136 {dimension_numbers = #tpu.dot_dimension_numbers<[1], [0], [0], [1], [0, 0, 1, 1], [], []>} : vector<8x64xf32>, vector<64x256xf32>, vector<8x256xf32> -> vector<8x256xf32>
    %574 = arith.addf %572, %573 : vector<8x256xf32>
    %575 = arith.negf %574 : vector<8x256xf32>
    %576 = math.exp %575 : vector<8x256xf32>
    %cst_137 = arith.constant 1.000000e+00 : f32
    %577 = vector.broadcast %cst_137 : f32 to vector<8x256xf32>
    %578 = arith.addf %577, %576 : vector<8x256xf32>
    %579 = arith.divf %577, %578 : vector<8x256xf32>
    %580 = math.tanh %574 : vector<8x256xf32>
    %581 = arith.select %14, %580, %579 : vector<8x256xi1>, vector<8x256xf32>
    %582 = vector.extract_strided_slice %581 {offsets = [0, 0], sizes = [8, 64], strides = [1, 1]} : vector<8x256xf32> to vector<8x64xf32>
    %583 = vector.extract_strided_slice %581 {offsets = [0, 64], sizes = [8, 64], strides = [1, 1]} : vector<8x256xf32> to vector<8x64xf32>
    %584 = vector.extract_strided_slice %581 {offsets = [0, 128], sizes = [8, 64], strides = [1, 1]} : vector<8x256xf32> to vector<8x64xf32>
    %585 = vector.extract_strided_slice %581 {offsets = [0, 192], sizes = [8, 64], strides = [1, 1]} : vector<8x256xf32> to vector<8x64xf32>
    %586 = arith.index_cast %c11_i32 : i32 to index
    %c0_138 = arith.constant 0 : index
    %c0_139 = arith.constant 0 : index
    %587 = vector.load %arg6[%586, %c0_138, %c0_139] : memref<16x8x64xf32, #tpu.memory_space<vmem>>, vector<1x8x64xf32>
    %588 = vector.shape_cast %587 : vector<1x8x64xf32> to vector<8x64xf32>
    %589 = arith.mulf %583, %542 : vector<8x64xf32>
    %590 = arith.mulf %582, %584 : vector<8x64xf32>
    %591 = arith.addf %589, %590 : vector<8x64xf32>
    %592 = arith.mulf %588, %591 : vector<8x64xf32>
    %593 = math.tanh %592 : vector<8x64xf32>
    %594 = arith.mulf %585, %593 : vector<8x64xf32>
    %595 = arith.mulf %588, %594 : vector<8x64xf32>
    %596 = vector.broadcast %8 : vector<1x64xf32> to vector<8x64xf32>
    %597 = arith.mulf %595, %596 : vector<8x64xf32>
    %598 = vector.extract_strided_slice %597 {offsets = [0, 0], sizes = [8, 32], strides = [1, 1]} : vector<8x64xf32> to vector<8x32xf32>
    %cst_140 = arith.constant dense<0.000000e+00> : vector<8xf32>
    %599 = vector.multi_reduction <add>, %598, %cst_140 [1] : vector<8x32xf32> to vector<8xf32>
    %600 = vector.shape_cast %599 : vector<8xf32> to vector<8x1xf32>
    %601 = vector.extract_strided_slice %597 {offsets = [0, 32], sizes = [8, 32], strides = [1, 1]} : vector<8x64xf32> to vector<8x32xf32>
    %cst_141 = arith.constant dense<0.000000e+00> : vector<8xf32>
    %602 = vector.multi_reduction <add>, %601, %cst_141 [1] : vector<8x32xf32> to vector<8xf32>
    %603 = vector.shape_cast %602 : vector<8xf32> to vector<8x1xf32>
    %604 = vector.broadcast %c11_i32 : i32 to vector<8x16xi32>
    %605 = arith.cmpi eq, %15, %604 : vector<8x16xi32>
    %cst_142 = arith.constant 0.000000e+00 : f32
    %606 = vector.shape_cast %600 : vector<8x1xf32> to vector<8x1xf32>
    %607 = vector.broadcast %606 : vector<8x1xf32> to vector<8x16xf32>
    %608 = vector.broadcast %cst_142 : f32 to vector<8x16xf32>
    %609 = arith.select %605, %607, %608 : vector<8x16xi1>, vector<8x16xf32>
    %610 = arith.addf %568, %609 : vector<8x16xf32>
    %c15_i32_143 = arith.constant 15 : i32
    %611 = arith.subi %c15_i32_143, %c11_i32 : i32
    %612 = vector.broadcast %611 : i32 to vector<8x16xi32>
    %613 = arith.cmpi eq, %15, %612 : vector<8x16xi32>
    %cst_144 = arith.constant 0.000000e+00 : f32
    %614 = vector.shape_cast %603 : vector<8x1xf32> to vector<8x1xf32>
    %615 = vector.broadcast %614 : vector<8x1xf32> to vector<8x16xf32>
    %616 = vector.broadcast %cst_144 : f32 to vector<8x16xf32>
    %617 = arith.select %613, %615, %616 : vector<8x16xi1>, vector<8x16xf32>
    %618 = arith.addf %610, %617 : vector<8x16xf32>
    %c12_i32 = arith.constant 12 : i32
    %c8_i32_145 = arith.constant 8 : i32
    %619 = arith.muli %c12_i32, %c8_i32_145 : i32
    %620 = tpu.assume_multiple %619, 8 : i32
    %621 = arith.index_cast %620 : i32 to index
    %c0_146 = arith.constant 0 : index
    %622 = vector.load %arg9[%621, %c0_146] : memref<128x256xf32, #tpu.memory_space<vmem>>, vector<8x256xf32>
    %cst_147 = arith.constant dense<0.000000e+00> : vector<8x256xf32>
    %623 = tpu.matmul %595, %7, %cst_147 {dimension_numbers = #tpu.dot_dimension_numbers<[1], [0], [0], [1], [0, 0, 1, 1], [], []>} : vector<8x64xf32>, vector<64x256xf32>, vector<8x256xf32> -> vector<8x256xf32>
    %624 = arith.addf %622, %623 : vector<8x256xf32>
    %625 = arith.negf %624 : vector<8x256xf32>
    %626 = math.exp %625 : vector<8x256xf32>
    %cst_148 = arith.constant 1.000000e+00 : f32
    %627 = vector.broadcast %cst_148 : f32 to vector<8x256xf32>
    %628 = arith.addf %627, %626 : vector<8x256xf32>
    %629 = arith.divf %627, %628 : vector<8x256xf32>
    %630 = math.tanh %624 : vector<8x256xf32>
    %631 = arith.select %14, %630, %629 : vector<8x256xi1>, vector<8x256xf32>
    %632 = vector.extract_strided_slice %631 {offsets = [0, 0], sizes = [8, 64], strides = [1, 1]} : vector<8x256xf32> to vector<8x64xf32>
    %633 = vector.extract_strided_slice %631 {offsets = [0, 64], sizes = [8, 64], strides = [1, 1]} : vector<8x256xf32> to vector<8x64xf32>
    %634 = vector.extract_strided_slice %631 {offsets = [0, 128], sizes = [8, 64], strides = [1, 1]} : vector<8x256xf32> to vector<8x64xf32>
    %635 = vector.extract_strided_slice %631 {offsets = [0, 192], sizes = [8, 64], strides = [1, 1]} : vector<8x256xf32> to vector<8x64xf32>
    %636 = arith.index_cast %c12_i32 : i32 to index
    %c0_149 = arith.constant 0 : index
    %c0_150 = arith.constant 0 : index
    %637 = vector.load %arg6[%636, %c0_149, %c0_150] : memref<16x8x64xf32, #tpu.memory_space<vmem>>, vector<1x8x64xf32>
    %638 = vector.shape_cast %637 : vector<1x8x64xf32> to vector<8x64xf32>
    %639 = arith.mulf %633, %592 : vector<8x64xf32>
    %640 = arith.mulf %632, %634 : vector<8x64xf32>
    %641 = arith.addf %639, %640 : vector<8x64xf32>
    %642 = arith.mulf %638, %641 : vector<8x64xf32>
    %643 = math.tanh %642 : vector<8x64xf32>
    %644 = arith.mulf %635, %643 : vector<8x64xf32>
    %645 = arith.mulf %638, %644 : vector<8x64xf32>
    %646 = vector.broadcast %8 : vector<1x64xf32> to vector<8x64xf32>
    %647 = arith.mulf %645, %646 : vector<8x64xf32>
    %648 = vector.extract_strided_slice %647 {offsets = [0, 0], sizes = [8, 32], strides = [1, 1]} : vector<8x64xf32> to vector<8x32xf32>
    %cst_151 = arith.constant dense<0.000000e+00> : vector<8xf32>
    %649 = vector.multi_reduction <add>, %648, %cst_151 [1] : vector<8x32xf32> to vector<8xf32>
    %650 = vector.shape_cast %649 : vector<8xf32> to vector<8x1xf32>
    %651 = vector.extract_strided_slice %647 {offsets = [0, 32], sizes = [8, 32], strides = [1, 1]} : vector<8x64xf32> to vector<8x32xf32>
    %cst_152 = arith.constant dense<0.000000e+00> : vector<8xf32>
    %652 = vector.multi_reduction <add>, %651, %cst_152 [1] : vector<8x32xf32> to vector<8xf32>
    %653 = vector.shape_cast %652 : vector<8xf32> to vector<8x1xf32>
    %654 = vector.broadcast %c12_i32 : i32 to vector<8x16xi32>
    %655 = arith.cmpi eq, %15, %654 : vector<8x16xi32>
    %cst_153 = arith.constant 0.000000e+00 : f32
    %656 = vector.shape_cast %650 : vector<8x1xf32> to vector<8x1xf32>
    %657 = vector.broadcast %656 : vector<8x1xf32> to vector<8x16xf32>
    %658 = vector.broadcast %cst_153 : f32 to vector<8x16xf32>
    %659 = arith.select %655, %657, %658 : vector<8x16xi1>, vector<8x16xf32>
    %660 = arith.addf %618, %659 : vector<8x16xf32>
    %c15_i32_154 = arith.constant 15 : i32
    %661 = arith.subi %c15_i32_154, %c12_i32 : i32
    %662 = vector.broadcast %661 : i32 to vector<8x16xi32>
    %663 = arith.cmpi eq, %15, %662 : vector<8x16xi32>
    %cst_155 = arith.constant 0.000000e+00 : f32
    %664 = vector.shape_cast %653 : vector<8x1xf32> to vector<8x1xf32>
    %665 = vector.broadcast %664 : vector<8x1xf32> to vector<8x16xf32>
    %666 = vector.broadcast %cst_155 : f32 to vector<8x16xf32>
    %667 = arith.select %663, %665, %666 : vector<8x16xi1>, vector<8x16xf32>
    %668 = arith.addf %660, %667 : vector<8x16xf32>
    %c13_i32 = arith.constant 13 : i32
    %c8_i32_156 = arith.constant 8 : i32
    %669 = arith.muli %c13_i32, %c8_i32_156 : i32
    %670 = tpu.assume_multiple %669, 8 : i32
    %671 = arith.index_cast %670 : i32 to index
    %c0_157 = arith.constant 0 : index
    %672 = vector.load %arg9[%671, %c0_157] : memref<128x256xf32, #tpu.memory_space<vmem>>, vector<8x256xf32>
    %cst_158 = arith.constant dense<0.000000e+00> : vector<8x256xf32>
    %673 = tpu.matmul %645, %7, %cst_158 {dimension_numbers = #tpu.dot_dimension_numbers<[1], [0], [0], [1], [0, 0, 1, 1], [], []>} : vector<8x64xf32>, vector<64x256xf32>, vector<8x256xf32> -> vector<8x256xf32>
    %674 = arith.addf %672, %673 : vector<8x256xf32>
    %675 = arith.negf %674 : vector<8x256xf32>
    %676 = math.exp %675 : vector<8x256xf32>
    %cst_159 = arith.constant 1.000000e+00 : f32
    %677 = vector.broadcast %cst_159 : f32 to vector<8x256xf32>
    %678 = arith.addf %677, %676 : vector<8x256xf32>
    %679 = arith.divf %677, %678 : vector<8x256xf32>
    %680 = math.tanh %674 : vector<8x256xf32>
    %681 = arith.select %14, %680, %679 : vector<8x256xi1>, vector<8x256xf32>
    %682 = vector.extract_strided_slice %681 {offsets = [0, 0], sizes = [8, 64], strides = [1, 1]} : vector<8x256xf32> to vector<8x64xf32>
    %683 = vector.extract_strided_slice %681 {offsets = [0, 64], sizes = [8, 64], strides = [1, 1]} : vector<8x256xf32> to vector<8x64xf32>
    %684 = vector.extract_strided_slice %681 {offsets = [0, 128], sizes = [8, 64], strides = [1, 1]} : vector<8x256xf32> to vector<8x64xf32>
    %685 = vector.extract_strided_slice %681 {offsets = [0, 192], sizes = [8, 64], strides = [1, 1]} : vector<8x256xf32> to vector<8x64xf32>
    %686 = arith.index_cast %c13_i32 : i32 to index
    %c0_160 = arith.constant 0 : index
    %c0_161 = arith.constant 0 : index
    %687 = vector.load %arg6[%686, %c0_160, %c0_161] : memref<16x8x64xf32, #tpu.memory_space<vmem>>, vector<1x8x64xf32>
    %688 = vector.shape_cast %687 : vector<1x8x64xf32> to vector<8x64xf32>
    %689 = arith.mulf %683, %642 : vector<8x64xf32>
    %690 = arith.mulf %682, %684 : vector<8x64xf32>
    %691 = arith.addf %689, %690 : vector<8x64xf32>
    %692 = arith.mulf %688, %691 : vector<8x64xf32>
    %693 = math.tanh %692 : vector<8x64xf32>
    %694 = arith.mulf %685, %693 : vector<8x64xf32>
    %695 = arith.mulf %688, %694 : vector<8x64xf32>
    %696 = vector.broadcast %8 : vector<1x64xf32> to vector<8x64xf32>
    %697 = arith.mulf %695, %696 : vector<8x64xf32>
    %698 = vector.extract_strided_slice %697 {offsets = [0, 0], sizes = [8, 32], strides = [1, 1]} : vector<8x64xf32> to vector<8x32xf32>
    %cst_162 = arith.constant dense<0.000000e+00> : vector<8xf32>
    %699 = vector.multi_reduction <add>, %698, %cst_162 [1] : vector<8x32xf32> to vector<8xf32>
    %700 = vector.shape_cast %699 : vector<8xf32> to vector<8x1xf32>
    %701 = vector.extract_strided_slice %697 {offsets = [0, 32], sizes = [8, 32], strides = [1, 1]} : vector<8x64xf32> to vector<8x32xf32>
    %cst_163 = arith.constant dense<0.000000e+00> : vector<8xf32>
    %702 = vector.multi_reduction <add>, %701, %cst_163 [1] : vector<8x32xf32> to vector<8xf32>
    %703 = vector.shape_cast %702 : vector<8xf32> to vector<8x1xf32>
    %704 = vector.broadcast %c13_i32 : i32 to vector<8x16xi32>
    %705 = arith.cmpi eq, %15, %704 : vector<8x16xi32>
    %cst_164 = arith.constant 0.000000e+00 : f32
    %706 = vector.shape_cast %700 : vector<8x1xf32> to vector<8x1xf32>
    %707 = vector.broadcast %706 : vector<8x1xf32> to vector<8x16xf32>
    %708 = vector.broadcast %cst_164 : f32 to vector<8x16xf32>
    %709 = arith.select %705, %707, %708 : vector<8x16xi1>, vector<8x16xf32>
    %710 = arith.addf %668, %709 : vector<8x16xf32>
    %c15_i32_165 = arith.constant 15 : i32
    %711 = arith.subi %c15_i32_165, %c13_i32 : i32
    %712 = vector.broadcast %711 : i32 to vector<8x16xi32>
    %713 = arith.cmpi eq, %15, %712 : vector<8x16xi32>
    %cst_166 = arith.constant 0.000000e+00 : f32
    %714 = vector.shape_cast %703 : vector<8x1xf32> to vector<8x1xf32>
    %715 = vector.broadcast %714 : vector<8x1xf32> to vector<8x16xf32>
    %716 = vector.broadcast %cst_166 : f32 to vector<8x16xf32>
    %717 = arith.select %713, %715, %716 : vector<8x16xi1>, vector<8x16xf32>
    %718 = arith.addf %710, %717 : vector<8x16xf32>
    %c14_i32 = arith.constant 14 : i32
    %c8_i32_167 = arith.constant 8 : i32
    %719 = arith.muli %c14_i32, %c8_i32_167 : i32
    %720 = tpu.assume_multiple %719, 8 : i32
    %721 = arith.index_cast %720 : i32 to index
    %c0_168 = arith.constant 0 : index
    %722 = vector.load %arg9[%721, %c0_168] : memref<128x256xf32, #tpu.memory_space<vmem>>, vector<8x256xf32>
    %cst_169 = arith.constant dense<0.000000e+00> : vector<8x256xf32>
    %723 = tpu.matmul %695, %7, %cst_169 {dimension_numbers = #tpu.dot_dimension_numbers<[1], [0], [0], [1], [0, 0, 1, 1], [], []>} : vector<8x64xf32>, vector<64x256xf32>, vector<8x256xf32> -> vector<8x256xf32>
    %724 = arith.addf %722, %723 : vector<8x256xf32>
    %725 = arith.negf %724 : vector<8x256xf32>
    %726 = math.exp %725 : vector<8x256xf32>
    %cst_170 = arith.constant 1.000000e+00 : f32
    %727 = vector.broadcast %cst_170 : f32 to vector<8x256xf32>
    %728 = arith.addf %727, %726 : vector<8x256xf32>
    %729 = arith.divf %727, %728 : vector<8x256xf32>
    %730 = math.tanh %724 : vector<8x256xf32>
    %731 = arith.select %14, %730, %729 : vector<8x256xi1>, vector<8x256xf32>
    %732 = vector.extract_strided_slice %731 {offsets = [0, 0], sizes = [8, 64], strides = [1, 1]} : vector<8x256xf32> to vector<8x64xf32>
    %733 = vector.extract_strided_slice %731 {offsets = [0, 64], sizes = [8, 64], strides = [1, 1]} : vector<8x256xf32> to vector<8x64xf32>
    %734 = vector.extract_strided_slice %731 {offsets = [0, 128], sizes = [8, 64], strides = [1, 1]} : vector<8x256xf32> to vector<8x64xf32>
    %735 = vector.extract_strided_slice %731 {offsets = [0, 192], sizes = [8, 64], strides = [1, 1]} : vector<8x256xf32> to vector<8x64xf32>
    %736 = arith.index_cast %c14_i32 : i32 to index
    %c0_171 = arith.constant 0 : index
    %c0_172 = arith.constant 0 : index
    %737 = vector.load %arg6[%736, %c0_171, %c0_172] : memref<16x8x64xf32, #tpu.memory_space<vmem>>, vector<1x8x64xf32>
    %738 = vector.shape_cast %737 : vector<1x8x64xf32> to vector<8x64xf32>
    %739 = arith.mulf %733, %692 : vector<8x64xf32>
    %740 = arith.mulf %732, %734 : vector<8x64xf32>
    %741 = arith.addf %739, %740 : vector<8x64xf32>
    %742 = arith.mulf %738, %741 : vector<8x64xf32>
    %743 = math.tanh %742 : vector<8x64xf32>
    %744 = arith.mulf %735, %743 : vector<8x64xf32>
    %745 = arith.mulf %738, %744 : vector<8x64xf32>
    %746 = vector.broadcast %8 : vector<1x64xf32> to vector<8x64xf32>
    %747 = arith.mulf %745, %746 : vector<8x64xf32>
    %748 = vector.extract_strided_slice %747 {offsets = [0, 0], sizes = [8, 32], strides = [1, 1]} : vector<8x64xf32> to vector<8x32xf32>
    %cst_173 = arith.constant dense<0.000000e+00> : vector<8xf32>
    %749 = vector.multi_reduction <add>, %748, %cst_173 [1] : vector<8x32xf32> to vector<8xf32>
    %750 = vector.shape_cast %749 : vector<8xf32> to vector<8x1xf32>
    %751 = vector.extract_strided_slice %747 {offsets = [0, 32], sizes = [8, 32], strides = [1, 1]} : vector<8x64xf32> to vector<8x32xf32>
    %cst_174 = arith.constant dense<0.000000e+00> : vector<8xf32>
    %752 = vector.multi_reduction <add>, %751, %cst_174 [1] : vector<8x32xf32> to vector<8xf32>
    %753 = vector.shape_cast %752 : vector<8xf32> to vector<8x1xf32>
    %754 = vector.broadcast %c14_i32 : i32 to vector<8x16xi32>
    %755 = arith.cmpi eq, %15, %754 : vector<8x16xi32>
    %cst_175 = arith.constant 0.000000e+00 : f32
    %756 = vector.shape_cast %750 : vector<8x1xf32> to vector<8x1xf32>
    %757 = vector.broadcast %756 : vector<8x1xf32> to vector<8x16xf32>
    %758 = vector.broadcast %cst_175 : f32 to vector<8x16xf32>
    %759 = arith.select %755, %757, %758 : vector<8x16xi1>, vector<8x16xf32>
    %760 = arith.addf %718, %759 : vector<8x16xf32>
    %c15_i32_176 = arith.constant 15 : i32
    %761 = arith.subi %c15_i32_176, %c14_i32 : i32
    %762 = vector.broadcast %761 : i32 to vector<8x16xi32>
    %763 = arith.cmpi eq, %15, %762 : vector<8x16xi32>
    %cst_177 = arith.constant 0.000000e+00 : f32
    %764 = vector.shape_cast %753 : vector<8x1xf32> to vector<8x1xf32>
    %765 = vector.broadcast %764 : vector<8x1xf32> to vector<8x16xf32>
    %766 = vector.broadcast %cst_177 : f32 to vector<8x16xf32>
    %767 = arith.select %763, %765, %766 : vector<8x16xi1>, vector<8x16xf32>
    %768 = arith.addf %760, %767 : vector<8x16xf32>
    %c15_i32_178 = arith.constant 15 : i32
    %c8_i32_179 = arith.constant 8 : i32
    %769 = arith.muli %c15_i32_178, %c8_i32_179 : i32
    %770 = tpu.assume_multiple %769, 8 : i32
    %771 = arith.index_cast %770 : i32 to index
    %c0_180 = arith.constant 0 : index
    %772 = vector.load %arg9[%771, %c0_180] : memref<128x256xf32, #tpu.memory_space<vmem>>, vector<8x256xf32>
    %cst_181 = arith.constant dense<0.000000e+00> : vector<8x256xf32>
    %773 = tpu.matmul %745, %7, %cst_181 {dimension_numbers = #tpu.dot_dimension_numbers<[1], [0], [0], [1], [0, 0, 1, 1], [], []>} : vector<8x64xf32>, vector<64x256xf32>, vector<8x256xf32> -> vector<8x256xf32>
    %774 = arith.addf %772, %773 : vector<8x256xf32>
    %775 = arith.negf %774 : vector<8x256xf32>
    %776 = math.exp %775 : vector<8x256xf32>
    %cst_182 = arith.constant 1.000000e+00 : f32
    %777 = vector.broadcast %cst_182 : f32 to vector<8x256xf32>
    %778 = arith.addf %777, %776 : vector<8x256xf32>
    %779 = arith.divf %777, %778 : vector<8x256xf32>
    %780 = math.tanh %774 : vector<8x256xf32>
    %781 = arith.select %14, %780, %779 : vector<8x256xi1>, vector<8x256xf32>
    %782 = vector.extract_strided_slice %781 {offsets = [0, 0], sizes = [8, 64], strides = [1, 1]} : vector<8x256xf32> to vector<8x64xf32>
    %783 = vector.extract_strided_slice %781 {offsets = [0, 64], sizes = [8, 64], strides = [1, 1]} : vector<8x256xf32> to vector<8x64xf32>
    %784 = vector.extract_strided_slice %781 {offsets = [0, 128], sizes = [8, 64], strides = [1, 1]} : vector<8x256xf32> to vector<8x64xf32>
    %785 = vector.extract_strided_slice %781 {offsets = [0, 192], sizes = [8, 64], strides = [1, 1]} : vector<8x256xf32> to vector<8x64xf32>
    %786 = arith.index_cast %c15_i32_178 : i32 to index
    %c0_183 = arith.constant 0 : index
    %c0_184 = arith.constant 0 : index
    %787 = vector.load %arg6[%786, %c0_183, %c0_184] : memref<16x8x64xf32, #tpu.memory_space<vmem>>, vector<1x8x64xf32>
    %788 = vector.shape_cast %787 : vector<1x8x64xf32> to vector<8x64xf32>
    %789 = arith.mulf %783, %742 : vector<8x64xf32>
    %790 = arith.mulf %782, %784 : vector<8x64xf32>
    %791 = arith.addf %789, %790 : vector<8x64xf32>
    %792 = arith.mulf %788, %791 : vector<8x64xf32>
    %793 = math.tanh %792 : vector<8x64xf32>
    %794 = arith.mulf %785, %793 : vector<8x64xf32>
    %795 = arith.mulf %788, %794 : vector<8x64xf32>
    %796 = vector.broadcast %8 : vector<1x64xf32> to vector<8x64xf32>
    %797 = arith.mulf %795, %796 : vector<8x64xf32>
    %798 = vector.extract_strided_slice %797 {offsets = [0, 0], sizes = [8, 32], strides = [1, 1]} : vector<8x64xf32> to vector<8x32xf32>
    %cst_185 = arith.constant dense<0.000000e+00> : vector<8xf32>
    %799 = vector.multi_reduction <add>, %798, %cst_185 [1] : vector<8x32xf32> to vector<8xf32>
    %800 = vector.shape_cast %799 : vector<8xf32> to vector<8x1xf32>
    %801 = vector.extract_strided_slice %797 {offsets = [0, 32], sizes = [8, 32], strides = [1, 1]} : vector<8x64xf32> to vector<8x32xf32>
    %cst_186 = arith.constant dense<0.000000e+00> : vector<8xf32>
    %802 = vector.multi_reduction <add>, %801, %cst_186 [1] : vector<8x32xf32> to vector<8xf32>
    %803 = vector.shape_cast %802 : vector<8xf32> to vector<8x1xf32>
    %804 = vector.broadcast %c15_i32_178 : i32 to vector<8x16xi32>
    %805 = arith.cmpi eq, %15, %804 : vector<8x16xi32>
    %cst_187 = arith.constant 0.000000e+00 : f32
    %806 = vector.shape_cast %800 : vector<8x1xf32> to vector<8x1xf32>
    %807 = vector.broadcast %806 : vector<8x1xf32> to vector<8x16xf32>
    %808 = vector.broadcast %cst_187 : f32 to vector<8x16xf32>
    %809 = arith.select %805, %807, %808 : vector<8x16xi1>, vector<8x16xf32>
    %810 = arith.addf %768, %809 : vector<8x16xf32>
    %c15_i32_188 = arith.constant 15 : i32
    %811 = arith.subi %c15_i32_188, %c15_i32_178 : i32
    %812 = vector.broadcast %811 : i32 to vector<8x16xi32>
    %813 = arith.cmpi eq, %15, %812 : vector<8x16xi32>
    %cst_189 = arith.constant 0.000000e+00 : f32
    %814 = vector.shape_cast %803 : vector<8x1xf32> to vector<8x1xf32>
    %815 = vector.broadcast %814 : vector<8x1xf32> to vector<8x16xf32>
    %816 = vector.broadcast %cst_189 : f32 to vector<8x16xf32>
    %817 = arith.select %813, %815, %816 : vector<8x16xi1>, vector<8x16xf32>
    %818 = arith.addf %810, %817 : vector<8x16xf32>
    %c16_i32 = arith.constant 16 : i32
    %c0_190 = arith.constant 0 : index
    %c0_191 = arith.constant 0 : index
    %819 = vector.load %arg7[%c0_190, %c0_191] : memref<8x16xf32, #tpu.memory_space<vmem>>, vector<8x16xf32>
    %cst_192 = arith.constant 0.000000e+00 : f32
    %820 = vector.broadcast %cst_192 : f32 to vector<8x16xf32>
    %821 = arith.cmpf ogt, %819, %820 : vector<8x16xf32>
    %cst_193 = arith.constant 1.000000e-10 : f32
    %822 = vector.broadcast %cst_193 : f32 to vector<8x16xf32>
    %823 = arith.select %821, %822, %818 : vector<8x16xi1>, vector<8x16xf32>
    %cst_194 = arith.constant dense<0xFF800000> : vector<8xf32>
    %824 = vector.multi_reduction <maximumf>, %823, %cst_194 [1] : vector<8x16xf32> to vector<8xf32>
    %825 = vector.shape_cast %824 : vector<8xf32> to vector<8x1xf32>
    %826 = vector.broadcast %825 : vector<8x1xf32> to vector<8x16xf32>
    %827 = arith.subf %823, %826 : vector<8x16xf32>
    %828 = math.exp %827 : vector<8x16xf32>
    %cst_195 = arith.constant dense<0.000000e+00> : vector<8xf32>
    %829 = vector.multi_reduction <add>, %828, %cst_195 [1] : vector<8x16xf32> to vector<8xf32>
    %830 = vector.shape_cast %829 : vector<8xf32> to vector<8x1xf32>
    %831 = vector.broadcast %830 : vector<8x1xf32> to vector<8x16xf32>
    %832 = arith.divf %828, %831 : vector<8x16xf32>
    %c0_196 = arith.constant 0 : index
    %c0_197 = arith.constant 0 : index
    %833 = vector.load %arg8[%c0_196, %c0_197] : memref<8x16xf32, #tpu.memory_space<vmem>>, vector<8x16xf32>
    tpu.vector_store %arg8[%c0_196, %c0_197], %832 {strides = array<i32>} : memref<8x16xf32, #tpu.memory_space<vmem>>, vector<8x16xf32>,
    return
  }
  func.func @transform_0(%arg0: i32) -> (i32, i32) {
    %c0_i32 = arith.constant 0 : i32
    %c0_i32_0 = arith.constant 0 : i32
    %c0_i32_1 = arith.constant 0 : i32
    return %c0_i32, %c0_i32_0 : i32, i32
  }
  func.func @transform_1(%arg0: i32) -> (i32, i32) {
    %c0_i32 = arith.constant 0 : i32
    %c0_i32_0 = arith.constant 0 : i32
    %c0_i32_1 = arith.constant 0 : i32
    return %c0_i32, %c0_i32_0 : i32, i32
  }
  func.func @transform_2(%arg0: i32) -> (i32, i32) {
    %c0_i32 = arith.constant 0 : i32
    %c0_i32_0 = arith.constant 0 : i32
    %c0_i32_1 = arith.constant 0 : i32
    return %c0_i32, %c0_i32_0 : i32, i32
  }
  func.func @transform_3(%arg0: i32) -> (i32, i32) {
    %c0_i32 = arith.constant 0 : i32
    %c0_i32_0 = arith.constant 0 : i32
    %c0_i32_1 = arith.constant 0 : i32
    return %c0_i32, %c0_i32_0 : i32, i32
  }
  func.func @transform_4(%arg0: i32) -> (i32, i32) {
    %c0_i32 = arith.constant 0 : i32
    %c0_i32_0 = arith.constant 0 : i32
    %c0_i32_1 = arith.constant 0 : i32
    return %c0_i32, %c0_i32_0 : i32, i32
  }
  func.func @transform_5(%arg0: i32) -> (i32, i32, i32) {
    %c0_i32 = arith.constant 0 : i32
    %c0_i32_0 = arith.constant 0 : i32
    %c0_i32_1 = arith.constant 0 : i32
    %c0_i32_2 = arith.constant 0 : i32
    return %c0_i32, %c0_i32_0, %c0_i32_1 : i32, i32, i32
  }
  func.func @transform_6(%arg0: i32) -> (i32, i32) {
    %c0_i32 = arith.constant 0 : i32
    %c0_i32_0 = arith.constant 0 : i32
    %c0_i32_1 = arith.constant 0 : i32
    return %c0_i32, %c0_i32_0 : i32, i32
  }
  func.func @transform_7(%arg0: i32) -> (i32, i32) {
    %c0_i32 = arith.constant 0 : i32
    %c0_i32_0 = arith.constant 0 : i32
    %c0_i32_1 = arith.constant 0 : i32
    return %c0_i32, %c0_i32_0 : i32, i32
  }
}

</mosaic_0001>

<bundles_post_ra>
// kernel: tpu_custom_call.1
= control target key start
LH: loop header
LB: loop body
LE: loop exit
PB: predicated region body
PF: predicated region fallthrough
CT: control target
= control target key end

     0   :  { %12 = vsyncpa [#allocation4], 0  ;;  %s4195_s0 = inlined_call_operand.vmem [shape: f32[128,64], index: 0, kind: input, shape index: {}]   ;;  %s4196_s1 = inlined_call_operand.vmem [shape: f32[64,256], index: 1, kind: input, shape index: {}]   ;;  %s4197_s2 = inlined_call_operand.hbm [shape: f32[64,256], index: 2, kind: input, shape index: {}]   ;;  %s4198_s3 = inlined_call_operand.vmem [shape: f32[1,256], index: 3, kind: input, shape index: {}]   ;;  %s4199_s4 = inlined_call_operand.vmem [shape: f32[1,64], index: 4, kind: input, shape index: {}]   ;;  %s4200_s5 = inlined_call_operand.hbm [shape: f32[16,8,64], index: 5, kind: input, shape index: {}]   ;;  %s4201_s6 = inlined_call_operand.vmem [shape: f32[8,16], index: 6, kind: input, shape index: {}]   ;;  %s4202_s7 = inlined_call_operand.hbm [shape: f32[8,16], index: 7, kind: output, shape index: {}]  }
   0x1   :  { %13 = vsyncpa [#allocation7], 0 }
   0x2   :  { %14 = vsyncpa [#allocation5], 0  ;;  %s3366_s24 = smov [#allocation3]   ;;  %s3294_s28 = scalar_lea.hbm %s4197_s2, 2048 }
   0x3   :  { %s24_s25 = sshll.u32 %s3366_s24, 4  ;;  %p3295_p0 = scmp.ne.s32.totalorder %s4197_s2, %s3294_s28  ;;  %s25_s25 = int_to_ptr.vmem [resolvable:$true] %s24_s25 }
   0x4   :  { %p3298_p1 = scmp.lt.u32.totalorder %s3294_s28, %s4197_s2 }
   0x6   :  { %p3300_p2 = pnand %p3298_p1, %p3295_p0 }
   0x8   :  { %3303 = shalt.err (!%p3300_p2)
}
   0x9   :  { %s3304_s10 = scalar_lea.vmem %s25_s25, 2048  ;;  %p3309_p4 = scmp.lt.s32.totalorder %s25_s25, %s25_s25 }
   0xa   :  { %p3305_p3 = scmp.ne.s32.totalorder %s25_s25, %s3304_s10  ;;  %p3310_p5 = scmp.lt.s32.totalorder %s3304_s10, %s3304_s10 }
   0xc   :  { %p3311_p6 = por %p3310_p5, %p3309_p4 }
   0xe   :  { %p3312_p7 = pnand %p3311_p6, %p3305_p3 }
  0x10   :  { %3315 = shalt.err (!%p3312_p7)
}
  0x11   :  { %s3367_s11 = smov 256   ;;  %s3368_s12 = smov 16  }
  0x12   :  { %30 = dma.hbm_to_vmem [thread:$0]  %s4197_s2, 2048, %s25_s25, [#allocation4], %s3367_s11, %s3367_s11, %s3368_s12  }
  0x13   :  { %s3369_s15 = smov [#allocation6]   ;;  %s3316_s19 = scalar_lea.hbm %s4200_s5, 2048 }
  0x14   :  { %s40_s16 = sshll.u32 %s3369_s15, 4  ;;  %p3317_p8 = scmp.ne.s32.totalorder %s4200_s5, %s3316_s19  ;;  %s41_s16 = int_to_ptr.vmem [resolvable:$true] %s40_s16 }
  0x15   :  { %p3320_p9 = scmp.lt.u32.totalorder %s3316_s19, %s4200_s5 }
  0x17   :  { %p3322_p10 = pnand %p3320_p9, %p3317_p8 }
  0x19   :  { %3325 = shalt.err (!%p3322_p10)
}
  0x1a   :  { %s3326_s24 = scalar_lea.vmem %s41_s16, 2048  ;;  %p3331_p12 = scmp.lt.s32.totalorder %s41_s16, %s41_s16 }
  0x1b   :  { %p3327_p11 = scmp.ne.s32.totalorder %s41_s16, %s3326_s24  ;;  %p3332_p13 = scmp.lt.s32.totalorder %s3326_s24, %s3326_s24 }
  0x1d   :  { %p3333_p0 = por %p3332_p13, %p3331_p12 }
  0x1f   :  { %p3334_p1 = pnand %p3333_p0, %p3327_p11 }
  0x21   :  { %3337 = shalt.err (!%p3334_p1)
}
  0x22   :  { %s3370_s2 = smov 128   ;;  %s3371_s25 = smov 8  }
  0x23   :  { %46 = dma.hbm_to_vmem [thread:$0]  %s4200_s5, 2048, %s41_s16, [#allocation7], %s3370_s2, %s3370_s2, %s3371_s25  }
  0x24   :  { %3360 = dma.done.wait [#allocation4], 2048  }
  0x25   :  { %3361 = vsyncadd [#allocation4], 4294965248 }
  0x26   :  { %3362 = dma.done.wait [#allocation7], 2048  }
  0x27   :  { %3363 = vsyncadd [#allocation7], 4294965248  ;;  %v3372_v0 = vmov 0.0   ;;  %v72_v1 = vld [vmem:[%s4196_s1 + $0x8] sm:$0xff]  ;;  %v74_v2 = vld [vmem:[%s4196_s1 + $0x18] sm:$0xff]  ;;  %vm99_vm0 = vcmask 523264  }
  0x28   :  { %212 = vmatprep.mubr.f32.mxu1 %v3372_v0  ;;  %1299 = vmatprep.mubr.f32.mxu0 %v3372_v0  ;;  %v71_v3 = vld [vmem:[%s4196_s1] sm:$0xff]  ;;  %v2752_v4 = vpack.c.bf16 %v74_v2, %v72_v1  ;;  %v73_v5 = vld [vmem:[%s4196_s1 + $0x10] sm:$0xff]  ;;  %v76_v6 = vld [vmem:[%s4196_s1 + $0x28] sm:$0xff]  ;;  %vm495_vm2 = vcmask 261120   ;;  %s3374_s19 = smov 96  }
  0x29   :  { %v78_v7 = vld [vmem:[%s4196_s1 + $0x38] sm:$0xff]  ;;  %v2754_v8 = vpack.c.bf16 %v73_v5, %v71_v3  ;;  %v75_v10 = vld [vmem:[%s4196_s1 + $0x20] sm:$0xff]  ;;  %v77_v11 = vld [vmem:[%s4196_s1 + $0x30] sm:$0xff] }
  0x2a   :  { %v2756_v9 = vpack.c.bf16 %v78_v7, %v76_v6  ;;  %v80_v12 = vld [vmem:[%s4196_s1 + $0x48] sm:$0xff]  ;;  %2753 = vmatprep.subr.bf16.mxu1 %v2752_v4  ;;  %v82_v13 = vld [vmem:[%s4196_s1 + $0x58] sm:$0xff]  ;;  %v2758_v14 = vpack.c.bf16 %v77_v11, %v75_v10  ;;  %v79_v15 = vld [vmem:[%s4196_s1 + $0x40] sm:$0xff] }
  0x2b   :  { %2755 = vmatpush1.bf16.msra.mxu1 %v2754_v8  ;;  %v81_v16 = vld [vmem:[%s4196_s1 + $0x50] sm:$0xff]  ;;  %v2760_v17 = vpack.c.bf16 %v82_v13, %v80_v12  ;;  %v84_v18 = vld [vmem:[%s4196_s1 + $0x68] sm:$0xff]  ;;  %v86_v19 = vld [vmem:[%s4196_s1 + $0x78] sm:$0xff] }
  0x2c   :  { %2757 = vmatprep.subr.bf16.mxu1 %v2756_v9  ;;  %v342_v20 = vld [vmem:[#allocation3 + $0x8] sm:$0xff]  ;;  %v344_v21 = vld [vmem:[#allocation3 + $0x18] sm:$0xff]  ;;  %v341_v22 = vld [vmem:[#allocation3] sm:$0xff]  ;;  %v2762_v25 = vpack.c.bf16 %v81_v16, %v79_v15  ;;  %v2764_v30 = vpack.c.bf16 %v86_v19, %v84_v18  ;;  %v89_v16 = vlaneseq }
  0x2d   :  { %v343_v23 = vld [vmem:[#allocation3 + $0x10] sm:$0xff]  ;;  %v3484_v24 = vpack.c.bf16 %v344_v21, %v342_v20  ;;  %v83_v26 = vld [vmem:[%s4196_s1 + $0x60] sm:$0xff]  ;;  %v346_v28 = vld [vmem:[#allocation3 + $0x28] sm:$0xff] }
  0x2e   :  { %v3489_v27 = vpack.c.bf16 %v343_v23, %v341_v22  ;;  %v348_v29 = vld [vmem:[#allocation3 + $0x38] sm:$0xff]  ;;  %v85_v31 = vld [vmem:[%s4196_s1 + $0x70] sm:$0xff]  ;;  %v345_v33 = vld [vmem:[#allocation3 + $0x20] sm:$0xff]  ;;  %v90_v19 = vshrl.u32 %v89_v16, 7 }
  0x2f   :  { %2759 = vmatpush1.bf16.msra.mxu1 %v2758_v14  ;;  %v3494_v32 = vpack.c.bf16 %v348_v29, %v346_v28  ;;  %v347_v34 = vld [vmem:[#allocation3 + $0x30] sm:$0xff]  ;;  %2865 = vmatprep.subr.bf16.mxu0 %v3484_v24  ;;  %v350_v35 = vld [vmem:[#allocation3 + $0x48] sm:$0xff]  ;;  %v352_v36 = vld [vmem:[#allocation3 + $0x58] sm:$0xff]  ;;  %v2766_v37 = vpack.c.bf16 %v85_v31, %v83_v26 }
  0x30   :  { %2761 = vmatprep.subr.bf16.mxu1 %v2760_v17  ;;  %2867 = vmatpush1.bf16.msra.mxu0 %v3489_v27  ;;  %v3499_v38 = vpack.c.bf16 %v347_v34, %v345_v33  ;;  %v3501_v39 = vpack.c.bf16 %v352_v36, %v350_v35  ;;  %v349_v40 = vld [vmem:[#allocation3 + $0x40] sm:$0xff]  ;;  %v351_v41 = vld [vmem:[#allocation3 + $0x50] sm:$0xff]  ;;  %v354_v42 = vld [vmem:[#allocation3 + $0x68] sm:$0xff]  ;;  %v91_v22 = vsub.s32 0, %v90_v19 }
  0x31   :  { %2869 = vmatprep.subr.bf16.mxu0 %v3494_v32  ;;  %v356_v43 = vld [vmem:[#allocation3 + $0x78] sm:$0xff]  ;;  %v55_v44 = vld [vmem:[%s4195_s0] sm:$0xff]  ;;  %v3508_v45 = vpack.c.bf16 %v351_v41, %v349_v40  ;;  %v355_v48 = vld [vmem:[#allocation3 + $0x70] sm:$0xff] }
  0x32   :  { %v3511_v46 = vpack.c.bf16 %v356_v43, %v354_v42  ;;  %v353_v47 = vld [vmem:[#allocation3 + $0x60] sm:$0xff]  ;;  %v56_v49 = vld [vmem:[%s4195_s0 + $0x8] sm:$0xff]  ;;  %v57_v51 = vld [vmem:[%s4195_s0 + $0x10] sm:$0xff] }
  0x33   :  { %2763 = vmatpush1.bf16.msra.mxu1 %v2762_v25  ;;  %v3521_v50 = vpack.c.bf16 %v355_v48, %v353_v47  ;;  %v58_v52 = vld [vmem:[%s4195_s0 + $0x18] sm:$0xff]  ;;  %v59_v53 = vld [vmem:[%s4195_s0 + $0x20] sm:$0xff]  ;;  %v60_v54 = vld [vmem:[%s4195_s0 + $0x28] sm:$0xff]  ;;  %v95_v25 = vsub.s32 1, %v90_v19 }
  0x34   :  { %2765 = vmatprep.subr.bf16.mxu1 %v2764_v30  ;;  %2871 = vmatpush1.bf16.msra.mxu0 %v3499_v38  ;;  %v61_v55 = vld [vmem:[%s4195_s0 + $0x30] sm:$0xff]  ;;  %v62_v56 = vld [vmem:[%s4195_s0 + $0x38] sm:$0xff]  ;;  %v63_v57 = vld [vmem:[%s4195_s0 + $0x40] sm:$0xff] }
  0x35   :  { %2873 = vmatprep.subr.bf16.mxu0 %v3501_v39  ;;  %v64_v58 = vld [vmem:[%s4195_s0 + $0x48] sm:$0xff]  ;;  %v65_v59 = vld [vmem:[%s4195_s0 + $0x50] sm:$0xff]  ;;  %v66_v60 = vld [vmem:[%s4195_s0 + $0x58] sm:$0xff] }
  0x36   :  { %v67_v61 = vld [vmem:[%s4195_s0 + $0x60] sm:$0xff]  ;;  %v68_v62 = vld [vmem:[%s4195_s0 + $0x68] sm:$0xff]  ;;  %v69_v63 = vld [vmem:[%s4195_s0 + $0x70] sm:$0xff] }
  0x37   :  { %2767 = vmatpush1.bf16.msra.mxu1 %v2766_v37  ;;  %v70_v1 = vld [vmem:[%s4195_s0 + $0x78] sm:$0xff]  ;;  %v87_v23 = vld [vmem:[%s4198_s3] sm:$0x3]  ;;  %s3373_s3 = smov 64  }
  0x38   :  { %2769 = vmatprep.subr.bf16.mxu1 %v3484_v24  ;;  %2875 = vmatpush1.bf16.msra.mxu0 %v3508_v45  ;;  %v3657_v29 = vrot.slane %v87_v23, %v91_v22  ;;  %v3659_v30 = vrot.slane %v87_v23, %v95_v25 }
  0x39   :  { %2877 = vmatprep.subr.bf16.mxu0 %v3511_v46 }
  0x3a   :  { %2688 = vmatmul.mubr.msk.f32.vlgmr.msra.gmra.mrb[0].mxu1 %vm99_vm0, %v55_v44  ;;  %v3663_v44 = vand.u32 127, %v89_v16 }
  0x3b   :  { %2771 = vmatpush1.bf16.msra.mxu1 %v3489_v27  ;;  %218 = vmatprep.mubr.f32.mxu1 %v3372_v0 }
  0x3c   :  { %2773 = vmatprep.subr.bf16.mxu1 %v3494_v32  ;;  %2879 = vmatpush1.bf16.msra.mxu0 %v3521_v50  ;;  %v3666_v47 = vadd.s32 128, %v3663_v44  ;;  %vm4203_vm3 = vcmp.eq.s32.totalorder %v3663_v44, 0  ;;  %vm509_vm4 = vcmp.eq.s32.totalorder %v3663_v44, 15  ;;  %vm649_vm5 = vcmp.eq.s32.totalorder %v3663_v44, 1 }
  0x3d   :  { %2881 = vmatprep.subr.bf16.mxu0 %v3484_v24  ;;  %vm652_vm6 = vcmp.eq.s32.totalorder %v3663_v44, 14  ;;  %vm792_vm7 = vcmp.eq.s32.totalorder %v3663_v44, 2  ;;  %vm795_vm8 = vcmp.eq.s32.totalorder %v3663_v44, 13  ;;  %vm935_vm9 = vcmp.eq.s32.totalorder %v3663_v44, 3 }
  0x3e   :  { %2689 = vmatmul.mubr.msk.f32.gmra.mrb[2].mxu1 %vm99_vm0, %v56_v49  ;;  %vm364_vm1 = vcmp.lt.s32.totalorder %v3666_v47, 192  ;;  %vm938_vm10 = vcmp.eq.s32.totalorder %v3663_v44, 12  ;;  %vm1078_vm11 = vcmp.eq.s32.totalorder %v3663_v44, 4  ;;  %vm1081_vm12 = vcmp.eq.s32.totalorder %v3663_v44, 11 }
  0x3f   :  { %224 = vmatprep.mubr.f32.mxu1 %v3372_v0  ;;  %2775 = vmatpush1.bf16.msra.mxu1 %v3499_v38  ;;  %vm1221_vm13 = vcmp.eq.s32.totalorder %v3663_v44, 5  ;;  %vm1224_vm14 = vcmp.eq.s32.totalorder %v3663_v44, 10  ;;  %vm1364_vm15 = vcmp.eq.s32.totalorder %v3663_v44, 6 }
  0x40   :  { %2777 = vmatprep.subr.bf16.mxu1 %v3501_v39 }
  0x42   :  { %2690 = vmatmul.mubr.msk.f32.gmra.mrb[4].mxu1 %vm99_vm0, %v57_v51 }
  0x43   :  { %230 = vmatprep.mubr.f32.mxu1 %v3372_v0  ;;  %2779 = vmatpush1.bf16.msra.mxu1 %v3508_v45 }
  0x44   :  { %2781 = vmatprep.subr.bf16.mxu1 %v3511_v46 }
  0x46   :  { %2691 = vmatmul.mubr.msk.f32.gmra.mrb[6].mxu1 %vm99_vm0, %v58_v52 }
  0x47   :  { %236 = vmatprep.mubr.f32.mxu1 %v3372_v0  ;;  %2783 = vmatpush1.bf16.msra.mxu1 %v3521_v50 }
  0x48   :  { %2785 = vmatprep.subr.bf16.mxu1 %v3484_v24 }
  0x4a   :  { %2692 = vmatmul.mubr.msk.f32.gmra.mrb[8].mxu1 %vm99_vm0, %v59_v53 }
  0x4b   :  { %242 = vmatprep.mubr.f32.mxu1 %v3372_v0 }
  0x4e   :  { %2693 = vmatmul.mubr.msk.f32.gmra.mrb[10].mxu1 %vm99_vm0, %v60_v54 }
  0x4f   :  { %248 = vmatprep.mubr.f32.mxu1 %v3372_v0 }
  0x52   :  { %2694 = vmatmul.mubr.msk.f32.gmra.mrb[12].mxu1 %vm99_vm0, %v61_v55 }
  0x53   :  { %254 = vmatprep.mubr.f32.mxu1 %v3372_v0 }
  0x56   :  { %2695 = vmatmul.mubr.msk.f32.gmra.mrb[14].mxu1 %vm99_vm0, %v62_v56 }
  0x57   :  { %260 = vmatprep.mubr.f32.mxu1 %v3372_v0 }
  0x5a   :  { %2696 = vmatmul.mubr.msk.f32.gmra.mrb[16].mxu1 %vm99_vm0, %v63_v57  ;;  %v464_v57 = vld [vmem:[#allocation6] sm:$0xff] }
  0x5b   :  { %266 = vmatprep.mubr.f32.mxu1 %v3372_v0 }
  0x5e   :  { %2697 = vmatmul.mubr.msk.f32.gmra.mrb[18].mxu1 %vm99_vm0, %v64_v58 }
  0x5f   :  { %272 = vmatprep.mubr.f32.mxu1 %v3372_v0 }
  0x62   :  { %2698 = vmatmul.mubr.msk.f32.gmra.mrb[20].mxu1 %vm99_vm0, %v65_v59 }
  0x63   :  { %278 = vmatprep.mubr.f32.mxu1 %v3372_v0 }
  0x66   :  { %2699 = vmatmul.mubr.msk.f32.gmra.mrb[22].mxu1 %vm99_vm0, %v66_v60 }
  0x67   :  { %284 = vmatprep.mubr.f32.mxu1 %v3372_v0 }
  0x6a   :  { %2700 = vmatmul.mubr.msk.f32.gmra.mrb[24].mxu1 %vm99_vm0, %v67_v61 }
  0x6b   :  { %290 = vmatprep.mubr.f32.mxu1 %v3372_v0 }
  0x6e   :  { %2701 = vmatmul.mubr.msk.f32.gmra.mrb[26].mxu1 %vm99_vm0, %v68_v62 }
  0x6f   :  { %296 = vmatprep.mubr.f32.mxu1 %v3372_v0 }
  0x72   :  { %2702 = vmatmul.mubr.msk.f32.gmra.mrb[28].mxu1 %vm99_vm0, %v69_v63 }
  0x73   :  { %302 = vmatprep.mubr.f32.mxu1 %v3372_v0 }
  0x76   :  { %2703 = vmatmul.mubr.msk.f32.gmra.mrb[30].mxu1 %vm99_vm0, %v70_v1 }
  0x77   :  { %439 = vmatprep.mubr.f32.mxu1 %v3372_v0 }
  0x7a   :  { %440 = vmatmul.mubr.f32.vlgmr.msra.gmra.mrb[0].mxu1 %v3372_v0 }
  0x7b   :  { %2787 = vmatpush1.bf16.msra.mxu1 %v3489_v27  ;;  %584 = vmatprep.mubr.f32.mxu1 %v3372_v0 }
  0x7c   :  { %2789 = vmatprep.subr.bf16.mxu1 %v3494_v32 }
  0x7f   :  { %2791 = vmatpush1.bf16.msra.mxu1 %v3499_v38 }
  0x80   :  { %2793 = vmatprep.subr.bf16.mxu1 %v3501_v39 }
  0x83   :  { %2795 = vmatpush1.bf16.msra.mxu1 %v3508_v45 }
  0x84   :  { %2797 = vmatprep.subr.bf16.mxu1 %v3511_v46 }
  0x87   :  { %2799 = vmatpush1.bf16.msra.mxu1 %v3521_v50 }
  0x88   :  { %2801 = vmatprep.subr.bf16.mxu1 %v3484_v24 }
 0x125   :  { %v3614_v2 = vpop.f32.mrb[12].mxu1 }
 0x126   :  { %v3616_v3 = vpop.f32.mrb[13].mxu1 }
 0x129   :  { %v3618_v4 = vpop.f32.mrb[14].mxu1 }
 0x12a   :  { %v3620_v5 = vpop.f32.mrb[15].mxu1 }
 0x12d   :  { %v3622_v6 = vpop.f32.mrb[16].mxu1 }
 0x12e   :  { %v3624_v7 = vpop.f32.mrb[17].mxu1 }
 0x131   :  { %v3626_v8 = vpop.f32.mrb[18].mxu1 }
 0x132   :  { %v3628_v9 = vpop.f32.mrb[19].mxu1 }
 0x135   :  { %v3630_v10 = vpop.f32.mrb[20].mxu1 }
 0x136   :  { %v3632_v11 = vpop.f32.mrb[21].mxu1 }
 0x139   :  { %v3634_v12 = vpop.f32.mrb[22].mxu1 }
 0x13a   :  { %v3636_v13 = vpop.f32.mrb[23].mxu1 }
 0x13d   :  { %v3638_v14 = vpop.f32.mrb[24].mxu1 }
 0x13e   :  { %v3640_v15 = vpop.f32.mrb[25].mxu1 }
 0x141   :  { %v3642_v17 = vpop.f32.mrb[26].mxu1 }
 0x142   :  { %v3644_v18 = vpop.f32.mrb[27].mxu1 }
 0x145   :  { %v3646_v20 = vpop.f32.mrb[28].mxu1 }
 0x146   :  { %v3648_v21 = vpop.f32.mrb[29].mxu1 }
 0x149   :  { %v3653_v26 = vpop.f32.mrb[30].mxu1 }
 0x14a   :  { %v3655_v28 = vpop.f32.mrb[31].mxu1 }
 0x14d   :  { %v441_v31 = vpop.f32.mrb[0].mxu1 }
 0x14e   :  { %v3024_v33 = vadd.f32 %v441_v31, %v3657_v29  ;;  %v443_v34 = vpop.f32.mrb[1].mxu1 }
 0x14f   :  { %v3025_v35 = vadd.f32 %v443_v34, %v3659_v30 }
 0x150   :  { %v2704_v36 = vmul.f32 -1.442695, %v3024_v33 }
 0x151   :  { %v2705_v37 = vmul.f32 -1.442695, %v3025_v35 }
 0x152   :  { %3098 = vpow2.f32 %v2704_v36 }
 0x153   :  { %3100 = vpow2.f32 %v2705_v37 }
 0x154   :  { %3102 = vtanh.f32 %v3025_v35 }
 0x15c   :  { %v3099_v40 = vpop.eup %3098 }
 0x15d   :  { %v3101_v41 = vpop.eup %3100  ;;  %v454_v42 = vadd.f32 1.0, %v3099_v40 }
 0x15e   :  { %v455_v43 = vadd.f32 1.0, %v3101_v41  ;;  %v3103_v48 = vpop.eup %3102 }
 0x160   :  { %3104 = vrcp.f32 %v455_v43 }
 0x161   :  { %3106 = vrcp.f32 %v454_v42 }
 0x16a   :  { %v3105_v49 = vpop.eup %3104 }
 0x16b   :  { %v3107_v51 = vpop.eup %3106  ;;  %v463_v52 = vsel %vm364_vm1, %v3103_v48, %v3105_v49 }
 0x16c   :  { %v466_v53 = vmul.f32 %v3107_v51, %v463_v52  ;;  %v465_v54 = vmul.f32 0.0, %v3107_v51 }
 0x16e   :  { %468 = vrot.lane.b32.xlu0 %v466_v53, %s3373_s3  ;;  %v610_v53 = vld [vmem:[#allocation6 + $0x8] sm:$0xff] }
 0x1e0   :  { %v469_v55 = vpop.permute.xlu0 %468 }
 0x1e1   :  { %v471_v56 = vadd.f32 %v469_v55, %v465_v54 }
 0x1e3   :  { %473 = vrot.lane.b32.xlu0 %v471_v56, %s3373_s3 }
 0x255   :  { %v474_v58 = vpop.permute.xlu0 %473 }
 0x256   :  { %v476_v59 = vmul.f32 %v474_v58, %v464_v57 }
 0x258   :  { %3108 = vtanh.f32 %v476_v59  ;;  %612 = vrot.lane.b32.xlu0 %v476_v59, %s3373_s3 }
 0x262   :  { %v3109_v60 = vpop.eup %3108 }
 0x263   :  { %479 = vrot.lane.b32.xlu1 %v3109_v60, %s3373_s3 }
 0x2ca   :  { %v613_v48 = vpop.permute.xlu0 %612 }
 0x2d5   :  { %v480_v61 = vpop.permute.xlu1 %479 }
 0x2d6   :  { %v482_v62 = vmul.f32 %v480_v61, %v463_v52 }
 0x2d8   :  { %484 = vrot.lane.b32.xlu1 %v482_v62, %s3373_s3 }
 0x34a   :  { %v485_v63 = vpop.permute.xlu1 %484 }
 0x34b   :  { %v3676_v1 = vmul.f32 %v485_v63, %v464_v57 }
 0x34d   :  { %2707 = vmatmul.mubr.msk.f32.vlgmr.msra.gmra.mrb[2].mxu1 %vm99_vm0, %v3676_v1 }
 0x34e   :  { %2803 = vmatpush1.bf16.msra.mxu1 %v3489_v27  ;;  %727 = vmatprep.mubr.f32.mxu1 %v3372_v0 }
 0x34f   :  { %2805 = vmatprep.subr.bf16.mxu1 %v3494_v32 }
 0x352   :  { %2807 = vmatpush1.bf16.msra.mxu1 %v3499_v38 }
 0x353   :  { %2809 = vmatprep.subr.bf16.mxu1 %v3501_v39 }
 0x356   :  { %2811 = vmatpush1.bf16.msra.mxu1 %v3508_v45 }
 0x357   :  { %2813 = vmatprep.subr.bf16.mxu1 %v3511_v46 }
 0x35a   :  { %2815 = vmatpush1.bf16.msra.mxu1 %v3521_v50 }
 0x35b   :  { %2817 = vmatprep.subr.bf16.mxu1 %v3484_v24 }
 0x420   :  { %v586_v16 = vpop.f32.mrb[2].mxu1 }
 0x421   :  { %v3026_v19 = vadd.f32 %v586_v16, %v3657_v29  ;;  %v588_v22 = vpop.f32.mrb[3].mxu1 }
 0x422   :  { %v3027_v23 = vadd.f32 %v588_v22, %v3659_v30 }
 0x423   :  { %v2708_v25 = vmul.f32 -1.442695, %v3026_v19 }
 0x424   :  { %v2709_v31 = vmul.f32 -1.442695, %v3027_v23 }
 0x425   :  { %3110 = vpow2.f32 %v2708_v25 }
 0x426   :  { %3112 = vpow2.f32 %v2709_v31 }
 0x427   :  { %3114 = vtanh.f32 %v3027_v23 }
 0x42f   :  { %v3111_v33 = vpop.eup %3110 }
 0x430   :  { %v3113_v34 = vpop.eup %3112  ;;  %v599_v35 = vadd.f32 1.0, %v3111_v33 }
 0x431   :  { %v600_v36 = vadd.f32 1.0, %v3113_v34  ;;  %v3115_v37 = vpop.eup %3114 }
 0x433   :  { %3116 = vrcp.f32 %v600_v36 }
 0x434   :  { %3118 = vrcp.f32 %v599_v35 }
 0x43d   :  { %v3117_v40 = vpop.eup %3116 }
 0x43e   :  { %v3119_v41 = vpop.eup %3118  ;;  %v608_v42 = vsel %vm364_vm1, %v3115_v37, %v3117_v40 }
 0x43f   :  { %v616_v43 = vmul.f32 %v3119_v41, %v608_v42  ;;  %v615_v49 = vmul.f32 %v3119_v41, %v613_v48 }
 0x441   :  { %618 = vrot.lane.b32.xlu1 %v616_v43, %s3373_s3 }
 0x4b3   :  { %v619_v51 = vpop.permute.xlu1 %618 }
 0x4b4   :  { %v621_v52 = vadd.f32 %v619_v51, %v615_v49  ;;  %v753_v49 = vld [vmem:[#allocation6 + $0x10] sm:$0xff] }
 0x4b6   :  { %623 = vrot.lane.b32.xlu0 %v621_v52, %s3373_s3 }
 0x528   :  { %v624_v54 = vpop.permute.xlu0 %623 }
 0x529   :  { %v626_v55 = vmul.f32 %v624_v54, %v610_v53 }
 0x52b   :  { %3120 = vtanh.f32 %v626_v55 }
 0x535   :  { %v3121_v56 = vpop.eup %3120 }
 0x536   :  { %629 = vrot.lane.b32.xlu1 %v3121_v56, %s3373_s3 }
 0x53a   :  { %755 = vrot.lane.b32.xlu1 %v626_v55, %s3373_s3 }
 0x5a8   :  { %v630_v57 = vpop.permute.xlu1 %629 }
 0x5a9   :  { %v632_v58 = vmul.f32 %v630_v57, %v608_v42 }
 0x5ab   :  { %634 = vrot.lane.b32.xlu0 %v632_v58, %s3373_s3 }
 0x5ac   :  { %v756_v41 = vpop.permute.xlu1 %755 }
 0x61d   :  { %v635_v59 = vpop.permute.xlu0 %634 }
 0x61e   :  { %v3698_v60 = vmul.f32 %v635_v59, %v610_v53 }
 0x620   :  { %2710 = vmatmul.mubr.msk.f32.vlgmr.msra.gmra.mrb[4].mxu1 %vm99_vm0, %v3698_v60 }
 0x621   :  { %2819 = vmatpush1.bf16.msra.mxu1 %v3489_v27  ;;  %870 = vmatprep.mubr.f32.mxu1 %v3372_v0 }
 0x622   :  { %2821 = vmatprep.subr.bf16.mxu1 %v3494_v32 }
 0x625   :  { %2823 = vmatpush1.bf16.msra.mxu1 %v3499_v38 }
 0x626   :  { %2825 = vmatprep.subr.bf16.mxu1 %v3501_v39 }
 0x629   :  { %2827 = vmatpush1.bf16.msra.mxu1 %v3508_v45 }
 0x62a   :  { %2829 = vmatprep.subr.bf16.mxu1 %v3511_v46 }
 0x62d   :  { %2831 = vmatpush1.bf16.msra.mxu1 %v3521_v50 }
 0x62e   :  { %2833 = vmatprep.subr.bf16.mxu1 %v3484_v24 }
 0x6f3   :  { %v729_v61 = vpop.f32.mrb[4].mxu1 }
 0x6f4   :  { %v3028_v62 = vadd.f32 %v729_v61, %v3657_v29  ;;  %v731_v63 = vpop.f32.mrb[5].mxu1 }
 0x6f5   :  { %v3029_v16 = vadd.f32 %v731_v63, %v3659_v30 }
 0x6f6   :  { %v2711_v19 = vmul.f32 -1.442695, %v3028_v62 }
 0x6f7   :  { %v2712_v22 = vmul.f32 -1.442695, %v3029_v16 }
 0x6f8   :  { %3122 = vpow2.f32 %v2711_v19 }
 0x6f9   :  { %3124 = vpow2.f32 %v2712_v22 }
 0x6fa   :  { %3126 = vtanh.f32 %v3029_v16 }
 0x702   :  { %v3123_v23 = vpop.eup %3122 }
 0x703   :  { %v3125_v25 = vpop.eup %3124  ;;  %v742_v31 = vadd.f32 1.0, %v3123_v23 }
 0x704   :  { %v743_v33 = vadd.f32 1.0, %v3125_v25  ;;  %v3127_v34 = vpop.eup %3126 }
 0x706   :  { %3128 = vrcp.f32 %v743_v33 }
 0x707   :  { %3130 = vrcp.f32 %v742_v31 }
 0x710   :  { %v3129_v35 = vpop.eup %3128 }
 0x711   :  { %v3131_v36 = vpop.eup %3130  ;;  %v751_v37 = vsel %vm364_vm1, %v3127_v34, %v3129_v35 }
 0x712   :  { %v759_v40 = vmul.f32 %v3131_v36, %v751_v37  ;;  %v758_v42 = vmul.f32 %v3131_v36, %v756_v41 }
 0x714   :  { %761 = vrot.lane.b32.xlu0 %v759_v40, %s3373_s3 }
 0x786   :  { %v762_v43 = vpop.permute.xlu0 %761 }
 0x787   :  { %v764_v48 = vadd.f32 %v762_v43, %v758_v42  ;;  %v896_v43 = vld [vmem:[#allocation6 + $0x18] sm:$0xff] }
 0x789   :  { %766 = vrot.lane.b32.xlu1 %v764_v48, %s3373_s3 }
 0x7fb   :  { %v767_v51 = vpop.permute.xlu1 %766 }
 0x7fc   :  { %v769_v52 = vmul.f32 %v767_v51, %v753_v49 }
 0x7fe   :  { %3132 = vtanh.f32 %v769_v52 }
 0x808   :  { %v3133_v53 = vpop.eup %3132 }
 0x809   :  { %772 = vrot.lane.b32.xlu0 %v3133_v53, %s3373_s3 }
 0x80d   :  { %898 = vrot.lane.b32.xlu0 %v769_v52, %s3373_s3 }
 0x87b   :  { %v773_v54 = vpop.permute.xlu0 %772 }
 0x87c   :  { %v775_v55 = vmul.f32 %v773_v54, %v751_v37 }
 0x87e   :  { %777 = vrot.lane.b32.xlu1 %v775_v55, %s3373_s3 }
 0x87f   :  { %v899_v37 = vpop.permute.xlu0 %898 }
 0x8f0   :  { %v778_v56 = vpop.permute.xlu1 %777 }
 0x8f1   :  { %v3720_v57 = vmul.f32 %v778_v56, %v753_v49 }
 0x8f3   :  { %2713 = vmatmul.mubr.msk.f32.vlgmr.msra.gmra.mrb[6].mxu1 %vm99_vm0, %v3720_v57 }
 0x8f4   :  { %2835 = vmatpush1.bf16.msra.mxu1 %v3489_v27  ;;  %1013 = vmatprep.mubr.f32.mxu1 %v3372_v0 }
 0x8f5   :  { %2837 = vmatprep.subr.bf16.mxu1 %v3494_v32 }
 0x8f8   :  { %2839 = vmatpush1.bf16.msra.mxu1 %v3499_v38 }
 0x8f9   :  { %2841 = vmatprep.subr.bf16.mxu1 %v3501_v39 }
 0x8fc   :  { %2843 = vmatpush1.bf16.msra.mxu1 %v3508_v45 }
 0x8fd   :  { %2845 = vmatprep.subr.bf16.mxu1 %v3511_v46 }
 0x900   :  { %2847 = vmatpush1.bf16.msra.mxu1 %v3521_v50 }
 0x901   :  { %2849 = vmatprep.subr.bf16.mxu1 %v3484_v24 }
 0x9c6   :  { %v872_v58 = vpop.f32.mrb[6].mxu1 }
 0x9c7   :  { %v3030_v59 = vadd.f32 %v872_v58, %v3657_v29  ;;  %v874_v61 = vpop.f32.mrb[7].mxu1 }
 0x9c8   :  { %v3031_v62 = vadd.f32 %v874_v61, %v3659_v30 }
 0x9c9   :  { %v2714_v63 = vmul.f32 -1.442695, %v3030_v59 }
 0x9ca   :  { %v2715_v16 = vmul.f32 -1.442695, %v3031_v62 }
 0x9cb   :  { %3134 = vpow2.f32 %v2714_v63 }
 0x9cc   :  { %3136 = vpow2.f32 %v2715_v16 }
 0x9cd   :  { %3138 = vtanh.f32 %v3031_v62 }
 0x9d5   :  { %v3135_v19 = vpop.eup %3134 }
 0x9d6   :  { %v3137_v22 = vpop.eup %3136  ;;  %v885_v23 = vadd.f32 1.0, %v3135_v19 }
 0x9d7   :  { %v886_v25 = vadd.f32 1.0, %v3137_v22  ;;  %v3139_v31 = vpop.eup %3138 }
 0x9d9   :  { %3140 = vrcp.f32 %v886_v25 }
 0x9da   :  { %3142 = vrcp.f32 %v885_v23 }
 0x9e3   :  { %v3141_v33 = vpop.eup %3140 }
 0x9e4   :  { %v3143_v34 = vpop.eup %3142  ;;  %v894_v35 = vsel %vm364_vm1, %v3139_v31, %v3141_v33 }
 0x9e5   :  { %v902_v36 = vmul.f32 %v3143_v34, %v894_v35  ;;  %v901_v40 = vmul.f32 %v3143_v34, %v899_v37 }
 0x9e7   :  { %904 = vrot.lane.b32.xlu1 %v902_v36, %s3373_s3 }
 0xa59   :  { %v905_v41 = vpop.permute.xlu1 %904 }
 0xa5a   :  { %v907_v42 = vadd.f32 %v905_v41, %v901_v40 }
 0xa5c   :  { %909 = vrot.lane.b32.xlu0 %v907_v42, %s3373_s3  ;;  %v1039_v42 = vld [vmem:[#allocation6 + $0x20] sm:$0xff] }
 0xace   :  { %v910_v48 = vpop.permute.xlu0 %909 }
 0xacf   :  { %v912_v49 = vmul.f32 %v910_v48, %v896_v43 }
 0xad1   :  { %3144 = vtanh.f32 %v912_v49 }
 0xadb   :  { %v3145_v51 = vpop.eup %3144 }
 0xadc   :  { %915 = vrot.lane.b32.xlu1 %v3145_v51, %s3373_s3 }
 0xae0   :  { %1041 = vrot.lane.b32.xlu1 %v912_v49, %s3373_s3 }
 0xb4e   :  { %v916_v52 = vpop.permute.xlu1 %915 }
 0xb4f   :  { %v918_v53 = vmul.f32 %v916_v52, %v894_v35 }
 0xb51   :  { %920 = vrot.lane.b32.xlu0 %v918_v53, %s3373_s3 }
 0xb52   :  { %v1042_v36 = vpop.permute.xlu1 %1041 }
 0xbc3   :  { %v921_v54 = vpop.permute.xlu0 %920 }
 0xbc4   :  { %v3742_v55 = vmul.f32 %v921_v54, %v896_v43 }
 0xbc6   :  { %2716 = vmatmul.mubr.msk.f32.vlgmr.msra.gmra.mrb[8].mxu1 %vm99_vm0, %v3742_v55 }
 0xbc7   :  { %2851 = vmatpush1.bf16.msra.mxu1 %v3489_v27  ;;  %1156 = vmatprep.mubr.f32.mxu1 %v3372_v0 }
 0xbc8   :  { %2853 = vmatprep.subr.bf16.mxu1 %v3494_v32 }
 0xbcb   :  { %2855 = vmatpush1.bf16.msra.mxu1 %v3499_v38 }
 0xbcc   :  { %2857 = vmatprep.subr.bf16.mxu1 %v3501_v39 }
 0xbcf   :  { %2859 = vmatpush1.bf16.msra.mxu1 %v3508_v45 }
 0xbd0   :  { %2861 = vmatprep.subr.bf16.mxu1 %v3511_v46 }
 0xbd3   :  { %2863 = vmatpush1.bf16.msra.mxu1 %v3521_v50 }
 0xc99   :  { %v1015_v56 = vpop.f32.mrb[8].mxu1 }
 0xc9a   :  { %v3032_v58 = vadd.f32 %v1015_v56, %v3657_v29  ;;  %v1017_v59 = vpop.f32.mrb[9].mxu1 }
 0xc9b   :  { %v3033_v61 = vadd.f32 %v1017_v59, %v3659_v30 }
 0xc9c   :  { %v2717_v62 = vmul.f32 -1.442695, %v3032_v58 }
 0xc9d   :  { %v2718_v63 = vmul.f32 -1.442695, %v3033_v61 }
 0xc9e   :  { %3146 = vpow2.f32 %v2717_v62 }
 0xc9f   :  { %3148 = vpow2.f32 %v2718_v63 }
 0xca0   :  { %3150 = vtanh.f32 %v3033_v61 }
 0xca8   :  { %v3147_v16 = vpop.eup %3146 }
 0xca9   :  { %v3149_v19 = vpop.eup %3148  ;;  %v1028_v22 = vadd.f32 1.0, %v3147_v16 }
 0xcaa   :  { %v1029_v23 = vadd.f32 1.0, %v3149_v19  ;;  %v3151_v25 = vpop.eup %3150 }
 0xcac   :  { %3152 = vrcp.f32 %v1029_v23 }
 0xcad   :  { %3154 = vrcp.f32 %v1028_v22 }
 0xcb6   :  { %v3153_v31 = vpop.eup %3152 }
 0xcb7   :  { %v3155_v33 = vpop.eup %3154  ;;  %v1037_v34 = vsel %vm364_vm1, %v3151_v25, %v3153_v31 }
 0xcb8   :  { %v1045_v35 = vmul.f32 %v3155_v33, %v1037_v34  ;;  %v1044_v37 = vmul.f32 %v3155_v33, %v1042_v36 }
 0xcba   :  { %1047 = vrot.lane.b32.xlu0 %v1045_v35, %s3373_s3 }
 0xd2c   :  { %v1048_v40 = vpop.permute.xlu0 %1047 }
 0xd2d   :  { %v1050_v41 = vadd.f32 %v1048_v40, %v1044_v37 }
 0xd2f   :  { %1052 = vrot.lane.b32.xlu1 %v1050_v41, %s3373_s3 }
 0xda1   :  { %v1053_v43 = vpop.permute.xlu1 %1052 }
 0xda2   :  { %v1055_v48 = vmul.f32 %v1053_v43, %v1039_v42 }
 0xda4   :  { %3156 = vtanh.f32 %v1055_v48 }
 0xdae   :  { %v3157_v49 = vpop.eup %3156 }
 0xdaf   :  { %1058 = vrot.lane.b32.xlu0 %v3157_v49, %s3373_s3 }
 0xdb3   :  { %1184 = vrot.lane.b32.xlu0 %v1055_v48, %s3373_s3 }
 0xe21   :  { %v1059_v51 = vpop.permute.xlu0 %1058 }
 0xe22   :  { %v1061_v52 = vmul.f32 %v1059_v51, %v1037_v34 }
 0xe24   :  { %1063 = vrot.lane.b32.xlu1 %v1061_v52, %s3373_s3 }
 0xe25   :  { %v1185_v36 = vpop.permute.xlu0 %1184 }
 0xe96   :  { %v1064_v53 = vpop.permute.xlu1 %1063 }
 0xe97   :  { %v3763_v54 = vmul.f32 %v1064_v53, %v1039_v42  ;;  %v1182_v42 = vld [vmem:[#allocation6 + $0x28] sm:$0xff] }
 0xe99   :  { %2719 = vmatmul.mubr.msk.f32.vlgmr.msra.gmra.mrb[10].mxu1 %vm99_vm0, %v3763_v54 }
 0xf6c   :  { %v1158_v56 = vpop.f32.mrb[10].mxu1 }
 0xf6d   :  { %v3034_v58 = vadd.f32 %v1158_v56, %v3657_v29  ;;  %v1160_v59 = vpop.f32.mrb[11].mxu1 }
 0xf6e   :  { %v3035_v61 = vadd.f32 %v1160_v59, %v3659_v30  ;;  %v253_v59 = vadd.f32 %v3616_v3, %v3659_v30 }
 0xf6f   :  { %v2720_v62 = vmul.f32 -1.442695, %v3034_v58  ;;  %v251_v58 = vadd.f32 %v3614_v2, %v3657_v29 }
 0xf70   :  { %v2721_v63 = vmul.f32 -1.442695, %v3035_v61 }
 0xf71   :  { %3158 = vpow2.f32 %v2720_v62 }
 0xf72   :  { %3160 = vpow2.f32 %v2721_v63 }
 0xf73   :  { %3162 = vtanh.f32 %v3035_v61 }
 0xf7b   :  { %v3159_v16 = vpop.eup %3158 }
 0xf7c   :  { %v3161_v19 = vpop.eup %3160  ;;  %v1171_v22 = vadd.f32 1.0, %v3159_v16 }
 0xf7d   :  { %v1172_v23 = vadd.f32 1.0, %v3161_v19  ;;  %v3163_v25 = vpop.eup %3162 }
 0xf7f   :  { %3164 = vrcp.f32 %v1172_v23 }
 0xf80   :  { %3166 = vrcp.f32 %v1171_v22 }
 0xf89   :  { %v3165_v31 = vpop.eup %3164 }
 0xf8a   :  { %v3167_v33 = vpop.eup %3166  ;;  %v1180_v34 = vsel %vm364_vm1, %v3163_v25, %v3165_v31 }
 0xf8b   :  { %v1188_v35 = vmul.f32 %v3167_v33, %v1180_v34  ;;  %v1187_v37 = vmul.f32 %v3167_v33, %v1185_v36 }
 0xf8d   :  { %1190 = vrot.lane.b32.xlu1 %v1188_v35, %s3373_s3 }
 0xfff   :  { %v1191_v40 = vpop.permute.xlu1 %1190 }
0x1000   :  { %v1193_v41 = vadd.f32 %v1191_v40, %v1187_v37 }
0x1002   :  { %1195 = vrot.lane.b32.xlu0 %v1193_v41, %s3373_s3 }
0x1074   :  { %v1196_v43 = vpop.permute.xlu0 %1195 }
0x1075   :  { %v1198_v48 = vmul.f32 %v1196_v43, %v1182_v42  ;;  %v1325_v43 = vld [vmem:[#allocation6 + $0x30] sm:$0xff] }
0x1077   :  { %3168 = vtanh.f32 %v1198_v48 }
0x1081   :  { %v3169_v49 = vpop.eup %3168 }
0x1082   :  { %1201 = vrot.lane.b32.xlu1 %v3169_v49, %s3373_s3 }
0x1086   :  { %1327 = vrot.lane.b32.xlu1 %v1198_v48, %s3373_s3 }
0x10f4   :  { %v1202_v51 = vpop.permute.xlu1 %1201 }
0x10f5   :  { %v1204_v52 = vmul.f32 %v1202_v51, %v1180_v34 }
0x10f7   :  { %1206 = vrot.lane.b32.xlu0 %v1204_v52, %s3373_s3 }
0x10f8   :  { %v1328_v37 = vpop.permute.xlu1 %1327 }
0x1169   :  { %v1207_v53 = vpop.permute.xlu0 %1206 }
0x116a   :  { %v3776_v56 = vmul.f32 %v1207_v53, %v1182_v42 }
0x116c   :  { %2722 = vmatmul.mubr.msk.f32.vlgmr.msra.gmra.mrb[0].mxu0 %vm99_vm0, %v3776_v56 }
0x116d   :  { %2883 = vmatpush1.bf16.msra.mxu0 %v3489_v27  ;;  %1442 = vmatprep.mubr.f32.mxu0 %v3372_v0 }
0x116e   :  { %2885 = vmatprep.subr.bf16.mxu0 %v3494_v32 }
0x1171   :  { %2887 = vmatpush1.bf16.msra.mxu0 %v3499_v38 }
0x1172   :  { %2889 = vmatprep.subr.bf16.mxu0 %v3501_v39 }
0x1175   :  { %2891 = vmatpush1.bf16.msra.mxu0 %v3508_v45 }
0x1176   :  { %2893 = vmatprep.subr.bf16.mxu0 %v3511_v46 }
0x1179   :  { %2895 = vmatpush1.bf16.msra.mxu0 %v3521_v50 }
0x117a   :  { %2897 = vmatprep.subr.bf16.mxu0 %v3484_v24 }
0x123f   :  { %v1301_v61 = vpop.f32.mrb[0].mxu0 }
0x1240   :  { %v1306_v62 = vadd.f32 %v1301_v61, %v251_v58  ;;  %v1303_v63 = vpop.f32.mrb[1].mxu0  ;;  %v257_v61 = vadd.f32 %v3618_v4, %v3657_v29 }
0x1241   :  { %v1307_v16 = vadd.f32 %v1303_v63, %v253_v59 }
0x1242   :  { %v2723_v19 = vmul.f32 -1.442695, %v1306_v62  ;;  %v259_v62 = vadd.f32 %v3620_v5, %v3659_v30 }
0x1243   :  { %v2724_v22 = vmul.f32 -1.442695, %v1307_v16 }
0x1244   :  { %3170 = vpow2.f32 %v2723_v19 }
0x1245   :  { %3172 = vpow2.f32 %v2724_v22 }
0x1246   :  { %3174 = vtanh.f32 %v1307_v16 }
0x124e   :  { %v3171_v23 = vpop.eup %3170 }
0x124f   :  { %v3173_v25 = vpop.eup %3172  ;;  %v1314_v31 = vadd.f32 1.0, %v3171_v23 }
0x1250   :  { %v1315_v33 = vadd.f32 1.0, %v3173_v25  ;;  %v3175_v34 = vpop.eup %3174 }
0x1252   :  { %3176 = vrcp.f32 %v1315_v33 }
0x1253   :  { %3178 = vrcp.f32 %v1314_v31 }
0x125c   :  { %v3177_v2 = vpop.eup %3176 }
0x125d   :  { %v3179_v35 = vpop.eup %3178  ;;  %v1323_v3 = vsel %vm364_vm1, %v3175_v34, %v3177_v2 }
0x125e   :  { %v1331_v36 = vmul.f32 %v3179_v35, %v1323_v3  ;;  %v1330_v40 = vmul.f32 %v3179_v35, %v1328_v37 }
0x1260   :  { %1333 = vrot.lane.b32.xlu0 %v1331_v36, %s3373_s3 }
0x12d2   :  { %v1334_v41 = vpop.permute.xlu0 %1333 }
0x12d3   :  { %v1336_v42 = vadd.f32 %v1334_v41, %v1330_v40 }
0x12d5   :  { %1338 = vrot.lane.b32.xlu1 %v1336_v42, %s3373_s3 }
0x1347   :  { %v1339_v48 = vpop.permute.xlu1 %1338 }
0x1348   :  { %v1341_v49 = vmul.f32 %v1339_v48, %v1325_v43 }
0x134a   :  { %3180 = vtanh.f32 %v1341_v49 }
0x1354   :  { %v3181_v51 = vpop.eup %3180 }
0x1355   :  { %1344 = vrot.lane.b32.xlu0 %v3181_v51, %s3373_s3 }
0x1359   :  { %1470 = vrot.lane.b32.xlu0 %v1341_v49, %s3373_s3 }
0x13c7   :  { %v1345_v52 = vpop.permute.xlu0 %1344 }
0x13c8   :  { %v1347_v53 = vmul.f32 %v1345_v52, %v1323_v3 }
0x13ca   :  { %1349 = vrot.lane.b32.xlu1 %v1347_v53, %s3373_s3 }
0x13cb   :  { %v1471_v37 = vpop.permute.xlu0 %1470 }
0x143c   :  { %v1350_v58 = vpop.permute.xlu1 %1349 }
0x143d   :  { %v3800_v59 = vmul.f32 %v1350_v58, %v1325_v43  ;;  %v1468_v43 = vld [vmem:[#allocation6 + $0x38] sm:$0xff] }
0x143f   :  { %2725 = vmatmul.mubr.msk.f32.vlgmr.msra.gmra.mrb[2].mxu0 %vm99_vm0, %v3800_v59 }
0x1440   :  { %2899 = vmatpush1.bf16.msra.mxu0 %v3489_v27  ;;  %1585 = vmatprep.mubr.f32.mxu0 %v3372_v0 }
0x1441   :  { %2901 = vmatprep.subr.bf16.mxu0 %v3494_v32 }
0x1444   :  { %2903 = vmatpush1.bf16.msra.mxu0 %v3499_v38 }
0x1445   :  { %2905 = vmatprep.subr.bf16.mxu0 %v3501_v39 }
0x1448   :  { %2907 = vmatpush1.bf16.msra.mxu0 %v3508_v45 }
0x1449   :  { %2909 = vmatprep.subr.bf16.mxu0 %v3511_v46 }
0x144c   :  { %2911 = vmatpush1.bf16.msra.mxu0 %v3521_v50 }
0x144d   :  { %2913 = vmatprep.subr.bf16.mxu0 %v3484_v24 }
0x1512   :  { %v1444_v63 = vpop.f32.mrb[2].mxu0 }
0x1513   :  { %v1449_v16 = vadd.f32 %v1444_v63, %v257_v61  ;;  %v1446_v19 = vpop.f32.mrb[3].mxu0  ;;  %v265_v63 = vadd.f32 %v3624_v7, %v3659_v30 }
0x1514   :  { %v1450_v22 = vadd.f32 %v1446_v19, %v259_v62  ;;  %v263_v62 = vadd.f32 %v3622_v6, %v3657_v29 }
0x1515   :  { %v2726_v23 = vmul.f32 -1.442695, %v1449_v16 }
0x1516   :  { %v2727_v25 = vmul.f32 -1.442695, %v1450_v22 }
0x1517   :  { %3182 = vpow2.f32 %v2726_v23 }
0x1518   :  { %3184 = vpow2.f32 %v2727_v25 }
0x1519   :  { %3186 = vtanh.f32 %v1450_v22 }
0x1521   :  { %v3183_v31 = vpop.eup %3182 }
0x1522   :  { %v3185_v33 = vpop.eup %3184  ;;  %v1457_v34 = vadd.f32 1.0, %v3183_v31 }
0x1523   :  { %v1458_v2 = vadd.f32 1.0, %v3185_v33  ;;  %v3187_v35 = vpop.eup %3186 }
0x1525   :  { %3188 = vrcp.f32 %v1458_v2 }
0x1526   :  { %3190 = vrcp.f32 %v1457_v34 }
0x152f   :  { %v3189_v4 = vpop.eup %3188 }
0x1530   :  { %v3191_v3 = vpop.eup %3190  ;;  %v1466_v5 = vsel %vm364_vm1, %v3187_v35, %v3189_v4 }
0x1531   :  { %v1474_v36 = vmul.f32 %v3191_v3, %v1466_v5  ;;  %v1473_v40 = vmul.f32 %v3191_v3, %v1471_v37 }
0x1533   :  { %1476 = vrot.lane.b32.xlu1 %v1474_v36, %s3373_s3 }
0x15a5   :  { %v1477_v41 = vpop.permute.xlu1 %1476 }
0x15a6   :  { %v1479_v42 = vadd.f32 %v1477_v41, %v1473_v40 }
0x15a8   :  { %1481 = vrot.lane.b32.xlu0 %v1479_v42, %s3373_s3  ;;  %v1611_v42 = vld [vmem:[#allocation6 + $0x40] sm:$0xff] }
0x161a   :  { %v1482_v48 = vpop.permute.xlu0 %1481 }
0x161b   :  { %v1484_v49 = vmul.f32 %v1482_v48, %v1468_v43 }
0x161d   :  { %3192 = vtanh.f32 %v1484_v49 }
0x1627   :  { %v3193_v51 = vpop.eup %3192 }
0x1628   :  { %1487 = vrot.lane.b32.xlu1 %v3193_v51, %s3373_s3 }
0x162c   :  { %1613 = vrot.lane.b32.xlu1 %v1484_v49, %s3373_s3 }
0x169a   :  { %v1488_v52 = vpop.permute.xlu1 %1487 }
0x169b   :  { %v1490_v53 = vmul.f32 %v1488_v52, %v1466_v5 }
0x169d   :  { %1492 = vrot.lane.b32.xlu0 %v1490_v53, %s3373_s3 }
0x169e   :  { %v1614_v36 = vpop.permute.xlu1 %1613 }
0x170f   :  { %v1493_v58 = vpop.permute.xlu0 %1492 }
0x1710   :  { %v3824_v61 = vmul.f32 %v1493_v58, %v1468_v43 }
0x1712   :  { %2728 = vmatmul.mubr.msk.f32.vlgmr.msra.gmra.mrb[4].mxu0 %vm99_vm0, %v3824_v61 }
0x1713   :  { %2915 = vmatpush1.bf16.msra.mxu0 %v3489_v27  ;;  %1726 = vmatprep.mubr.f32.mxu0 %v3372_v0 }
0x1714   :  { %2917 = vmatprep.subr.bf16.mxu0 %v3494_v32 }
0x1717   :  { %2919 = vmatpush1.bf16.msra.mxu0 %v3499_v38 }
0x1718   :  { %2921 = vmatprep.subr.bf16.mxu0 %v3501_v39 }
0x171b   :  { %2923 = vmatpush1.bf16.msra.mxu0 %v3508_v45 }
0x171c   :  { %2925 = vmatprep.subr.bf16.mxu0 %v3511_v46 }
0x171f   :  { %2927 = vmatpush1.bf16.msra.mxu0 %v3521_v50 }
0x1720   :  { %2929 = vmatprep.subr.bf16.mxu0 %v3484_v24 }
0x17e5   :  { %v1587_v16 = vpop.f32.mrb[4].mxu0 }
0x17e6   :  { %v1592_v19 = vadd.f32 %v1587_v16, %v263_v62  ;;  %v1589_v22 = vpop.f32.mrb[5].mxu0  ;;  %v269_v62 = vadd.f32 %v3626_v8, %v3657_v29 }
0x17e7   :  { %v1593_v23 = vadd.f32 %v1589_v22, %v265_v63  ;;  %v271_v63 = vadd.f32 %v3628_v9, %v3659_v30 }
0x17e8   :  { %v2729_v25 = vmul.f32 -1.442695, %v1592_v19 }
0x17e9   :  { %v2730_v31 = vmul.f32 -1.442695, %v1593_v23 }
0x17ea   :  { %3194 = vpow2.f32 %v2729_v25 }
0x17eb   :  { %3196 = vpow2.f32 %v2730_v31 }
0x17ec   :  { %3198 = vtanh.f32 %v1593_v23 }
0x17f4   :  { %v3195_v33 = vpop.eup %3194 }
0x17f5   :  { %v3197_v34 = vpop.eup %3196  ;;  %v1600_v2 = vadd.f32 1.0, %v3195_v33 }
0x17f6   :  { %v1601_v35 = vadd.f32 1.0, %v3197_v34  ;;  %v3199_v4 = vpop.eup %3198 }
0x17f8   :  { %3200 = vrcp.f32 %v1601_v35 }
0x17f9   :  { %3202 = vrcp.f32 %v1600_v2 }
0x1802   :  { %v3201_v6 = vpop.eup %3200 }
0x1803   :  { %v3203_v3 = vpop.eup %3202  ;;  %v1609_v7 = vsel %vm364_vm1, %v3199_v4, %v3201_v6 }
0x1804   :  { %v1617_v5 = vmul.f32 %v3203_v3, %v1609_v7  ;;  %v1616_v37 = vmul.f32 %v3203_v3, %v1614_v36 }
0x1806   :  { %1619 = vrot.lane.b32.xlu0 %v1617_v5, %s3373_s3 }
0x1878   :  { %v1620_v40 = vpop.permute.xlu0 %1619 }
0x1879   :  { %v1622_v41 = vadd.f32 %v1620_v40, %v1616_v37  ;;  %v1752_v40 = vld [vmem:[#allocation6 + $0x48] sm:$0xff] }
0x187b   :  { %1624 = vrot.lane.b32.xlu1 %v1622_v41, %s3373_s3 }
0x18ed   :  { %v1625_v43 = vpop.permute.xlu1 %1624 }
0x18ee   :  { %v1627_v48 = vmul.f32 %v1625_v43, %v1611_v42 }
0x18f0   :  { %3204 = vtanh.f32 %v1627_v48 }
0x18fa   :  { %v3205_v49 = vpop.eup %3204 }
0x18fb   :  { %1630 = vrot.lane.b32.xlu0 %v3205_v49, %s3373_s3 }
0x18ff   :  { %1754 = vrot.lane.b32.xlu0 %v1627_v48, %s3373_s3 }
0x196d   :  { %v1631_v51 = vpop.permute.xlu0 %1630 }
0x196e   :  { %v1633_v52 = vmul.f32 %v1631_v51, %v1609_v7 }
0x1970   :  { %1635 = vrot.lane.b32.xlu1 %v1633_v52, %s3373_s3 }
0x1971   :  { %v1755_v7 = vpop.permute.xlu0 %1754 }
0x19e2   :  { %v1636_v53 = vpop.permute.xlu1 %1635 }
0x19e3   :  { %v3848_v58 = vmul.f32 %v1636_v53, %v1611_v42  ;;  %v275_v53 = vadd.f32 %v3630_v10, %v3657_v29 }
0x19e5   :  { %2731 = vmatmul.mubr.msk.f32.vlgmr.msra.gmra.mrb[6].mxu0 %vm99_vm0, %v3848_v58 }
0x19e6   :  { %2931 = vmatpush1.bf16.msra.mxu0 %v3489_v27  ;;  %1867 = vmatprep.mubr.f32.mxu0 %v3372_v0 }
0x19e7   :  { %2933 = vmatprep.subr.bf16.mxu0 %v3494_v32 }
0x19ea   :  { %2935 = vmatpush1.bf16.msra.mxu0 %v3499_v38 }
0x19eb   :  { %2937 = vmatprep.subr.bf16.mxu0 %v3501_v39 }
0x19ee   :  { %2939 = vmatpush1.bf16.msra.mxu0 %v3508_v45 }
0x19ef   :  { %2941 = vmatprep.subr.bf16.mxu0 %v3511_v46 }
0x19f2   :  { %2943 = vmatpush1.bf16.msra.mxu0 %v3521_v50 }
0x19f3   :  { %2945 = vmatprep.subr.bf16.mxu0 %v3484_v24 }
0x1ab8   :  { %v1728_v16 = vpop.f32.mrb[6].mxu0 }
0x1ab9   :  { %v1733_v19 = vadd.f32 %v1728_v16, %v269_v62  ;;  %v1730_v22 = vpop.f32.mrb[7].mxu0  ;;  %v277_v62 = vadd.f32 %v3632_v11, %v3659_v30 }
0x1aba   :  { %v1734_v23 = vadd.f32 %v1730_v22, %v271_v63 }
0x1abb   :  { %v2732_v25 = vmul.f32 -1.442695, %v1733_v19 }
0x1abc   :  { %v2733_v31 = vmul.f32 -1.442695, %v1734_v23 }
0x1abd   :  { %3206 = vpow2.f32 %v2732_v25 }
0x1abe   :  { %3208 = vpow2.f32 %v2733_v31 }
0x1abf   :  { %3210 = vtanh.f32 %v1734_v23 }
0x1ac7   :  { %v3207_v33 = vpop.eup %3206 }
0x1ac8   :  { %v3209_v34 = vpop.eup %3208  ;;  %v1741_v2 = vadd.f32 1.0, %v3207_v33 }
0x1ac9   :  { %v1742_v35 = vadd.f32 1.0, %v3209_v34  ;;  %v3211_v4 = vpop.eup %3210 }
0x1acb   :  { %3212 = vrcp.f32 %v1742_v35 }
0x1acc   :  { %3214 = vrcp.f32 %v1741_v2 }
0x1ad5   :  { %v3213_v8 = vpop.eup %3212 }
0x1ad6   :  { %v3215_v6 = vpop.eup %3214  ;;  %v1750_v9 = vsel %vm364_vm1, %v3211_v4, %v3213_v8 }
0x1ad7   :  { %v1758_v3 = vmul.f32 %v3215_v6, %v1750_v9  ;;  %v1757_v5 = vmul.f32 %v3215_v6, %v1755_v7 }
0x1ad9   :  { %1760 = vrot.lane.b32.xlu1 %v1758_v3, %s3373_s3 }
0x1b4b   :  { %v1761_v36 = vpop.permute.xlu1 %1760 }
0x1b4c   :  { %v1763_v37 = vadd.f32 %v1761_v36, %v1757_v5  ;;  %v1893_v5 = vld [vmem:[#allocation6 + $0x50] sm:$0xff] }
0x1b4e   :  { %1765 = vrot.lane.b32.xlu0 %v1763_v37, %s3373_s3 }
0x1bc0   :  { %v1766_v41 = vpop.permute.xlu0 %1765 }
0x1bc1   :  { %v1768_v42 = vmul.f32 %v1766_v41, %v1752_v40 }
0x1bc3   :  { %3216 = vtanh.f32 %v1768_v42 }
0x1bcd   :  { %v3217_v43 = vpop.eup %3216 }
0x1bce   :  { %1771 = vrot.lane.b32.xlu1 %v3217_v43, %s3373_s3 }
0x1bd2   :  { %1895 = vrot.lane.b32.xlu1 %v1768_v42, %s3373_s3 }
0x1c40   :  { %v1772_v48 = vpop.permute.xlu1 %1771 }
0x1c41   :  { %v1774_v49 = vmul.f32 %v1772_v48, %v1750_v9 }
0x1c43   :  { %1776 = vrot.lane.b32.xlu0 %v1774_v49, %s3373_s3  ;;  %v281_v49 = vadd.f32 %v3634_v12, %v3657_v29 }
0x1c44   :  { %v1896_v6 = vpop.permute.xlu1 %1895 }
0x1cb5   :  { %v1777_v51 = vpop.permute.xlu0 %1776 }
0x1cb6   :  { %v3872_v52 = vmul.f32 %v1777_v51, %v1752_v40  ;;  %v283_v51 = vadd.f32 %v3636_v13, %v3659_v30 }
0x1cb8   :  { %2734 = vmatmul.mubr.msk.f32.vlgmr.msra.gmra.mrb[8].mxu0 %vm99_vm0, %v3872_v52 }
0x1cb9   :  { %2947 = vmatpush1.bf16.msra.mxu0 %v3489_v27  ;;  %2008 = vmatprep.mubr.f32.mxu0 %v3372_v0 }
0x1cba   :  { %2949 = vmatprep.subr.bf16.mxu0 %v3494_v32 }
0x1cbd   :  { %2951 = vmatpush1.bf16.msra.mxu0 %v3499_v38 }
0x1cbe   :  { %2953 = vmatprep.subr.bf16.mxu0 %v3501_v39 }
0x1cc1   :  { %2955 = vmatpush1.bf16.msra.mxu0 %v3508_v45 }
0x1cc2   :  { %2957 = vmatprep.subr.bf16.mxu0 %v3511_v46 }
0x1cc5   :  { %2959 = vmatpush1.bf16.msra.mxu0 %v3521_v50 }
0x1cc6   :  { %2961 = vmatprep.subr.bf16.mxu0 %v3484_v24 }
0x1d8b   :  { %v1869_v63 = vpop.f32.mrb[8].mxu0 }
0x1d8c   :  { %v1874_v16 = vadd.f32 %v1869_v63, %v275_v53  ;;  %v1871_v19 = vpop.f32.mrb[9].mxu0 }
0x1d8d   :  { %v1875_v22 = vadd.f32 %v1871_v19, %v277_v62 }
0x1d8e   :  { %v2735_v23 = vmul.f32 -1.442695, %v1874_v16 }
0x1d8f   :  { %v2736_v25 = vmul.f32 -1.442695, %v1875_v22 }
0x1d90   :  { %3218 = vpow2.f32 %v2735_v23 }
0x1d91   :  { %3220 = vpow2.f32 %v2736_v25 }
0x1d92   :  { %3222 = vtanh.f32 %v1875_v22 }
0x1d9a   :  { %v3219_v31 = vpop.eup %3218 }
0x1d9b   :  { %v3221_v33 = vpop.eup %3220  ;;  %v1882_v34 = vadd.f32 1.0, %v3219_v31 }
0x1d9c   :  { %v1883_v2 = vadd.f32 1.0, %v3221_v33  ;;  %v3223_v35 = vpop.eup %3222 }
0x1d9e   :  { %3224 = vrcp.f32 %v1883_v2 }
0x1d9f   :  { %3226 = vrcp.f32 %v1882_v34 }
0x1da8   :  { %v3225_v10 = vpop.eup %3224 }
0x1da9   :  { %v3227_v4 = vpop.eup %3226  ;;  %v1891_v11 = vsel %vm364_vm1, %v3223_v35, %v3225_v10 }
0x1daa   :  { %v1899_v8 = vmul.f32 %v3227_v4, %v1891_v11  ;;  %v1898_v9 = vmul.f32 %v3227_v4, %v1896_v6  ;;  %v2034_v6 = vld [vmem:[#allocation6 + $0x58] sm:$0xff] }
0x1dac   :  { %1901 = vrot.lane.b32.xlu0 %v1899_v8, %s3373_s3 }
0x1e1e   :  { %v1902_v3 = vpop.permute.xlu0 %1901 }
0x1e1f   :  { %v1904_v7 = vadd.f32 %v1902_v3, %v1898_v9 }
0x1e21   :  { %1906 = vrot.lane.b32.xlu1 %v1904_v7, %s3373_s3 }
0x1e93   :  { %v1907_v36 = vpop.permute.xlu1 %1906 }
0x1e94   :  { %v1909_v37 = vmul.f32 %v1907_v36, %v1893_v5 }
0x1e96   :  { %3228 = vtanh.f32 %v1909_v37 }
0x1ea0   :  { %v3229_v40 = vpop.eup %3228 }
0x1ea1   :  { %1912 = vrot.lane.b32.xlu0 %v3229_v40, %s3373_s3 }
0x1ea5   :  { %2036 = vrot.lane.b32.xlu0 %v1909_v37, %s3373_s3 }
0x1f13   :  { %v1913_v41 = vpop.permute.xlu0 %1912 }
0x1f14   :  { %v1915_v42 = vmul.f32 %v1913_v41, %v1891_v11  ;;  %v287_v41 = vadd.f32 %v3638_v14, %v3657_v29 }
0x1f16   :  { %1917 = vrot.lane.b32.xlu1 %v1915_v42, %s3373_s3  ;;  %v289_v42 = vadd.f32 %v3640_v15, %v3659_v30 }
0x1f17   :  { %v2037_v10 = vpop.permute.xlu0 %2036 }
0x1f88   :  { %v1918_v43 = vpop.permute.xlu1 %1917 }
0x1f89   :  { %v3896_v48 = vmul.f32 %v1918_v43, %v1893_v5 }
0x1f8b   :  { %2737 = vmatmul.mubr.msk.f32.vlgmr.msra.gmra.mrb[10].mxu0 %vm99_vm0, %v3896_v48 }
0x1f8c   :  { %2963 = vmatpush1.bf16.msra.mxu0 %v3489_v27  ;;  %2149 = vmatprep.mubr.f32.mxu0 %v3372_v0 }
0x1f8d   :  { %2965 = vmatprep.subr.bf16.mxu0 %v3494_v32 }
0x1f90   :  { %2967 = vmatpush1.bf16.msra.mxu0 %v3499_v38 }
0x1f91   :  { %2969 = vmatprep.subr.bf16.mxu0 %v3501_v39 }
0x1f94   :  { %2971 = vmatpush1.bf16.msra.mxu0 %v3508_v45 }
0x1f95   :  { %2973 = vmatprep.subr.bf16.mxu0 %v3511_v46 }
0x1f98   :  { %2975 = vmatpush1.bf16.msra.mxu0 %v3521_v50 }
0x1f99   :  { %2977 = vmatprep.subr.bf16.mxu0 %v3484_v24 }
0x205e   :  { %v2010_v53 = vpop.f32.mrb[10].mxu0 }
0x205f   :  { %v2015_v62 = vadd.f32 %v2010_v53, %v281_v49  ;;  %v2012_v63 = vpop.f32.mrb[11].mxu0 }
0x2060   :  { %v2016_v16 = vadd.f32 %v2012_v63, %v283_v51 }
0x2061   :  { %v2738_v19 = vmul.f32 -1.442695, %v2015_v62 }
0x2062   :  { %v2739_v22 = vmul.f32 -1.442695, %v2016_v16 }
0x2063   :  { %3230 = vpow2.f32 %v2738_v19 }
0x2064   :  { %3232 = vpow2.f32 %v2739_v22 }
0x2065   :  { %3234 = vtanh.f32 %v2016_v16 }
0x206d   :  { %v3231_v23 = vpop.eup %3230 }
0x206e   :  { %v3233_v25 = vpop.eup %3232  ;;  %v2023_v31 = vadd.f32 1.0, %v3231_v23 }
0x206f   :  { %v2024_v33 = vadd.f32 1.0, %v3233_v25  ;;  %v3235_v34 = vpop.eup %3234 }
0x2071   :  { %3236 = vrcp.f32 %v2024_v33 }
0x2072   :  { %3238 = vrcp.f32 %v2023_v31 }
0x207b   :  { %v3237_v12 = vpop.eup %3236 }
0x207c   :  { %v3239_v2 = vpop.eup %3238  ;;  %v2032_v13 = vsel %vm364_vm1, %v3235_v34, %v3237_v12 }
0x207d   :  { %v2040_v35 = vmul.f32 %v3239_v2, %v2032_v13  ;;  %v2039_v4 = vmul.f32 %v3239_v2, %v2037_v10 }
0x207f   :  { %2042 = vrot.lane.b32.xlu1 %v2040_v35, %s3373_s3  ;;  %v2175_v35 = vld [vmem:[#allocation6 + $0x60] sm:$0xff] }
0x20f1   :  { %v2043_v11 = vpop.permute.xlu1 %2042 }
0x20f2   :  { %v2045_v8 = vadd.f32 %v2043_v11, %v2039_v4 }
0x20f4   :  { %2047 = vrot.lane.b32.xlu0 %v2045_v8, %s3373_s3 }
0x2166   :  { %v2048_v9 = vpop.permute.xlu0 %2047 }
0x2167   :  { %v2050_v3 = vmul.f32 %v2048_v9, %v2034_v6 }
0x2169   :  { %3240 = vtanh.f32 %v2050_v3 }
0x2173   :  { %v3241_v7 = vpop.eup %3240 }
0x2174   :  { %2053 = vrot.lane.b32.xlu1 %v3241_v7, %s3373_s3  ;;  %v293_v7 = vadd.f32 %v3642_v17, %v3657_v29 }
0x2178   :  { %2177 = vrot.lane.b32.xlu1 %v2050_v3, %s3373_s3 }
0x21e6   :  { %v2054_v5 = vpop.permute.xlu1 %2053 }
0x21e7   :  { %v2056_v36 = vmul.f32 %v2054_v5, %v2032_v13  ;;  %v295_v5 = vadd.f32 %v3644_v18, %v3659_v30 }
0x21e9   :  { %2058 = vrot.lane.b32.xlu0 %v2056_v36, %s3373_s3 }
0x21ea   :  { %v2178_v34 = vpop.permute.xlu1 %2177 }
0x225b   :  { %v2059_v37 = vpop.permute.xlu0 %2058 }
0x225c   :  { %v3920_v40 = vmul.f32 %v2059_v37, %v2034_v6 }
0x225e   :  { %2740 = vmatmul.mubr.msk.f32.vlgmr.msra.gmra.mrb[12].mxu0 %vm99_vm0, %v3920_v40 }
0x225f   :  { %2979 = vmatpush1.bf16.msra.mxu0 %v3489_v27  ;;  %2290 = vmatprep.mubr.f32.mxu0 %v3372_v0 }
0x2260   :  { %2981 = vmatprep.subr.bf16.mxu0 %v3494_v32 }
0x2263   :  { %2983 = vmatpush1.bf16.msra.mxu0 %v3499_v38 }
0x2264   :  { %2985 = vmatprep.subr.bf16.mxu0 %v3501_v39 }
0x2267   :  { %2987 = vmatpush1.bf16.msra.mxu0 %v3508_v45 }
0x2268   :  { %2989 = vmatprep.subr.bf16.mxu0 %v3511_v46 }
0x226b   :  { %2991 = vmatpush1.bf16.msra.mxu0 %v3521_v50 }
0x226c   :  { %2993 = vmatprep.subr.bf16.mxu0 %v3484_v24 }
0x2331   :  { %v2151_v43 = vpop.f32.mrb[12].mxu0 }
0x2332   :  { %v2156_v49 = vadd.f32 %v2151_v43, %v287_v41  ;;  %v2153_v51 = vpop.f32.mrb[13].mxu0 }
0x2333   :  { %v2157_v53 = vadd.f32 %v2153_v51, %v289_v42 }
0x2334   :  { %v2741_v62 = vmul.f32 -1.442695, %v2156_v49 }
0x2335   :  { %v2742_v63 = vmul.f32 -1.442695, %v2157_v53 }
0x2336   :  { %3242 = vpow2.f32 %v2741_v62 }
0x2337   :  { %3244 = vpow2.f32 %v2742_v63 }
0x2338   :  { %3246 = vtanh.f32 %v2157_v53 }
0x2340   :  { %v3243_v16 = vpop.eup %3242 }
0x2341   :  { %v3245_v19 = vpop.eup %3244  ;;  %v2164_v22 = vadd.f32 1.0, %v3243_v16 }
0x2342   :  { %v2165_v23 = vadd.f32 1.0, %v3245_v19  ;;  %v3247_v25 = vpop.eup %3246 }
0x2344   :  { %3248 = vrcp.f32 %v2165_v23 }
0x2345   :  { %3250 = vrcp.f32 %v2164_v22 }
0x234e   :  { %v3249_v14 = vpop.eup %3248 }
0x234f   :  { %v3251_v31 = vpop.eup %3250  ;;  %v2173_v15 = vsel %vm364_vm1, %v3247_v25, %v3249_v14 }
0x2350   :  { %v2181_v33 = vmul.f32 %v3251_v31, %v2173_v15  ;;  %v2180_v12 = vmul.f32 %v3251_v31, %v2178_v34  ;;  %v2316_v31 = vld [vmem:[#allocation6 + $0x68] sm:$0xff] }
0x2352   :  { %2183 = vrot.lane.b32.xlu0 %v2181_v33, %s3373_s3 }
0x23c4   :  { %v2184_v2 = vpop.permute.xlu0 %2183 }
0x23c5   :  { %v2186_v13 = vadd.f32 %v2184_v2, %v2180_v12 }
0x23c7   :  { %2188 = vrot.lane.b32.xlu1 %v2186_v13, %s3373_s3 }
0x2439   :  { %v2189_v10 = vpop.permute.xlu1 %2188 }
0x243a   :  { %v2191_v4 = vmul.f32 %v2189_v10, %v2175_v35  ;;  %v299_v10 = vadd.f32 %v3646_v20, %v3657_v29 }
0x243c   :  { %3252 = vtanh.f32 %v2191_v4 }
0x2446   :  { %v3253_v11 = vpop.eup %3252 }
0x2447   :  { %2194 = vrot.lane.b32.xlu0 %v3253_v11, %s3373_s3 }
0x244b   :  { %2318 = vrot.lane.b32.xlu0 %v2191_v4, %s3373_s3 }
0x24b9   :  { %v2195_v8 = vpop.permute.xlu0 %2194 }
0x24ba   :  { %v2197_v6 = vmul.f32 %v2195_v8, %v2173_v15 }
0x24bc   :  { %2199 = vrot.lane.b32.xlu1 %v2197_v6, %s3373_s3 }
0x24bd   :  { %v2319_v22 = vpop.permute.xlu0 %2318 }
0x252e   :  { %v2200_v9 = vpop.permute.xlu1 %2199 }
0x252f   :  { %v3944_v3 = vmul.f32 %v2200_v9, %v2175_v35 }
0x2531   :  { %2743 = vmatmul.mubr.msk.f32.vlgmr.msra.gmra.mrb[14].mxu0 %vm99_vm0, %v3944_v3 }
0x2532   :  { %2995 = vmatpush1.bf16.msra.mxu0 %v3489_v27  ;;  %2431 = vmatprep.mubr.f32.mxu0 %v3372_v0 }
0x2533   :  { %2997 = vmatprep.subr.bf16.mxu0 %v3494_v32 }
0x2536   :  { %2999 = vmatpush1.bf16.msra.mxu0 %v3499_v38 }
0x2537   :  { %3001 = vmatprep.subr.bf16.mxu0 %v3501_v39 }
0x253a   :  { %3003 = vmatpush1.bf16.msra.mxu0 %v3508_v45 }
0x253b   :  { %3005 = vmatprep.subr.bf16.mxu0 %v3511_v46 }
0x253e   :  { %3007 = vmatpush1.bf16.msra.mxu0 %v3521_v50 }
0x253f   :  { %3009 = vmatprep.subr.bf16.mxu0 %v3484_v24 }
0x2604   :  { %v2292_v36 = vpop.f32.mrb[14].mxu0 }
0x2605   :  { %v2297_v37 = vadd.f32 %v2292_v36, %v293_v7  ;;  %v2294_v41 = vpop.f32.mrb[15].mxu0 }
0x2606   :  { %v2298_v42 = vadd.f32 %v2294_v41, %v295_v5 }
0x2607   :  { %v2744_v43 = vmul.f32 -1.442695, %v2297_v37 }
0x2608   :  { %v2745_v49 = vmul.f32 -1.442695, %v2298_v42 }
0x2609   :  { %3254 = vpow2.f32 %v2744_v43 }
0x260a   :  { %3256 = vpow2.f32 %v2745_v49 }
0x260b   :  { %3258 = vtanh.f32 %v2298_v42  ;;  %v2457_v42 = vld [vmem:[#allocation6 + $0x70] sm:$0xff] }
0x2613   :  { %v3255_v51 = vpop.eup %3254 }
0x2614   :  { %v3257_v53 = vpop.eup %3256  ;;  %v2305_v62 = vadd.f32 1.0, %v3255_v51 }
0x2615   :  { %v2306_v63 = vadd.f32 1.0, %v3257_v53  ;;  %v3259_v24 = vpop.eup %3258  ;;  %v3995_v53 = vld [vmem:[%s4199_s4] ss:$0 sm:$0xff] }
0x2617   :  { %3260 = vrcp.f32 %v2306_v63 }
0x2618   :  { %3262 = vrcp.f32 %v2305_v62  ;;  %v494_v62 = vmul.f32 %v3995_v53, %v3676_v1 }
0x261a   :  { %v496_v63 = vsel %vm495_vm2, %v494_v62, 0.0 }
0x2621   :  { %v3261_v17 = vpop.eup %3260 }
0x2622   :  { %v3263_v16 = vpop.eup %3262  ;;  %v2314_v18 = vsel %vm364_vm1, %v3259_v24, %v3261_v17  ;;  %v638_v24 = vmul.f32 %v3995_v53, %v3698_v60 }
0x2623   :  { %v2322_v19 = vmul.f32 %v3263_v16, %v2314_v18  ;;  %v2321_v23 = vmul.f32 %v3263_v16, %v2319_v22 }
0x2624   :  { %v639_v17 = vsel %vm495_vm2, %v638_v24, 0.0 }
0x2625   :  { %2324 = vrot.lane.b32.xlu1 %v2322_v19, %s3373_s3 }
0x2697   :  { %v2325_v25 = vpop.permute.xlu1 %2324 }
0x2698   :  { %v2327_v14 = vadd.f32 %v2325_v25, %v2321_v23 }
0x269a   :  { %2329 = vrot.lane.b32.xlu0 %v2327_v14, %s3373_s3 }
0x270c   :  { %v2330_v15 = vpop.permute.xlu0 %2329 }
0x270d   :  { %v2332_v33 = vmul.f32 %v2330_v15, %v2316_v31  ;;  %v781_v15 = vmul.f32 %v3995_v53, %v3720_v57 }
0x270f   :  { %3264 = vtanh.f32 %v2332_v33 }
0x2719   :  { %v3265_v34 = vpop.eup %3264 }
0x271a   :  { %2335 = vrot.lane.b32.xlu1 %v3265_v34, %s3373_s3  ;;  %v924_v34 = vmul.f32 %v3995_v53, %v3742_v55 }
0x271e   :  { %2459 = vrot.lane.b32.xlu1 %v2332_v33, %s3373_s3  ;;  %v782_v33 = vsel %vm495_vm2, %v781_v15, 0.0 }
0x278c   :  { %v2336_v12 = vpop.permute.xlu1 %2335 }
0x278d   :  { %v2338_v2 = vmul.f32 %v2336_v12, %v2314_v18  ;;  %v925_v12 = vsel %vm495_vm2, %v924_v34, 0.0 }
0x278f   :  { %2340 = vrot.lane.b32.xlu0 %v2338_v2, %s3373_s3 }
0x2790   :  { %v2460_v5 = vpop.permute.xlu1 %2459 }
0x2801   :  { %v2341_v13 = vpop.permute.xlu0 %2340 }
0x2802   :  { %v3968_v35 = vmul.f32 %v2341_v13, %v2316_v31 }
0x2804   :  { %2746 = vmatmul.mubr.msk.f32.vlgmr.msra.gmra.mrb[16].mxu0 %vm99_vm0, %v3968_v35 }
0x2805   :  { %3011 = vmatpush1.bf16.msra.mxu0 %v3489_v27  ;;  %2572 = vmatprep.mubr.f32.mxu0 %v3372_v0  ;;  %v301_v27 = vadd.f32 %v3648_v21, %v3659_v30 }
0x2806   :  { %3013 = vmatprep.subr.bf16.mxu0 %v3494_v32 }
0x2809   :  { %3015 = vmatpush1.bf16.msra.mxu0 %v3499_v38 }
0x280a   :  { %3017 = vmatprep.subr.bf16.mxu0 %v3501_v39 }
0x280d   :  { %3019 = vmatpush1.bf16.msra.mxu0 %v3508_v45 }
0x280e   :  { %3021 = vmatprep.subr.bf16.mxu0 %v3511_v46 }
0x2811   :  { %3023 = vmatpush1.bf16.msra.mxu0 %v3521_v50 }
0x28d7   :  { %v2433_v4 = vpop.f32.mrb[16].mxu0 }
0x28d8   :  { %v2438_v0 = vadd.f32 %v2433_v4, %v299_v10  ;;  %v2435_v11 = vpop.f32.mrb[17].mxu0 }
0x28d9   :  { %v2439_v32 = vadd.f32 %v2435_v11, %v301_v27 }
0x28da   :  { %v2747_v8 = vmul.f32 -1.442695, %v2438_v0 }
0x28db   :  { %v2748_v38 = vmul.f32 -1.442695, %v2439_v32 }
0x28dc   :  { %3266 = vpow2.f32 %v2747_v8 }
0x28dd   :  { %3268 = vpow2.f32 %v2748_v38 }
0x28de   :  { %3270 = vtanh.f32 %v2439_v32 }
0x28e6   :  { %v3267_v39 = vpop.eup %3266 }
0x28e7   :  { %v3269_v45 = vpop.eup %3268  ;;  %v2446_v6 = vadd.f32 1.0, %v3267_v39 }
0x28e8   :  { %v2447_v46 = vadd.f32 1.0, %v3269_v45  ;;  %v3271_v50 = vpop.eup %3270 }
0x28ea   :  { %3272 = vrcp.f32 %v2447_v46  ;;  %v307_v46 = vadd.f32 %v3655_v28, %v3659_v30 }
0x28eb   :  { %3274 = vrcp.f32 %v2446_v6  ;;  %v305_v6 = vadd.f32 %v3653_v26, %v3657_v29  ;;  %v1067_v26 = vmul.f32 %v3995_v53, %v3763_v54  ;;  %v1210_v29 = vmul.f32 %v3995_v53, %v3776_v56 }
0x28ed   :  { %v1068_v28 = vsel %vm495_vm2, %v1067_v26, 0.0  ;;  %v1211_v30 = vsel %vm495_vm2, %v1210_v29, 0.0 }
0x28f4   :  { %v3273_v20 = vpop.eup %3272 }
0x28f5   :  { %v3275_v9 = vpop.eup %3274  ;;  %v2455_v21 = vsel %vm364_vm1, %v3271_v50, %v3273_v20 }
0x28f6   :  { %v2463_v7 = vmul.f32 %v3275_v9, %v2455_v21  ;;  %v2462_v36 = vmul.f32 %v3275_v9, %v2460_v5 }
0x28f8   :  { %2465 = vrot.lane.b32.xlu0 %v2463_v7, %s3373_s3 }
0x296a   :  { %v2466_v37 = vpop.permute.xlu0 %2465 }
0x296b   :  { %v2468_v41 = vadd.f32 %v2466_v37, %v2462_v36 }
0x296d   :  { %2470 = vrot.lane.b32.xlu1 %v2468_v41, %s3373_s3 }
0x29df   :  { %v2471_v43 = vpop.permute.xlu1 %2470 }
0x29e0   :  { %v3988_v49 = vmul.f32 %v2471_v43, %v2457_v42 }
0x29e2   :  { %3276 = vtanh.f32 %v3988_v49 }
0x29ec   :  { %v3277_v51 = vpop.eup %3276 }
0x29ed   :  { %2476 = vrot.lane.b32.xlu0 %v3277_v51, %s3373_s3 }
0x2a0c   :  { %497 = vadd.xlane.f32.xlu0 %v496_v63 }
0x2a10   :  { %640 = vadd.xlane.f32.xlu0 %v639_v17 }
0x2a26   :  { %643 = vrot.lane.b32.xlu0 %v638_v24, %s3374_s19 }
0x2a5f   :  { %v2477_v16 = vpop.permute.xlu0 %2476 }
0x2a60   :  { %v2479_v18 = vmul.f32 %v2477_v16, %v2455_v21 }
0x2a62   :  { %2481 = vrot.lane.b32.xlu1 %v2479_v18, %s3373_s3 }
0x2a66   :  { %500 = vrot.lane.b32.xlu1 %v494_v62, %s3374_s19 }
0x2a99   :  { %v498_v1 = vpop.xlane.xlu0 %497 }
0x2a9a   :  { %v507_v57 = vsel %vm4203_vm3, %v498_v1, 0.0  ;;  %v1353_v1 = vmul.f32 %v3995_v53, %v3800_v59  ;;  %vm1510_vm3 = vcmp.eq.s32.totalorder %v3663_v44, 8 }
0x2a9d   :  { %v641_v19 = vpop.xlane.xlu0 %640 }
0x2a9e   :  { %v650_v55 = vsel %vm649_vm5, %v641_v19, 0.0  ;;  %v1354_v19 = vsel %vm495_vm2, %v1353_v1, 0.0 }
0x2aa1   :  { %v644_v14 = vpop.permute.xlu0 %643 }
0x2aa2   :  { %v646_v31 = vsel %vm495_vm2, %v644_v14, 0.0 }
0x2ad4   :  { %v2482_v22 = vpop.permute.xlu1 %2481 }
0x2ad5   :  { %v4006_v23 = vmul.f32 %v2482_v22, %v2457_v42  ;;  %v1496_v22 = vmul.f32 %v3995_v53, %v3824_v61 }
0x2ad7   :  { %2749 = vmatmul.mubr.msk.f32.vlgmr.msra.gmra.mrb[18].mxu0 %vm99_vm0, %v4006_v23  ;;  %vm1367_vm0 = vcmp.eq.s32.totalorder %v3663_v44, 9 }
0x2ad8   :  { %v501_v60 = vpop.permute.xlu1 %500 }
0x2ad9   :  { %v503_v25 = vsel %vm495_vm2, %v501_v60, 0.0  ;;  %v1497_v60 = vsel %vm495_vm2, %v1496_v22, 0.0 }
0x2ada   :  { %504 = vadd.xlane.f32.xlu1 %v503_v25 }
0x2ade   :  { %647 = vadd.xlane.f32.xlu1 %v646_v31  ;;  %v1639_v31 = vmul.f32 %v3995_v53, %v3848_v58 }
0x2ae0   :  { %v1640_v59 = vsel %vm495_vm2, %v1639_v31, 0.0 }
0x2ae2   :  { %783 = vadd.xlane.f32.xlu1 %v782_v33 }
0x2af3   :  { %786 = vrot.lane.b32.xlu1 %v781_v15, %s3374_s19 }
0x2b17   :  { %926 = vadd.xlane.f32.xlu1 %v925_v12 }
0x2b67   :  { %v505_v2 = vpop.xlane.xlu1 %504 }
0x2b68   :  { %v510_v13 = vsel %vm509_vm4, %v505_v2, 0.0 }
0x2b69   :  { %v511_v10 = vadd.f32 %v510_v13, %v507_v57 }
0x2b6b   :  { %v651_v27 = vadd.f32 %v650_v55, %v511_v10  ;;  %v648_v4 = vpop.xlane.xlu1 %647  ;;  %v4082_v10 = vmul.f32 %v3995_v53, %v3872_v52  ;;  %v1921_v52 = vmul.f32 %v3995_v53, %v3896_v48 }
0x2b6c   :  { %v653_v0 = vsel %vm652_vm6, %v648_v4, 0.0 }
0x2b6d   :  { %v654_v11 = vadd.f32 %v653_v0, %v651_v27  ;;  %v2062_v0 = vmul.f32 %v3995_v53, %v3920_v40 }
0x2b6f   :  { %v784_v32 = vpop.xlane.xlu1 %783 }
0x2b70   :  { %v793_v8 = vsel %vm792_vm7, %v784_v32, 0.0  ;;  %v2063_v32 = vsel %vm495_vm2, %v2062_v0, 0.0 }
0x2b71   :  { %v794_v38 = vadd.f32 %v793_v8, %v654_v11  ;;  %v1922_v11 = vsel %vm495_vm2, %v1921_v52, 0.0 }
0x2b73   :  { %v787_v39 = vpop.permute.xlu1 %786 }
0x2b74   :  { %v789_v45 = vsel %vm495_vm2, %v787_v39, 0.0 }
0x2b75   :  { %790 = vadd.xlane.f32.xlu0 %v789_v45 }
0x2b8b   :  { %929 = vrot.lane.b32.xlu0 %v924_v34, %s3374_s19 }
0x2ba4   :  { %v927_v42 = vpop.xlane.xlu1 %926 }
0x2ba5   :  { %v936_v54 = vsel %vm935_vm9, %v927_v42, 0.0 }
0x2baa   :  { %v2574_v50 = vpop.f32.mrb[18].mxu0 }
0x2bab   :  { %v2579_v20 = vadd.f32 %v2574_v50, %v305_v6  ;;  %v2576_v9 = vpop.f32.mrb[19].mxu0 }
0x2bac   :  { %v2580_v21 = vadd.f32 %v2576_v9, %v307_v46 }
0x2bad   :  { %v2750_v14 = vmul.f32 -1.442695, %v2579_v20 }
0x2bae   :  { %v2751_v25 = vmul.f32 -1.442695, %v2580_v21 }
0x2bb0   :  { %3278 = vpow2.f32 %v2751_v25  ;;  %v1781_v25 = vsel %vm495_vm2, %v4082_v10, 0.0 }
0x2bb1   :  { %3280 = vpow2.f32 %v2750_v14 }
0x2bba   :  { %v3279_v15 = vpop.eup %3278 }
0x2bbb   :  { %v2588_v33 = vadd.f32 1.0, %v3279_v15  ;;  %v3281_v34 = vpop.eup %3280 }
0x2bbc   :  { %v2587_v61 = vadd.f32 1.0, %v3281_v34 }
0x2bbd   :  { %3282 = vrcp.f32 %v2588_v33 }
0x2bbe   :  { %3284 = vtanh.f32 %v2580_v21 }
0x2bbf   :  { %3286 = vrcp.f32 %v2587_v61 }
0x2bc7   :  { %v3283_v12 = vpop.eup %3282 }
0x2bc8   :  { %v3285_v2 = vpop.eup %3284 }
0x2bc9   :  { %v4074_v57 = vsel %vm364_vm1, %v3285_v2, %v3283_v12  ;;  %v3287_v58 = vpop.eup %3286  ;;  %vm1507_vm1 = vcmp.eq.s32.totalorder %v3663_v44, 7 }
0x2bca   :  { %v2604_v13 = vmul.f32 %v3287_v58, %v4074_v57 }
0x2c02   :  { %v791_v7 = vpop.xlane.xlu0 %790 }
0x2c03   :  { %v796_v5 = vsel %vm795_vm8, %v791_v7, 0.0 }
0x2c04   :  { %v797_v36 = vadd.f32 %v796_v5, %v794_v38 }
0x2c06   :  { %v930_v37 = vpop.permute.xlu0 %929  ;;  %v937_v43 = vadd.f32 %v936_v54, %v797_v36 }
0x2c07   :  { %v932_v41 = vsel %vm495_vm2, %v930_v37, 0.0 }
0x2c08   :  { %933 = vadd.xlane.f32.xlu1 %v932_v41 }
0x2c0c   :  { %1069 = vadd.xlane.f32.xlu1 %v1068_v28 }
0x2c1d   :  { %1072 = vrot.lane.b32.xlu1 %v1067_v26, %s3374_s19 }
0x2c41   :  { %1212 = vadd.xlane.f32.xlu1 %v1211_v30 }
0x2c95   :  { %v934_v51 = vpop.xlane.xlu1 %933 }
0x2c96   :  { %v939_v62 = vsel %vm938_vm10, %v934_v51, 0.0 }
0x2c97   :  { %v940_v63 = vadd.f32 %v939_v62, %v937_v43 }
0x2c99   :  { %v1070_v56 = vpop.xlane.xlu1 %1069 }
0x2c9a   :  { %v1079_v24 = vsel %vm1078_vm11, %v1070_v56, 0.0 }
0x2c9b   :  { %v1080_v17 = vadd.f32 %v1079_v24, %v940_v63 }
0x2c9d   :  { %v1073_v16 = vpop.permute.xlu1 %1072 }
0x2c9e   :  { %v1075_v18 = vsel %vm495_vm2, %v1073_v16, 0.0 }
0x2c9f   :  { %1076 = vadd.xlane.f32.xlu0 %v1075_v18 }
0x2cb5   :  { %1215 = vrot.lane.b32.xlu0 %v1210_v29, %s3374_s19 }
0x2cce   :  { %v1213_v48 = vpop.xlane.xlu1 %1212 }
0x2ccf   :  { %v1222_v40 = vsel %vm1221_vm13, %v1213_v48, 0.0 }
0x2cd4   :  { %1355 = vadd.xlane.f32.xlu0 %v1354_v19 }
0x2cd8   :  { %1498 = vadd.xlane.f32.xlu0 %v1497_v60 }
0x2cee   :  { %1501 = vrot.lane.b32.xlu0 %v1496_v22, %s3374_s19 }
0x2d0d   :  { %1641 = vadd.xlane.f32.xlu0 %v1640_v59 }
0x2d23   :  { %2600 = vrot.lane.b32.xlu0 %v3988_v49, %s3373_s3 }
0x2d27   :  { %2606 = vrot.lane.b32.xlu0 %v2604_v13, %s3373_s3 }
0x2d2b   :  { %1785 = vrot.lane.b32.xlu0 %v4082_v10, %s3374_s19 }
0x2d2c   :  { %v1077_v47 = vpop.xlane.xlu0 %1076 }
0x2d2d   :  { %v1082_v55 = vsel %vm1081_vm12, %v1077_v47, 0.0 }
0x2d2e   :  { %v1083_v27 = vadd.f32 %v1082_v55, %v1080_v17  ;;  %v2203_v55 = vmul.f32 %v3995_v53, %v3944_v3 }
0x2d30   :  { %v1216_v49 = vpop.permute.xlu0 %1215  ;;  %v1223_v9 = vadd.f32 %v1222_v40, %v1083_v27 }
0x2d31   :  { %v1218_v4 = vsel %vm495_vm2, %v1216_v49, 0.0  ;;  %v2598_v49 = vld [vmem:[#allocation6 + $0x78] sm:$0xff] }
0x2d32   :  { %1219 = vadd.xlane.f32.xlu1 %v1218_v4 }
0x2d43   :  { %1358 = vrot.lane.b32.xlu1 %v1353_v1, %s3374_s19 }
0x2d4a   :  { %1923 = vadd.xlane.f32.xlu0 %v1922_v11 }
0x2d4e   :  { %2064 = vadd.xlane.f32.xlu0 %v2063_v32  ;;  %v2344_v32 = vmul.f32 %v3995_v53, %v3968_v35 }
0x2d50   :  { %v2345_v3 = vsel %vm495_vm2, %v2344_v32, 0.0 }
0x2d61   :  { %v1356_v8 = vpop.xlane.xlu0 %1355 }
0x2d62   :  { %v1365_v36 = vsel %vm1364_vm15, %v1356_v8, 0.0 }
0x2d64   :  { %2067 = vrot.lane.b32.xlu0 %v2062_v0, %s3374_s19  ;;  %v2204_v0 = vsel %vm495_vm2, %v2203_v55, 0.0 }
0x2d65   :  { %v1499_v38 = vpop.xlane.xlu0 %1498 }
0x2d66   :  { %v1508_v56 = vsel %vm1507_vm1, %v1499_v38, 0.0 }
0x2d69   :  { %v1502_v39 = vpop.permute.xlu0 %1501 }
0x2d6a   :  { %v1504_v28 = vsel %vm495_vm2, %v1502_v39, 0.0 }
0x2d9a   :  { %v1642_v45 = vpop.xlane.xlu0 %1641 }
0x2d9b   :  { %v1650_v1 = vsel %vm1510_vm3, %v1642_v45, 0.0 }
0x2d9e   :  { %v2601_v6 = vpop.permute.xlu0 %2600 }
0x2d9f   :  { %v2603_v46 = vmul.f32 %v3287_v58, %v2601_v6 }
0x2da2   :  { %v2607_v50 = vpop.permute.xlu0 %2606 }
0x2da3   :  { %v2609_v20 = vadd.f32 %v2607_v50, %v2603_v46 }
0x2da6   :  { %v1786_v29 = vpop.permute.xlu0 %1785 }
0x2da7   :  { %v1788_v14 = vsel %vm495_vm2, %v1786_v29, 0.0 }
0x2dbf   :  { %v1220_v21 = vpop.xlane.xlu1 %1219 }
0x2dc0   :  { %v1225_v7 = vsel %vm1224_vm14, %v1220_v21, 0.0 }
0x2dc1   :  { %v1226_v5 = vadd.f32 %v1225_v7, %v1223_v9 }
0x2dc3   :  { %v1359_v37 = vpop.permute.xlu1 %1358  ;;  %v1366_v41 = vadd.f32 %v1365_v36, %v1226_v5  ;;  %v2485_v5 = vmul.f32 %v3995_v53, %v4006_v23 }
0x2dc4   :  { %v1361_v26 = vsel %vm495_vm2, %v1359_v37, 0.0 }
0x2dc5   :  { %1362 = vadd.xlane.f32.xlu1 %v1361_v26  ;;  %v2486_v36 = vsel %vm495_vm2, %v2485_v5, 0.0 }
0x2dc9   :  { %1505 = vadd.xlane.f32.xlu1 %v1504_v28 }
0x2dd7   :  { %v1924_v30 = vpop.xlane.xlu0 %1923 }
0x2dd8   :  { %v1932_v13 = vsel %vm1224_vm14, %v1924_v30, 0.0 }
0x2dda   :  { %1644 = vrot.lane.b32.xlu1 %v1639_v31, %s3374_s19 }
0x2ddb   :  { %v2065_v42 = vpop.xlane.xlu0 %2064 }
0x2ddc   :  { %v2073_v50 = vsel %vm1081_vm12, %v2065_v42, 0.0 }
0x2ddf   :  { %v2068_v54 = vpop.permute.xlu0 %2067 }
0x2de0   :  { %v2070_v43 = vsel %vm495_vm2, %v2068_v54, 0.0 }
0x2de1   :  { %2071 = vadd.xlane.f32.xlu0 %v2070_v43 }
0x2e52   :  { %v1363_v51 = vpop.xlane.xlu1 %1362 }
0x2e53   :  { %v1368_v62 = vsel %vm1367_vm0, %v1363_v51, 0.0 }
0x2e54   :  { %v1369_v63 = vadd.f32 %v1368_v62, %v1366_v41 }
0x2e56   :  { %v1509_v24 = vadd.f32 %v1508_v56, %v1369_v63  ;;  %v1506_v17 = vpop.xlane.xlu1 %1505 }
0x2e57   :  { %v1511_v16 = vsel %vm1510_vm3, %v1506_v17, 0.0  ;;  %vm4204_vm3 = vcmp.eq.s32.totalorder %v3663_v44, 0 }
0x2e58   :  { %v1512_v18 = vadd.f32 %v1511_v16, %v1509_v24 }
0x2e5a   :  { %v1645_v19 = vpop.permute.xlu1 %1644  ;;  %v1651_v22 = vadd.f32 %v1650_v1, %v1512_v18 }
0x2e5b   :  { %v1647_v60 = vsel %vm495_vm2, %v1645_v19, 0.0 }
0x2e5c   :  { %1648 = vadd.xlane.f32.xlu1 %v1647_v60 }
0x2e60   :  { %1782 = vadd.xlane.f32.xlu1 %v1781_v25 }
0x2e64   :  { %1789 = vadd.xlane.f32.xlu1 %v1788_v14 }
0x2e6e   :  { %v2072_v8 = vpop.xlane.xlu0 %2071 }
0x2e6f   :  { %v2075_v35 = vsel %vm1078_vm11, %v2072_v8, 0.0 }
0x2e75   :  { %1926 = vrot.lane.b32.xlu1 %v1921_v52, %s3374_s19 }
0x2e79   :  { %2611 = vrot.lane.b32.xlu1 %v2609_v20, %s3373_s3 }
0x2ee9   :  { %v1649_v31 = vpop.xlane.xlu1 %1648 }
0x2eea   :  { %v1652_v59 = vsel %vm1507_vm1, %v1649_v31, 0.0 }
0x2eeb   :  { %v1653_v15 = vadd.f32 %v1652_v59, %v1651_v22  ;;  %v2641_v59 = vld [vmem:[%s4201_s6] sm:$0xff]  ;;  %s3375_s6 = smov [#allocation8]  }
0x2eec   :  { %s2663_s21 = sshll.u32 %s3375_s6, 4  ;;  %s2664_s21 = int_to_ptr.vmem [resolvable:$true] %s2663_s21 }
0x2eed   :  { %v1783_v33 = vpop.xlane.xlu1 %1782  ;;  %s3338_s22 = scalar_lea.vmem %s2664_s21, 128  ;;  %p3343_p3 = scmp.lt.s32.totalorder %s2664_s21, %s2664_s21 }
0x2eee   :  { %v1791_v34 = vsel %vm1367_vm0, %v1783_v33, 0.0  ;;  %p3339_p2 = scmp.ne.s32.totalorder %s2664_s21, %s3338_s22  ;;  %p3344_p4 = scmp.lt.s32.totalorder %s3338_s22, %s3338_s22 }
0x2eef   :  { %v1792_v61 = vadd.f32 %v1791_v34, %v1653_v15 }
0x2ef0   :  { %p3345_p5 = por %p3344_p4, %p3343_p3 }
0x2ef1   :  { %v1790_v12 = vpop.xlane.xlu1 %1789 }
0x2ef2   :  { %v1793_v2 = vsel %vm1364_vm15, %v1790_v12, 0.0  ;;  %p3346_p6 = pnand %p3345_p5, %p3339_p2 }
0x2ef3   :  { %v1794_v58 = vadd.f32 %v1793_v2, %v1792_v61 }
0x2ef5   :  { %v1927_v10 = vpop.permute.xlu1 %1926  ;;  %v1933_v47 = vadd.f32 %v1932_v13, %v1794_v58 }
0x2ef6   :  { %v1929_v27 = vsel %vm495_vm2, %v1927_v10, 0.0 }
0x2ef7   :  { %1930 = vadd.xlane.f32.xlu1 %v1929_v27 }
0x2ef9   :  { %v2612_v4 = vpop.permute.xlu1 %2611 }
0x2efa   :  { %v2614_v52 = vmul.f32 %v2612_v4, %v2598_v49 }
0x2efb   :  { %2205 = vadd.xlane.f32.xlu1 %v2204_v0 }
0x2efc   :  { %3288 = vtanh.f32 %v2614_v52 }
0x2f06   :  { %v3289_v11 = vpop.eup %3288 }
0x2f07   :  { %2617 = vrot.lane.b32.xlu0 %v3289_v11, %s3373_s3 }
0x2f0c   :  { %2208 = vrot.lane.b32.xlu1 %v2203_v55, %s3374_s19 }
0x2f26   :  { %2346 = vadd.xlane.f32.xlu0 %v2345_v3 }
0x2f79   :  { %v2618_v38 = vpop.permute.xlu0 %2617 }
0x2f7a   :  { %v2620_v39 = vmul.f32 %v2618_v38, %v4074_v57 }
0x2f7c   :  { %2622 = vrot.lane.b32.xlu0 %v2620_v39, %s3373_s3 }
0x2f84   :  { %v1931_v45 = vpop.xlane.xlu1 %1930 }
0x2f85   :  { %v1934_v6 = vsel %vm1221_vm13, %v1931_v45, 0.0 }
0x2f86   :  { %v1935_v46 = vadd.f32 %v1934_v6, %v1933_v47 }
0x2f88   :  { %v2074_v20 = vadd.f32 %v2073_v50, %v1935_v46  ;;  %v2206_v48 = vpop.xlane.xlu1 %2205 }
0x2f89   :  { %v2214_v9 = vsel %vm938_vm10, %v2206_v48, 0.0 }
0x2f8a   :  { %v2076_v40 = vadd.f32 %v2075_v35, %v2074_v20 }
0x2f8c   :  { %v2215_v57 = vadd.f32 %v2214_v9, %v2076_v40  ;;  %v2209_v21 = vpop.permute.xlu1 %2208 }
0x2f8d   :  { %v2211_v7 = vsel %vm495_vm2, %v2209_v21, 0.0 }
0x2f8e   :  { %2212 = vadd.xlane.f32.xlu1 %v2211_v7 }
0x2f9b   :  { %2487 = vadd.xlane.f32.xlu0 %v2486_v36 }
0x2f9f   :  { %2349 = vrot.lane.b32.xlu1 %v2344_v32, %s3374_s19 }
0x2fb3   :  { %v2347_v37 = vpop.xlane.xlu0 %2346 }
0x2fb4   :  { %v2355_v54 = vsel %vm795_vm8, %v2347_v37, 0.0 }
0x2fee   :  { %v2623_v41 = vpop.permute.xlu0 %2622 }
0x2fef   :  { %v2625_v26 = vmul.f32 %v2623_v41, %v2598_v49 }
0x2ff1   :  { %v2626_v28 = vmul.f32 %v3995_v53, %v2625_v26 }
0x2ff3   :  { %2631 = vrot.lane.b32.xlu0 %v2626_v28, %s3374_s19  ;;  %v2627_v29 = vsel %vm495_vm2, %v2626_v28, 0.0 }
0x3012   :  { %2628 = vadd.xlane.f32.xlu0 %v2627_v29 }
0x301b   :  { %v2213_v30 = vpop.xlane.xlu1 %2212 }
0x301c   :  { %v2216_v42 = vsel %vm935_vm9, %v2213_v30, 0.0 }
0x301d   :  { %v2217_v23 = vadd.f32 %v2216_v42, %v2215_v57 }
0x301f   :  { %v2350_v43 = vpop.permute.xlu1 %2349  ;;  %v2356_v51 = vadd.f32 %v2355_v54, %v2217_v23 }
0x3020   :  { %v2352_v62 = vsel %vm495_vm2, %v2350_v43, 0.0 }
0x3021   :  { %2353 = vadd.xlane.f32.xlu1 %v2352_v62 }
0x3028   :  { %v2488_v53 = vpop.xlane.xlu0 %2487 }
0x3029   :  { %v2496_v17 = vsel %vm652_vm6, %v2488_v53, 0.0  ;;  %vm2644_vm6 = vcmask 130048  }
0x3032   :  { %2490 = vrot.lane.b32.xlu1 %v2485_v5, %s3374_s19 }
0x3065   :  { %v2632_v19 = vpop.permute.xlu0 %2631 }
0x3066   :  { %v2634_v22 = vsel %vm495_vm2, %v2632_v19, 0.0 }
0x309f   :  { %v2629_v60 = vpop.xlane.xlu0 %2628 }
0x30a0   :  { %v2637_v15 = vsel %vm509_vm4, %v2629_v60, 0.0 }
0x30ae   :  { %v2354_v63 = vpop.xlane.xlu1 %2353 }
0x30af   :  { %v2357_v56 = vsel %vm792_vm7, %v2354_v63, 0.0 }
0x30b0   :  { %v2358_v24 = vadd.f32 %v2357_v56, %v2356_v51 }
0x30b2   :  { %v2491_v16 = vpop.permute.xlu1 %2490  ;;  %v2497_v18 = vadd.f32 %v2496_v17, %v2358_v24 }
0x30b3   :  { %v2493_v1 = vsel %vm495_vm2, %v2491_v16, 0.0  ;;  %vm2642_vm2 = vcmp.gt.f32.partialorder %v2641_v59, 0.0 }
0x30b4   :  { %2494 = vadd.xlane.f32.xlu1 %v2493_v1 }
0x30b8   :  { %2635 = vadd.xlane.f32.xlu1 %v2634_v22 }
0x3141   :  { %v2495_v25 = vpop.xlane.xlu1 %2494 }
0x3142   :  { %v2498_v14 = vsel %vm649_vm5, %v2495_v25, 0.0 }
0x3143   :  { %v2499_v31 = vadd.f32 %v2498_v14, %v2497_v18 }
0x3145   :  { %v2638_v33 = vadd.f32 %v2637_v15, %v2499_v31  ;;  %v2636_v34 = vpop.xlane.xlu1 %2635 }
0x3146   :  { %v2639_v61 = vsel %vm4204_vm3, %v2636_v34, 0.0 }
0x3147   :  { %v2640_v12 = vadd.f32 %v2639_v61, %v2638_v33 }
0x3149   :  { %v2643_v2 = vsel %vm2642_vm2, 1e-10, %v2640_v12 }
0x314a   :  { %v2645_v58 = vsel %vm2644_vm6, %v2643_v2, -inf }
0x314b   :  { %2646 = vmax.xlane.f32.xlu1 %v2645_v58 }
0x31d8   :  { %v2647_v13 = vpop.xlane.xlu1 %2646 }
0x31d9   :  { %v2648_v10 = vsub.f32 %v2643_v2, %v2647_v13 }
0x31db   :  { %v2649_v47 = vmul.f32 1.442695, %v2648_v10 }
0x31dd   :  { %3290 = vpow2.f32 %v2649_v47 }
0x31e7   :  { %v3291_v55 = vpop.eup %3290 }
0x31e8   :  { %v2651_v27 = vsel %vm2644_vm6, %v3291_v55, 0.0 }
0x31e9   :  { %2652 = vadd.xlane.f32.xlu1 %v2651_v27 }
0x3276   :  { %v2653_v49 = vpop.xlane.xlu1 %2652 }
0x3277   :  { %3292 = vrcp.f32 %v2653_v49 }
0x3281   :  { %v3293_v44 = vpop.eup %3292 }
0x3282   :  { %v2655_v4 = vmul.f32 %v3293_v44, %v3291_v55 }
0x3284   :  { %2656 = vst.msk [vmem:[#allocation8] sm:$0xff] %vm2644_vm6, %v2655_v4 }
0x3285   :  { %3349 = shalt.err (!%p3346_p6)
}
0x3286   :  { %s3350_s2 = scalar_lea.hbm %s4202_s7, 128 }
0x3287   :  { %p3351_p7 = scmp.ne.s32.totalorder %s4202_s7, %s3350_s2  ;;  %p3354_p8 = scmp.lt.u32.totalorder %s3350_s2, %s4202_s7 }
0x3289   :  { %p3356_p9 = pnand %p3354_p8, %p3351_p7 }
0x328b   :  { %3359 = shalt.err (!%p3356_p9)
}
0x328c   :  { %2666 = dma.vmem_to_hbm [thread:$0]  %s2664_s21, 128, %s4202_s7, [#allocation5]  }
0x328d   :  { %3364 = dma.done.wait [#allocation5], 128  }
0x328e   :  { %3365 = vsyncadd [#allocation5], 4294967168 }
0x328f   :  { %2670 = vsyncpa [#allocation4], 1 }
0x3290   :  { %2671 = vsyncpa [#allocation7], 1 }
0x3291   :  { %2672 = vsyncpa [#allocation5], 1 }

</bundles_post_ra>
